<compile_context>
chip_gen: v7x
topology: tpu7x:2x2x1
jax: 0.10.0
libtpu: 0.0.40
codegen_flags: <defaults>
</compile_context>

<pallas_src>
import jax
import jax.numpy as jnp
import numpy as np
from jax.experimental import pallas as pl
from jax.experimental.pallas import tpu as pltpu

# ----------------------------- configuration --------------------------------
B = 2                      # batch
T, H, W = 2, 4, 4
N = T * H * W + 1          # +1 cls token -> 33
NP = 40                    # N padded to a multiple of 8 (sublane alignment)
DIM = 32                   # input channels
DIM_OUT = 32               # output channels
NUM_HEADS = 4
HEAD_DIM = DIM_OUT // NUM_HEADS
SCALE = HEAD_DIM ** -0.5
HAS_CLS_EMBED = True
RESIDUAL_POOLING = True


# ------------------------------- kernel -------------------------------------
def _msa_kernel(x_ref, wq_ref, bq_ref, wk_ref, bk_ref, wv_ref, bv_ref,
                wproj_ref, bproj_ref, out_ref):
    """Single grid step. x_ref is (B*NP, DIM) with the batch folded into the
    sublane axis; per-head q/k/v weights are (NUM_HEADS, DIM, HEAD_DIM).
    Fuses qkv projection, per-(batch,head) scaled-dot-product attention with
    softmax, residual pooling, and the output projection."""
    x = x_ref[...]                                         # (B*NP, DIM)

    # Hoisted constants (built once per kernel invocation).
    # Additive key bias: 0 for valid key columns, -1e30 for padded ones.
    col = jax.lax.broadcasted_iota(jnp.int32, (1, NP), 1)
    key_bias = jnp.where(col < N, jnp.float32(0.0), jnp.float32(-1e30))   # (1, NP)
    # Residual pooling skips the cls row (row 0 of every batch block).
    row = jax.lax.broadcasted_iota(jnp.int32, (NP, 1), 0)
    res_mask = row >= 1                                    # (NP, 1)

    # Initialize the accumulator (= output block) with the projection bias.
    out_ref[...] = jnp.broadcast_to(bproj_ref[...], (B * NP, DIM_OUT))

    for h in range(NUM_HEADS):
        # Per-head projections over ALL folded batch rows (M = B*NP = 80).
        # wk/bk are pre-scaled by SCALE at parameter-prep time.
        q_h = jnp.dot(x, wq_ref[h], preferred_element_type=jnp.float32) + bq_ref[h]
        k_h = jnp.dot(x, wk_ref[h], preferred_element_type=jnp.float32) + bk_ref[h]
        v_h = jnp.dot(x, wv_ref[h], preferred_element_type=jnp.float32) + bv_ref[h]
        # Sublane slice of the projection weights (rows h*hd:(h+1)*hd, aligned).
        wp_h = wproj_ref[h * HEAD_DIM:(h + 1) * HEAD_DIM, :]              # (hd, DIM_OUT)

        for b in range(B):
            lo = b * NP                                    # static, multiple of 8
            sl = slice(lo, lo + NP)
            q = q_h[sl, :]                                 # (NP, hd)
            k = k_h[sl, :]
            v = v_h[sl, :]

            # attn = q @ k^T (scale already folded into k) without materializing
            # k.T: contract axis 1 of both operands inside the matmul.
            s = jax.lax.dot_general(q, k,
                                    dimension_numbers=(((1,), (1,)), ((), ())),
                                    preferred_element_type=jnp.float32)   # (NP, NP)
            s = s + key_bias
            # numerically-stable softmax along the key axis
            s = s - jnp.max(s, axis=-1, keepdims=True)
            p = jnp.exp(s)
            p = p * pl.reciprocal(jnp.sum(p, axis=-1, keepdims=True), approx=True)

            o = jnp.dot(p, v, preferred_element_type=jnp.float32)         # (NP, hd)

            if RESIDUAL_POOLING:
                if HAS_CLS_EMBED:
                    # x[:, :, 1:, :] += q[:, :, 1:, :]  (skip the cls row)
                    o = jnp.where(res_mask, o + q, o)
                else:
                    o = o + q

            # Fused output projection: concat-over-heads followed by (.)@Wproj
            # equals summing per-head o_h @ Wproj[h*hd:(h+1)*hd, :].
            out_ref[sl, :] = out_ref[sl, :] + jnp.dot(
                o, wp_h, preferred_element_type=jnp.float32)


# ------------------------------- wrapper -------------------------------------
@jax.jit
def _msa_pallas(x2, wq, bq, wk, bk, wv, bv, wproj, bproj):
    """Hot path: a single pallas_call on the padded, batch-folded layout."""
    const3 = lambda i: (0, 0, 0)
    const2 = lambda i: (0, 0)
    return pl.pallas_call(
        _msa_kernel,
        out_shape=jax.ShapeDtypeStruct((B * NP, DIM_OUT), jnp.float32),
        grid_spec=pl.GridSpec(
            grid=(1,),
            in_specs=[
                pl.BlockSpec((B * NP, DIM), const2),
                pl.BlockSpec((NUM_HEADS, DIM, HEAD_DIM), const3),
                pl.BlockSpec((NUM_HEADS, 1, HEAD_DIM), const3),
                pl.BlockSpec((NUM_HEADS, DIM, HEAD_DIM), const3),
                pl.BlockSpec((NUM_HEADS, 1, HEAD_DIM), const3),
                pl.BlockSpec((NUM_HEADS, DIM, HEAD_DIM), const3),
                pl.BlockSpec((NUM_HEADS, 1, HEAD_DIM), const3),
                pl.BlockSpec((DIM_OUT, DIM_OUT), const2),
                pl.BlockSpec((1, DIM_OUT), const2),
            ],
            out_specs=pl.BlockSpec((B * NP, DIM_OUT), const2),
        ),
        compiler_params=pltpu.CompilerParams(
            dimension_semantics=("arbitrary",)),
    )(x2, wq, bq, wk, bk, wv, bv, wproj, bproj)


def prepare_kernel_params(wqkv_t, bqkv, wproj_t, bproj):
    """One-time parameter prep (outside the hot path): split q/k/v per head and
    fold the attention SCALE into the K weights/bias.

    Column layout of wqkv_t / bqkv follows PyTorch's
    reshape(B,N,3,nh,hd).permute(2,0,3,1,4): q cols [0,DIM_OUT), k cols
    [DIM_OUT,2*DIM_OUT), v cols [2*DIM_OUT,3*DIM_OUT); within each block head h
    owns cols [h*hd,(h+1)*hd)."""
    def split_w(w):   # (DIM, DIM_OUT) -> (NUM_HEADS, DIM, HEAD_DIM)
        return jnp.transpose(w.reshape(DIM, NUM_HEADS, HEAD_DIM), (1, 0, 2))

    def split_b(b):   # (1, DIM_OUT) -> (NUM_HEADS, 1, HEAD_DIM)
        return jnp.transpose(b.reshape(1, NUM_HEADS, HEAD_DIM), (1, 0, 2))

    wq = wqkv_t[:, 0 * DIM_OUT:1 * DIM_OUT]
    wk = wqkv_t[:, 1 * DIM_OUT:2 * DIM_OUT] * SCALE
    wv = wqkv_t[:, 2 * DIM_OUT:3 * DIM_OUT]
    bq = bqkv[:, 0 * DIM_OUT:1 * DIM_OUT]
    bk = bqkv[:, 1 * DIM_OUT:2 * DIM_OUT] * SCALE
    bv = bqkv[:, 2 * DIM_OUT:3 * DIM_OUT]
    return {
        "wq": split_w(wq), "bq": split_b(bq),
        "wk": split_w(wk), "bk": split_b(bk),
        "wv": split_w(wv), "bv": split_b(bv),
        "wproj": wproj_t, "bproj": bproj,
    }


def multi_scale_attention_forward(x, thw_shape, kparams):
    """Mirrors MultiScaleAttention.forward: returns (out, q_shape).
    Pad/unpad bracket the kernel call (layout boundary); in a real pipeline the
    NP=40 padded, batch-folded layout would be kept end-to-end."""
    x2 = jnp.pad(x, ((0, 0), (0, NP - N), (0, 0))).reshape(B * NP, DIM)
    out2 = _msa_pallas(x2, kparams["wq"], kparams["bq"], kparams["wk"],
                       kparams["bk"], kparams["wv"], kparams["bv"],
                       kparams["wproj"], kparams["bproj"])
    out = out2.reshape(B, NP, DIM_OUT)[:, :N, :]
    q_shape = list(thw_shape)   # no pooling in this config
    return out, q_shape


# --------------------------- pure-JAX reference -------------------------------
def reference_forward(x, wqkv_t, bqkv, wproj_t, bproj):
    Bx, Nx, _ = x.shape
    qkv = (x @ wqkv_t + bqkv).reshape(Bx, Nx, 3, NUM_HEADS, HEAD_DIM)
    qkv = jnp.transpose(qkv, (2, 0, 3, 1, 4))          # (3, B, nh, N, hd)
    q, k, v = qkv[0], qkv[1], qkv[2]
    attn = (q * SCALE) @ jnp.swapaxes(k, -2, -1)
    attn = jax.nn.softmax(attn, axis=-1)
    o = attn @ v
    if RESIDUAL_POOLING:
        if HAS_CLS_EMBED:
            o = o.at[:, :, 1:, :].add(q[:, :, 1:, :])
        else:
            o = o + q
    o = jnp.swapaxes(o, 1, 2).reshape(Bx, Nx, DIM_OUT)
    return o @ wproj_t + bproj


# ---------------------------------- main --------------------------------------
if __name__ == "__main__":
    key = jax.random.PRNGKey(0)
    kx, kqkv, kbq, kproj, kbp = jax.random.split(key, 5)

    x = jax.random.normal(kx, (B, N, DIM), dtype=jnp.float32)

    # Deterministic synthetic parameters (same shapes as the nn.Module's layers,
    # stored pre-transposed so the kernel right-multiplies).
    wqkv_t = 0.05 * jax.random.normal(kqkv, (DIM, 3 * DIM_OUT), jnp.float32)
    bqkv = 0.01 * jax.random.normal(kbq, (1, 3 * DIM_OUT), jnp.float32)
    wproj_t = 0.05 * jax.random.normal(kproj, (DIM_OUT, DIM_OUT), jnp.float32)
    bproj = 0.01 * jax.random.normal(kbp, (1, DIM_OUT), jnp.float32)

    kparams = prepare_kernel_params(wqkv_t, bqkv, wproj_t, bproj)
    kparams = jax.tree_util.tree_map(jax.block_until_ready, kparams)  # setup done

    out, q_shape = multi_scale_attention_forward(x, [T, H, W], kparams)
    out = jax.block_until_ready(out)

    ref = reference_forward(x, wqkv_t, bqkv, wproj_t, bproj)
    ref = jax.block_until_ready(ref)

    assert out.shape == (B, N, DIM_OUT)
    assert q_shape == [T, H, W]
    # tolerance relaxed slightly for the approx (EUP) softmax reciprocal
    np.testing.assert_allclose(np.asarray(out), np.asarray(ref),
                               rtol=2e-3, atol=2e-3)
    print("KERNEL_OK")
</pallas_src>

<mosaic_0001>
module attributes {stable_mosaic.version = 11 : i64} {
  func.func @_msa_kernel(%arg0: i32, %arg1: memref<80x32xf32, #tpu.memory_space<vmem>>, %arg2: memref<4x32x8xf32, #tpu.memory_space<vmem>>, %arg3: memref<4x1x8xf32, #tpu.memory_space<vmem>>, %arg4: memref<4x32x8xf32, #tpu.memory_space<vmem>>, %arg5: memref<4x1x8xf32, #tpu.memory_space<vmem>>, %arg6: memref<4x32x8xf32, #tpu.memory_space<vmem>>, %arg7: memref<4x1x8xf32, #tpu.memory_space<vmem>>, %arg8: memref<32x32xf32, #tpu.memory_space<vmem>>, %arg9: memref<1x32xf32, #tpu.memory_space<vmem>>, %arg10: memref<80x32xf32, #tpu.memory_space<vmem>>) attributes {dimension_semantics = [#tpu.dimension_semantics<arbitrary>], iteration_bounds = array<i64: 1>, scalar_prefetch = 0 : i64, scratch_operands = 0 : i64, tpu.core_type = #tpu.core_type<tc>, window_params = [{pipeline_mode = #tpu.pipeline_mode<synchronous>, transform_indices = @transform_0, window_bounds = array<i64: 80, 32>}, {pipeline_mode = #tpu.pipeline_mode<synchronous>, transform_indices = @transform_1, window_bounds = array<i64: 4, 32, 8>}, {pipeline_mode = #tpu.pipeline_mode<synchronous>, transform_indices = @transform_2, window_bounds = array<i64: 4, 1, 8>}, {pipeline_mode = #tpu.pipeline_mode<synchronous>, transform_indices = @transform_3, window_bounds = array<i64: 4, 32, 8>}, {pipeline_mode = #tpu.pipeline_mode<synchronous>, transform_indices = @transform_4, window_bounds = array<i64: 4, 1, 8>}, {pipeline_mode = #tpu.pipeline_mode<synchronous>, transform_indices = @transform_5, window_bounds = array<i64: 4, 32, 8>}, {pipeline_mode = #tpu.pipeline_mode<synchronous>, transform_indices = @transform_6, window_bounds = array<i64: 4, 1, 8>}, {pipeline_mode = #tpu.pipeline_mode<synchronous>, transform_indices = @transform_7, window_bounds = array<i64: 32, 32>}, {pipeline_mode = #tpu.pipeline_mode<synchronous>, transform_indices = @transform_8, window_bounds = array<i64: 1, 32>}, {pipeline_mode = #tpu.pipeline_mode<synchronous>, transform_indices = @transform_9, window_bounds = array<i64: 80, 32>}]} {
    %c0 = arith.constant 0 : index
    %c0_0 = arith.constant 0 : index
    %0 = vector.load %arg1[%c0, %c0_0] : memref<80x32xf32, #tpu.memory_space<vmem>>, vector<80x32xf32>
    %1 = tpu.iota {dimensions = array<i32: 1>} : vector<1x40xi32>
    %c33_i32 = arith.constant 33 : i32
    %2 = vector.broadcast %c33_i32 : i32 to vector<1x40xi32>
    %3 = arith.cmpi slt, %1, %2 : vector<1x40xi32>
    %cst = arith.constant 0.000000e+00 : f32
    %cst_1 = arith.constant -1.000000e+30 : f32
    %4 = vector.broadcast %cst : f32 to vector<1x40xf32>
    %5 = vector.broadcast %cst_1 : f32 to vector<1x40xf32>
    %6 = arith.select %3, %4, %5 : vector<1x40xi1>, vector<1x40xf32>
    %7 = tpu.iota {dimensions = array<i32: 0>} : vector<40x1xi32>
    %c1_i32 = arith.constant 1 : i32
    %8 = vector.broadcast %c1_i32 : i32 to vector<40x1xi32>
    %9 = arith.cmpi sge, %7, %8 : vector<40x1xi32>
    %c0_2 = arith.constant 0 : index
    %c0_3 = arith.constant 0 : index
    %10 = vector.load %arg9[%c0_2, %c0_3] : memref<1x32xf32, #tpu.memory_space<vmem>>, vector<1x32xf32>
    %11 = vector.shape_cast %10 : vector<1x32xf32> to vector<1x32xf32>
    %12 = vector.broadcast %11 : vector<1x32xf32> to vector<80x32xf32>
    %c0_4 = arith.constant 0 : index
    %c0_5 = arith.constant 0 : index
    %13 = vector.load %arg10[%c0_4, %c0_5] : memref<80x32xf32, #tpu.memory_space<vmem>>, vector<80x32xf32>
    tpu.vector_store %arg10[%c0_4, %c0_5], %12 {strides = array<i32>} : memref<80x32xf32, #tpu.memory_space<vmem>>, vector<80x32xf32>,
    %c0_6 = arith.constant 0 : index
    %c0_7 = arith.constant 0 : index
    %c0_8 = arith.constant 0 : index
    %14 = vector.load %arg2[%c0_6, %c0_7, %c0_8] : memref<4x32x8xf32, #tpu.memory_space<vmem>>, vector<1x32x8xf32>
    %15 = vector.shape_cast %14 : vector<1x32x8xf32> to vector<32x8xf32>
    %cst_9 = arith.constant dense<0.000000e+00> : vector<80x8xf32>
    %16 = tpu.matmul %0, %15, %cst_9 {dimension_numbers = #tpu.dot_dimension_numbers<[1], [0], [0], [1], [0, 0, 1, 1], [], []>} : vector<80x32xf32>, vector<32x8xf32>, vector<80x8xf32> -> vector<80x8xf32>
    %c0_10 = arith.constant 0 : index
    %c0_11 = arith.constant 0 : index
    %c0_12 = arith.constant 0 : index
    %17 = vector.load %arg3[%c0_10, %c0_11, %c0_12] : memref<4x1x8xf32, #tpu.memory_space<vmem>>, vector<1x1x8xf32>
    %18 = vector.shape_cast %17 : vector<1x1x8xf32> to vector<1x8xf32>
    %19 = vector.broadcast %18 : vector<1x8xf32> to vector<80x8xf32>
    %20 = arith.addf %16, %19 : vector<80x8xf32>
    %c0_13 = arith.constant 0 : index
    %c0_14 = arith.constant 0 : index
    %c0_15 = arith.constant 0 : index
    %21 = vector.load %arg4[%c0_13, %c0_14, %c0_15] : memref<4x32x8xf32, #tpu.memory_space<vmem>>, vector<1x32x8xf32>
    %22 = vector.shape_cast %21 : vector<1x32x8xf32> to vector<32x8xf32>
    %cst_16 = arith.constant dense<0.000000e+00> : vector<80x8xf32>
    %23 = tpu.matmul %0, %22, %cst_16 {dimension_numbers = #tpu.dot_dimension_numbers<[1], [0], [0], [1], [0, 0, 1, 1], [], []>} : vector<80x32xf32>, vector<32x8xf32>, vector<80x8xf32> -> vector<80x8xf32>
    %c0_17 = arith.constant 0 : index
    %c0_18 = arith.constant 0 : index
    %c0_19 = arith.constant 0 : index
    %24 = vector.load %arg5[%c0_17, %c0_18, %c0_19] : memref<4x1x8xf32, #tpu.memory_space<vmem>>, vector<1x1x8xf32>
    %25 = vector.shape_cast %24 : vector<1x1x8xf32> to vector<1x8xf32>
    %26 = vector.broadcast %25 : vector<1x8xf32> to vector<80x8xf32>
    %27 = arith.addf %23, %26 : vector<80x8xf32>
    %c0_20 = arith.constant 0 : index
    %c0_21 = arith.constant 0 : index
    %c0_22 = arith.constant 0 : index
    %28 = vector.load %arg6[%c0_20, %c0_21, %c0_22] : memref<4x32x8xf32, #tpu.memory_space<vmem>>, vector<1x32x8xf32>
    %29 = vector.shape_cast %28 : vector<1x32x8xf32> to vector<32x8xf32>
    %cst_23 = arith.constant dense<0.000000e+00> : vector<80x8xf32>
    %30 = tpu.matmul %0, %29, %cst_23 {dimension_numbers = #tpu.dot_dimension_numbers<[1], [0], [0], [1], [0, 0, 1, 1], [], []>} : vector<80x32xf32>, vector<32x8xf32>, vector<80x8xf32> -> vector<80x8xf32>
    %c0_24 = arith.constant 0 : index
    %c0_25 = arith.constant 0 : index
    %c0_26 = arith.constant 0 : index
    %31 = vector.load %arg7[%c0_24, %c0_25, %c0_26] : memref<4x1x8xf32, #tpu.memory_space<vmem>>, vector<1x1x8xf32>
    %32 = vector.shape_cast %31 : vector<1x1x8xf32> to vector<1x8xf32>
    %33 = vector.broadcast %32 : vector<1x8xf32> to vector<80x8xf32>
    %34 = arith.addf %30, %33 : vector<80x8xf32>
    %c0_27 = arith.constant 0 : index
    %c0_28 = arith.constant 0 : index
    %35 = vector.load %arg8[%c0_27, %c0_28] : memref<32x32xf32, #tpu.memory_space<vmem>>, vector<8x32xf32>
    %36 = vector.extract_strided_slice %20 {offsets = [0, 0], sizes = [40, 8], strides = [1, 1]} : vector<80x8xf32> to vector<40x8xf32>
    %37 = vector.extract_strided_slice %27 {offsets = [0, 0], sizes = [40, 8], strides = [1, 1]} : vector<80x8xf32> to vector<40x8xf32>
    %38 = vector.extract_strided_slice %34 {offsets = [0, 0], sizes = [40, 8], strides = [1, 1]} : vector<80x8xf32> to vector<40x8xf32>
    %cst_29 = arith.constant dense<0.000000e+00> : vector<40x40xf32>
    %39 = tpu.matmul %36, %37, %cst_29 {dimension_numbers = #tpu.dot_dimension_numbers<[1], [1], [0], [0], [0, 0, 1, 0], [], []>} : vector<40x8xf32>, vector<40x8xf32>, vector<40x40xf32> -> vector<40x40xf32>
    %40 = vector.broadcast %6 : vector<1x40xf32> to vector<40x40xf32>
    %41 = arith.addf %39, %40 : vector<40x40xf32>
    %cst_30 = arith.constant dense<0xFF800000> : vector<40xf32>
    %42 = vector.multi_reduction <maximumf>, %41, %cst_30 [1] : vector<40x40xf32> to vector<40xf32>
    %43 = vector.shape_cast %42 : vector<40xf32> to vector<40x1xf32>
    %44 = vector.broadcast %43 : vector<40x1xf32> to vector<40x40xf32>
    %45 = arith.subf %41, %44 : vector<40x40xf32>
    %46 = math.exp %45 : vector<40x40xf32>
    %cst_31 = arith.constant dense<0.000000e+00> : vector<40xf32>
    %47 = vector.multi_reduction <add>, %46, %cst_31 [1] : vector<40x40xf32> to vector<40xf32>
    %48 = vector.shape_cast %47 : vector<40xf32> to vector<40x1xf32>
    %49 = tpu.reciprocal %48 {approx = true} : vector<40x1xf32> -> vector<40x1xf32>
    %50 = vector.broadcast %49 : vector<40x1xf32> to vector<40x40xf32>
    %51 = arith.mulf %46, %50 : vector<40x40xf32>
    %cst_32 = arith.constant dense<0.000000e+00> : vector<40x8xf32>
    %52 = tpu.matmul %51, %38, %cst_32 {dimension_numbers = #tpu.dot_dimension_numbers<[1], [0], [0], [1], [0, 0, 1, 1], [], []>} : vector<40x40xf32>, vector<40x8xf32>, vector<40x8xf32> -> vector<40x8xf32>
    %53 = arith.addf %52, %36 : vector<40x8xf32>
    %54 = vector.shape_cast %9 : vector<40x1xi1> to vector<40x1xi1>
    %55 = vector.broadcast %54 : vector<40x1xi1> to vector<40x8xi1>
    %56 = arith.select %55, %53, %52 : vector<40x8xi1>, vector<40x8xf32>
    %c0_33 = arith.constant 0 : index
    %c0_34 = arith.constant 0 : index
    %57 = vector.load %arg10[%c0_33, %c0_34] : memref<80x32xf32, #tpu.memory_space<vmem>>, vector<40x32xf32>
    %cst_35 = arith.constant dense<0.000000e+00> : vector<40x32xf32>
    %58 = tpu.matmul %56, %35, %cst_35 {dimension_numbers = #tpu.dot_dimension_numbers<[1], [0], [0], [1], [0, 0, 1, 1], [], []>} : vector<40x8xf32>, vector<8x32xf32>, vector<40x32xf32> -> vector<40x32xf32>
    %59 = arith.addf %57, %58 : vector<40x32xf32>
    %c0_36 = arith.constant 0 : index
    %c0_37 = arith.constant 0 : index
    %60 = vector.load %arg10[%c0_36, %c0_37] : memref<80x32xf32, #tpu.memory_space<vmem>>, vector<40x32xf32>
    tpu.vector_store %arg10[%c0_36, %c0_37], %59 {strides = array<i32>} : memref<80x32xf32, #tpu.memory_space<vmem>>, vector<40x32xf32>,
    %61 = vector.extract_strided_slice %20 {offsets = [40, 0], sizes = [40, 8], strides = [1, 1]} : vector<80x8xf32> to vector<40x8xf32>
    %62 = vector.extract_strided_slice %27 {offsets = [40, 0], sizes = [40, 8], strides = [1, 1]} : vector<80x8xf32> to vector<40x8xf32>
    %63 = vector.extract_strided_slice %34 {offsets = [40, 0], sizes = [40, 8], strides = [1, 1]} : vector<80x8xf32> to vector<40x8xf32>
    %cst_38 = arith.constant dense<0.000000e+00> : vector<40x40xf32>
    %64 = tpu.matmul %61, %62, %cst_38 {dimension_numbers = #tpu.dot_dimension_numbers<[1], [1], [0], [0], [0, 0, 1, 0], [], []>} : vector<40x8xf32>, vector<40x8xf32>, vector<40x40xf32> -> vector<40x40xf32>
    %65 = vector.broadcast %6 : vector<1x40xf32> to vector<40x40xf32>
    %66 = arith.addf %64, %65 : vector<40x40xf32>
    %cst_39 = arith.constant dense<0xFF800000> : vector<40xf32>
    %67 = vector.multi_reduction <maximumf>, %66, %cst_39 [1] : vector<40x40xf32> to vector<40xf32>
    %68 = vector.shape_cast %67 : vector<40xf32> to vector<40x1xf32>
    %69 = vector.broadcast %68 : vector<40x1xf32> to vector<40x40xf32>
    %70 = arith.subf %66, %69 : vector<40x40xf32>
    %71 = math.exp %70 : vector<40x40xf32>
    %cst_40 = arith.constant dense<0.000000e+00> : vector<40xf32>
    %72 = vector.multi_reduction <add>, %71, %cst_40 [1] : vector<40x40xf32> to vector<40xf32>
    %73 = vector.shape_cast %72 : vector<40xf32> to vector<40x1xf32>
    %74 = tpu.reciprocal %73 {approx = true} : vector<40x1xf32> -> vector<40x1xf32>
    %75 = vector.broadcast %74 : vector<40x1xf32> to vector<40x40xf32>
    %76 = arith.mulf %71, %75 : vector<40x40xf32>
    %cst_41 = arith.constant dense<0.000000e+00> : vector<40x8xf32>
    %77 = tpu.matmul %76, %63, %cst_41 {dimension_numbers = #tpu.dot_dimension_numbers<[1], [0], [0], [1], [0, 0, 1, 1], [], []>} : vector<40x40xf32>, vector<40x8xf32>, vector<40x8xf32> -> vector<40x8xf32>
    %78 = arith.addf %77, %61 : vector<40x8xf32>
    %79 = vector.shape_cast %9 : vector<40x1xi1> to vector<40x1xi1>
    %80 = vector.broadcast %79 : vector<40x1xi1> to vector<40x8xi1>
    %81 = arith.select %80, %78, %77 : vector<40x8xi1>, vector<40x8xf32>
    %c40 = arith.constant 40 : index
    %c0_42 = arith.constant 0 : index
    %82 = vector.load %arg10[%c40, %c0_42] : memref<80x32xf32, #tpu.memory_space<vmem>>, vector<40x32xf32>
    %cst_43 = arith.constant dense<0.000000e+00> : vector<40x32xf32>
    %83 = tpu.matmul %81, %35, %cst_43 {dimension_numbers = #tpu.dot_dimension_numbers<[1], [0], [0], [1], [0, 0, 1, 1], [], []>} : vector<40x8xf32>, vector<8x32xf32>, vector<40x32xf32> -> vector<40x32xf32>
    %84 = arith.addf %82, %83 : vector<40x32xf32>
    %c40_44 = arith.constant 40 : index
    %c0_45 = arith.constant 0 : index
    %85 = vector.load %arg10[%c40_44, %c0_45] : memref<80x32xf32, #tpu.memory_space<vmem>>, vector<40x32xf32>
    tpu.vector_store %arg10[%c40_44, %c0_45], %84 {strides = array<i32>} : memref<80x32xf32, #tpu.memory_space<vmem>>, vector<40x32xf32>,
    %c1 = arith.constant 1 : index
    %c0_46 = arith.constant 0 : index
    %c0_47 = arith.constant 0 : index
    %86 = vector.load %arg2[%c1, %c0_46, %c0_47] : memref<4x32x8xf32, #tpu.memory_space<vmem>>, vector<1x32x8xf32>
    %87 = vector.shape_cast %86 : vector<1x32x8xf32> to vector<32x8xf32>
    %cst_48 = arith.constant dense<0.000000e+00> : vector<80x8xf32>
    %88 = tpu.matmul %0, %87, %cst_48 {dimension_numbers = #tpu.dot_dimension_numbers<[1], [0], [0], [1], [0, 0, 1, 1], [], []>} : vector<80x32xf32>, vector<32x8xf32>, vector<80x8xf32> -> vector<80x8xf32>
    %c1_49 = arith.constant 1 : index
    %c0_50 = arith.constant 0 : index
    %c0_51 = arith.constant 0 : index
    %89 = vector.load %arg3[%c1_49, %c0_50, %c0_51] : memref<4x1x8xf32, #tpu.memory_space<vmem>>, vector<1x1x8xf32>
    %90 = vector.shape_cast %89 : vector<1x1x8xf32> to vector<1x8xf32>
    %91 = vector.broadcast %90 : vector<1x8xf32> to vector<80x8xf32>
    %92 = arith.addf %88, %91 : vector<80x8xf32>
    %c1_52 = arith.constant 1 : index
    %c0_53 = arith.constant 0 : index
    %c0_54 = arith.constant 0 : index
    %93 = vector.load %arg4[%c1_52, %c0_53, %c0_54] : memref<4x32x8xf32, #tpu.memory_space<vmem>>, vector<1x32x8xf32>
    %94 = vector.shape_cast %93 : vector<1x32x8xf32> to vector<32x8xf32>
    %cst_55 = arith.constant dense<0.000000e+00> : vector<80x8xf32>
    %95 = tpu.matmul %0, %94, %cst_55 {dimension_numbers = #tpu.dot_dimension_numbers<[1], [0], [0], [1], [0, 0, 1, 1], [], []>} : vector<80x32xf32>, vector<32x8xf32>, vector<80x8xf32> -> vector<80x8xf32>
    %c1_56 = arith.constant 1 : index
    %c0_57 = arith.constant 0 : index
    %c0_58 = arith.constant 0 : index
    %96 = vector.load %arg5[%c1_56, %c0_57, %c0_58] : memref<4x1x8xf32, #tpu.memory_space<vmem>>, vector<1x1x8xf32>
    %97 = vector.shape_cast %96 : vector<1x1x8xf32> to vector<1x8xf32>
    %98 = vector.broadcast %97 : vector<1x8xf32> to vector<80x8xf32>
    %99 = arith.addf %95, %98 : vector<80x8xf32>
    %c1_59 = arith.constant 1 : index
    %c0_60 = arith.constant 0 : index
    %c0_61 = arith.constant 0 : index
    %100 = vector.load %arg6[%c1_59, %c0_60, %c0_61] : memref<4x32x8xf32, #tpu.memory_space<vmem>>, vector<1x32x8xf32>
    %101 = vector.shape_cast %100 : vector<1x32x8xf32> to vector<32x8xf32>
    %cst_62 = arith.constant dense<0.000000e+00> : vector<80x8xf32>
    %102 = tpu.matmul %0, %101, %cst_62 {dimension_numbers = #tpu.dot_dimension_numbers<[1], [0], [0], [1], [0, 0, 1, 1], [], []>} : vector<80x32xf32>, vector<32x8xf32>, vector<80x8xf32> -> vector<80x8xf32>
    %c1_63 = arith.constant 1 : index
    %c0_64 = arith.constant 0 : index
    %c0_65 = arith.constant 0 : index
    %103 = vector.load %arg7[%c1_63, %c0_64, %c0_65] : memref<4x1x8xf32, #tpu.memory_space<vmem>>, vector<1x1x8xf32>
    %104 = vector.shape_cast %103 : vector<1x1x8xf32> to vector<1x8xf32>
    %105 = vector.broadcast %104 : vector<1x8xf32> to vector<80x8xf32>
    %106 = arith.addf %102, %105 : vector<80x8xf32>
    %c8 = arith.constant 8 : index
    %c0_66 = arith.constant 0 : index
    %107 = vector.load %arg8[%c8, %c0_66] : memref<32x32xf32, #tpu.memory_space<vmem>>, vector<8x32xf32>
    %108 = vector.extract_strided_slice %92 {offsets = [0, 0], sizes = [40, 8], strides = [1, 1]} : vector<80x8xf32> to vector<40x8xf32>
    %109 = vector.extract_strided_slice %99 {offsets = [0, 0], sizes = [40, 8], strides = [1, 1]} : vector<80x8xf32> to vector<40x8xf32>
    %110 = vector.extract_strided_slice %106 {offsets = [0, 0], sizes = [40, 8], strides = [1, 1]} : vector<80x8xf32> to vector<40x8xf32>
    %cst_67 = arith.constant dense<0.000000e+00> : vector<40x40xf32>
    %111 = tpu.matmul %108, %109, %cst_67 {dimension_numbers = #tpu.dot_dimension_numbers<[1], [1], [0], [0], [0, 0, 1, 0], [], []>} : vector<40x8xf32>, vector<40x8xf32>, vector<40x40xf32> -> vector<40x40xf32>
    %112 = vector.broadcast %6 : vector<1x40xf32> to vector<40x40xf32>
    %113 = arith.addf %111, %112 : vector<40x40xf32>
    %cst_68 = arith.constant dense<0xFF800000> : vector<40xf32>
    %114 = vector.multi_reduction <maximumf>, %113, %cst_68 [1] : vector<40x40xf32> to vector<40xf32>
    %115 = vector.shape_cast %114 : vector<40xf32> to vector<40x1xf32>
    %116 = vector.broadcast %115 : vector<40x1xf32> to vector<40x40xf32>
    %117 = arith.subf %113, %116 : vector<40x40xf32>
    %118 = math.exp %117 : vector<40x40xf32>
    %cst_69 = arith.constant dense<0.000000e+00> : vector<40xf32>
    %119 = vector.multi_reduction <add>, %118, %cst_69 [1] : vector<40x40xf32> to vector<40xf32>
    %120 = vector.shape_cast %119 : vector<40xf32> to vector<40x1xf32>
    %121 = tpu.reciprocal %120 {approx = true} : vector<40x1xf32> -> vector<40x1xf32>
    %122 = vector.broadcast %121 : vector<40x1xf32> to vector<40x40xf32>
    %123 = arith.mulf %118, %122 : vector<40x40xf32>
    %cst_70 = arith.constant dense<0.000000e+00> : vector<40x8xf32>
    %124 = tpu.matmul %123, %110, %cst_70 {dimension_numbers = #tpu.dot_dimension_numbers<[1], [0], [0], [1], [0, 0, 1, 1], [], []>} : vector<40x40xf32>, vector<40x8xf32>, vector<40x8xf32> -> vector<40x8xf32>
    %125 = arith.addf %124, %108 : vector<40x8xf32>
    %126 = vector.shape_cast %9 : vector<40x1xi1> to vector<40x1xi1>
    %127 = vector.broadcast %126 : vector<40x1xi1> to vector<40x8xi1>
    %128 = arith.select %127, %125, %124 : vector<40x8xi1>, vector<40x8xf32>
    %c0_71 = arith.constant 0 : index
    %c0_72 = arith.constant 0 : index
    %129 = vector.load %arg10[%c0_71, %c0_72] : memref<80x32xf32, #tpu.memory_space<vmem>>, vector<40x32xf32>
    %cst_73 = arith.constant dense<0.000000e+00> : vector<40x32xf32>
    %130 = tpu.matmul %128, %107, %cst_73 {dimension_numbers = #tpu.dot_dimension_numbers<[1], [0], [0], [1], [0, 0, 1, 1], [], []>} : vector<40x8xf32>, vector<8x32xf32>, vector<40x32xf32> -> vector<40x32xf32>
    %131 = arith.addf %129, %130 : vector<40x32xf32>
    %c0_74 = arith.constant 0 : index
    %c0_75 = arith.constant 0 : index
    %132 = vector.load %arg10[%c0_74, %c0_75] : memref<80x32xf32, #tpu.memory_space<vmem>>, vector<40x32xf32>
    tpu.vector_store %arg10[%c0_74, %c0_75], %131 {strides = array<i32>} : memref<80x32xf32, #tpu.memory_space<vmem>>, vector<40x32xf32>,
    %133 = vector.extract_strided_slice %92 {offsets = [40, 0], sizes = [40, 8], strides = [1, 1]} : vector<80x8xf32> to vector<40x8xf32>
    %134 = vector.extract_strided_slice %99 {offsets = [40, 0], sizes = [40, 8], strides = [1, 1]} : vector<80x8xf32> to vector<40x8xf32>
    %135 = vector.extract_strided_slice %106 {offsets = [40, 0], sizes = [40, 8], strides = [1, 1]} : vector<80x8xf32> to vector<40x8xf32>
    %cst_76 = arith.constant dense<0.000000e+00> : vector<40x40xf32>
    %136 = tpu.matmul %133, %134, %cst_76 {dimension_numbers = #tpu.dot_dimension_numbers<[1], [1], [0], [0], [0, 0, 1, 0], [], []>} : vector<40x8xf32>, vector<40x8xf32>, vector<40x40xf32> -> vector<40x40xf32>
    %137 = vector.broadcast %6 : vector<1x40xf32> to vector<40x40xf32>
    %138 = arith.addf %136, %137 : vector<40x40xf32>
    %cst_77 = arith.constant dense<0xFF800000> : vector<40xf32>
    %139 = vector.multi_reduction <maximumf>, %138, %cst_77 [1] : vector<40x40xf32> to vector<40xf32>
    %140 = vector.shape_cast %139 : vector<40xf32> to vector<40x1xf32>
    %141 = vector.broadcast %140 : vector<40x1xf32> to vector<40x40xf32>
    %142 = arith.subf %138, %141 : vector<40x40xf32>
    %143 = math.exp %142 : vector<40x40xf32>
    %cst_78 = arith.constant dense<0.000000e+00> : vector<40xf32>
    %144 = vector.multi_reduction <add>, %143, %cst_78 [1] : vector<40x40xf32> to vector<40xf32>
    %145 = vector.shape_cast %144 : vector<40xf32> to vector<40x1xf32>
    %146 = tpu.reciprocal %145 {approx = true} : vector<40x1xf32> -> vector<40x1xf32>
    %147 = vector.broadcast %146 : vector<40x1xf32> to vector<40x40xf32>
    %148 = arith.mulf %143, %147 : vector<40x40xf32>
    %cst_79 = arith.constant dense<0.000000e+00> : vector<40x8xf32>
    %149 = tpu.matmul %148, %135, %cst_79 {dimension_numbers = #tpu.dot_dimension_numbers<[1], [0], [0], [1], [0, 0, 1, 1], [], []>} : vector<40x40xf32>, vector<40x8xf32>, vector<40x8xf32> -> vector<40x8xf32>
    %150 = arith.addf %149, %133 : vector<40x8xf32>
    %151 = vector.shape_cast %9 : vector<40x1xi1> to vector<40x1xi1>
    %152 = vector.broadcast %151 : vector<40x1xi1> to vector<40x8xi1>
    %153 = arith.select %152, %150, %149 : vector<40x8xi1>, vector<40x8xf32>
    %c40_80 = arith.constant 40 : index
    %c0_81 = arith.constant 0 : index
    %154 = vector.load %arg10[%c40_80, %c0_81] : memref<80x32xf32, #tpu.memory_space<vmem>>, vector<40x32xf32>
    %cst_82 = arith.constant dense<0.000000e+00> : vector<40x32xf32>
    %155 = tpu.matmul %153, %107, %cst_82 {dimension_numbers = #tpu.dot_dimension_numbers<[1], [0], [0], [1], [0, 0, 1, 1], [], []>} : vector<40x8xf32>, vector<8x32xf32>, vector<40x32xf32> -> vector<40x32xf32>
    %156 = arith.addf %154, %155 : vector<40x32xf32>
    %c40_83 = arith.constant 40 : index
    %c0_84 = arith.constant 0 : index
    %157 = vector.load %arg10[%c40_83, %c0_84] : memref<80x32xf32, #tpu.memory_space<vmem>>, vector<40x32xf32>
    tpu.vector_store %arg10[%c40_83, %c0_84], %156 {strides = array<i32>} : memref<80x32xf32, #tpu.memory_space<vmem>>, vector<40x32xf32>,
    %c2 = arith.constant 2 : index
    %c0_85 = arith.constant 0 : index
    %c0_86 = arith.constant 0 : index
    %158 = vector.load %arg2[%c2, %c0_85, %c0_86] : memref<4x32x8xf32, #tpu.memory_space<vmem>>, vector<1x32x8xf32>
    %159 = vector.shape_cast %158 : vector<1x32x8xf32> to vector<32x8xf32>
    %cst_87 = arith.constant dense<0.000000e+00> : vector<80x8xf32>
    %160 = tpu.matmul %0, %159, %cst_87 {dimension_numbers = #tpu.dot_dimension_numbers<[1], [0], [0], [1], [0, 0, 1, 1], [], []>} : vector<80x32xf32>, vector<32x8xf32>, vector<80x8xf32> -> vector<80x8xf32>
    %c2_88 = arith.constant 2 : index
    %c0_89 = arith.constant 0 : index
    %c0_90 = arith.constant 0 : index
    %161 = vector.load %arg3[%c2_88, %c0_89, %c0_90] : memref<4x1x8xf32, #tpu.memory_space<vmem>>, vector<1x1x8xf32>
    %162 = vector.shape_cast %161 : vector<1x1x8xf32> to vector<1x8xf32>
    %163 = vector.broadcast %162 : vector<1x8xf32> to vector<80x8xf32>
    %164 = arith.addf %160, %163 : vector<80x8xf32>
    %c2_91 = arith.constant 2 : index
    %c0_92 = arith.constant 0 : index
    %c0_93 = arith.constant 0 : index
    %165 = vector.load %arg4[%c2_91, %c0_92, %c0_93] : memref<4x32x8xf32, #tpu.memory_space<vmem>>, vector<1x32x8xf32>
    %166 = vector.shape_cast %165 : vector<1x32x8xf32> to vector<32x8xf32>
    %cst_94 = arith.constant dense<0.000000e+00> : vector<80x8xf32>
    %167 = tpu.matmul %0, %166, %cst_94 {dimension_numbers = #tpu.dot_dimension_numbers<[1], [0], [0], [1], [0, 0, 1, 1], [], []>} : vector<80x32xf32>, vector<32x8xf32>, vector<80x8xf32> -> vector<80x8xf32>
    %c2_95 = arith.constant 2 : index
    %c0_96 = arith.constant 0 : index
    %c0_97 = arith.constant 0 : index
    %168 = vector.load %arg5[%c2_95, %c0_96, %c0_97] : memref<4x1x8xf32, #tpu.memory_space<vmem>>, vector<1x1x8xf32>
    %169 = vector.shape_cast %168 : vector<1x1x8xf32> to vector<1x8xf32>
    %170 = vector.broadcast %169 : vector<1x8xf32> to vector<80x8xf32>
    %171 = arith.addf %167, %170 : vector<80x8xf32>
    %c2_98 = arith.constant 2 : index
    %c0_99 = arith.constant 0 : index
    %c0_100 = arith.constant 0 : index
    %172 = vector.load %arg6[%c2_98, %c0_99, %c0_100] : memref<4x32x8xf32, #tpu.memory_space<vmem>>, vector<1x32x8xf32>
    %173 = vector.shape_cast %172 : vector<1x32x8xf32> to vector<32x8xf32>
    %cst_101 = arith.constant dense<0.000000e+00> : vector<80x8xf32>
    %174 = tpu.matmul %0, %173, %cst_101 {dimension_numbers = #tpu.dot_dimension_numbers<[1], [0], [0], [1], [0, 0, 1, 1], [], []>} : vector<80x32xf32>, vector<32x8xf32>, vector<80x8xf32> -> vector<80x8xf32>
    %c2_102 = arith.constant 2 : index
    %c0_103 = arith.constant 0 : index
    %c0_104 = arith.constant 0 : index
    %175 = vector.load %arg7[%c2_102, %c0_103, %c0_104] : memref<4x1x8xf32, #tpu.memory_space<vmem>>, vector<1x1x8xf32>
    %176 = vector.shape_cast %175 : vector<1x1x8xf32> to vector<1x8xf32>
    %177 = vector.broadcast %176 : vector<1x8xf32> to vector<80x8xf32>
    %178 = arith.addf %174, %177 : vector<80x8xf32>
    %c16 = arith.constant 16 : index
    %c0_105 = arith.constant 0 : index
    %179 = vector.load %arg8[%c16, %c0_105] : memref<32x32xf32, #tpu.memory_space<vmem>>, vector<8x32xf32>
    %180 = vector.extract_strided_slice %164 {offsets = [0, 0], sizes = [40, 8], strides = [1, 1]} : vector<80x8xf32> to vector<40x8xf32>
    %181 = vector.extract_strided_slice %171 {offsets = [0, 0], sizes = [40, 8], strides = [1, 1]} : vector<80x8xf32> to vector<40x8xf32>
    %182 = vector.extract_strided_slice %178 {offsets = [0, 0], sizes = [40, 8], strides = [1, 1]} : vector<80x8xf32> to vector<40x8xf32>
    %cst_106 = arith.constant dense<0.000000e+00> : vector<40x40xf32>
    %183 = tpu.matmul %180, %181, %cst_106 {dimension_numbers = #tpu.dot_dimension_numbers<[1], [1], [0], [0], [0, 0, 1, 0], [], []>} : vector<40x8xf32>, vector<40x8xf32>, vector<40x40xf32> -> vector<40x40xf32>
    %184 = vector.broadcast %6 : vector<1x40xf32> to vector<40x40xf32>
    %185 = arith.addf %183, %184 : vector<40x40xf32>
    %cst_107 = arith.constant dense<0xFF800000> : vector<40xf32>
    %186 = vector.multi_reduction <maximumf>, %185, %cst_107 [1] : vector<40x40xf32> to vector<40xf32>
    %187 = vector.shape_cast %186 : vector<40xf32> to vector<40x1xf32>
    %188 = vector.broadcast %187 : vector<40x1xf32> to vector<40x40xf32>
    %189 = arith.subf %185, %188 : vector<40x40xf32>
    %190 = math.exp %189 : vector<40x40xf32>
    %cst_108 = arith.constant dense<0.000000e+00> : vector<40xf32>
    %191 = vector.multi_reduction <add>, %190, %cst_108 [1] : vector<40x40xf32> to vector<40xf32>
    %192 = vector.shape_cast %191 : vector<40xf32> to vector<40x1xf32>
    %193 = tpu.reciprocal %192 {approx = true} : vector<40x1xf32> -> vector<40x1xf32>
    %194 = vector.broadcast %193 : vector<40x1xf32> to vector<40x40xf32>
    %195 = arith.mulf %190, %194 : vector<40x40xf32>
    %cst_109 = arith.constant dense<0.000000e+00> : vector<40x8xf32>
    %196 = tpu.matmul %195, %182, %cst_109 {dimension_numbers = #tpu.dot_dimension_numbers<[1], [0], [0], [1], [0, 0, 1, 1], [], []>} : vector<40x40xf32>, vector<40x8xf32>, vector<40x8xf32> -> vector<40x8xf32>
    %197 = arith.addf %196, %180 : vector<40x8xf32>
    %198 = vector.shape_cast %9 : vector<40x1xi1> to vector<40x1xi1>
    %199 = vector.broadcast %198 : vector<40x1xi1> to vector<40x8xi1>
    %200 = arith.select %199, %197, %196 : vector<40x8xi1>, vector<40x8xf32>
    %c0_110 = arith.constant 0 : index
    %c0_111 = arith.constant 0 : index
    %201 = vector.load %arg10[%c0_110, %c0_111] : memref<80x32xf32, #tpu.memory_space<vmem>>, vector<40x32xf32>
    %cst_112 = arith.constant dense<0.000000e+00> : vector<40x32xf32>
    %202 = tpu.matmul %200, %179, %cst_112 {dimension_numbers = #tpu.dot_dimension_numbers<[1], [0], [0], [1], [0, 0, 1, 1], [], []>} : vector<40x8xf32>, vector<8x32xf32>, vector<40x32xf32> -> vector<40x32xf32>
    %203 = arith.addf %201, %202 : vector<40x32xf32>
    %c0_113 = arith.constant 0 : index
    %c0_114 = arith.constant 0 : index
    %204 = vector.load %arg10[%c0_113, %c0_114] : memref<80x32xf32, #tpu.memory_space<vmem>>, vector<40x32xf32>
    tpu.vector_store %arg10[%c0_113, %c0_114], %203 {strides = array<i32>} : memref<80x32xf32, #tpu.memory_space<vmem>>, vector<40x32xf32>,
    %205 = vector.extract_strided_slice %164 {offsets = [40, 0], sizes = [40, 8], strides = [1, 1]} : vector<80x8xf32> to vector<40x8xf32>
    %206 = vector.extract_strided_slice %171 {offsets = [40, 0], sizes = [40, 8], strides = [1, 1]} : vector<80x8xf32> to vector<40x8xf32>
    %207 = vector.extract_strided_slice %178 {offsets = [40, 0], sizes = [40, 8], strides = [1, 1]} : vector<80x8xf32> to vector<40x8xf32>
    %cst_115 = arith.constant dense<0.000000e+00> : vector<40x40xf32>
    %208 = tpu.matmul %205, %206, %cst_115 {dimension_numbers = #tpu.dot_dimension_numbers<[1], [1], [0], [0], [0, 0, 1, 0], [], []>} : vector<40x8xf32>, vector<40x8xf32>, vector<40x40xf32> -> vector<40x40xf32>
    %209 = vector.broadcast %6 : vector<1x40xf32> to vector<40x40xf32>
    %210 = arith.addf %208, %209 : vector<40x40xf32>
    %cst_116 = arith.constant dense<0xFF800000> : vector<40xf32>
    %211 = vector.multi_reduction <maximumf>, %210, %cst_116 [1] : vector<40x40xf32> to vector<40xf32>
    %212 = vector.shape_cast %211 : vector<40xf32> to vector<40x1xf32>
    %213 = vector.broadcast %212 : vector<40x1xf32> to vector<40x40xf32>
    %214 = arith.subf %210, %213 : vector<40x40xf32>
    %215 = math.exp %214 : vector<40x40xf32>
    %cst_117 = arith.constant dense<0.000000e+00> : vector<40xf32>
    %216 = vector.multi_reduction <add>, %215, %cst_117 [1] : vector<40x40xf32> to vector<40xf32>
    %217 = vector.shape_cast %216 : vector<40xf32> to vector<40x1xf32>
    %218 = tpu.reciprocal %217 {approx = true} : vector<40x1xf32> -> vector<40x1xf32>
    %219 = vector.broadcast %218 : vector<40x1xf32> to vector<40x40xf32>
    %220 = arith.mulf %215, %219 : vector<40x40xf32>
    %cst_118 = arith.constant dense<0.000000e+00> : vector<40x8xf32>
    %221 = tpu.matmul %220, %207, %cst_118 {dimension_numbers = #tpu.dot_dimension_numbers<[1], [0], [0], [1], [0, 0, 1, 1], [], []>} : vector<40x40xf32>, vector<40x8xf32>, vector<40x8xf32> -> vector<40x8xf32>
    %222 = arith.addf %221, %205 : vector<40x8xf32>
    %223 = vector.shape_cast %9 : vector<40x1xi1> to vector<40x1xi1>
    %224 = vector.broadcast %223 : vector<40x1xi1> to vector<40x8xi1>
    %225 = arith.select %224, %222, %221 : vector<40x8xi1>, vector<40x8xf32>
    %c40_119 = arith.constant 40 : index
    %c0_120 = arith.constant 0 : index
    %226 = vector.load %arg10[%c40_119, %c0_120] : memref<80x32xf32, #tpu.memory_space<vmem>>, vector<40x32xf32>
    %cst_121 = arith.constant dense<0.000000e+00> : vector<40x32xf32>
    %227 = tpu.matmul %225, %179, %cst_121 {dimension_numbers = #tpu.dot_dimension_numbers<[1], [0], [0], [1], [0, 0, 1, 1], [], []>} : vector<40x8xf32>, vector<8x32xf32>, vector<40x32xf32> -> vector<40x32xf32>
    %228 = arith.addf %226, %227 : vector<40x32xf32>
    %c40_122 = arith.constant 40 : index
    %c0_123 = arith.constant 0 : index
    %229 = vector.load %arg10[%c40_122, %c0_123] : memref<80x32xf32, #tpu.memory_space<vmem>>, vector<40x32xf32>
    tpu.vector_store %arg10[%c40_122, %c0_123], %228 {strides = array<i32>} : memref<80x32xf32, #tpu.memory_space<vmem>>, vector<40x32xf32>,
    %c3 = arith.constant 3 : index
    %c0_124 = arith.constant 0 : index
    %c0_125 = arith.constant 0 : index
    %230 = vector.load %arg2[%c3, %c0_124, %c0_125] : memref<4x32x8xf32, #tpu.memory_space<vmem>>, vector<1x32x8xf32>
    %231 = vector.shape_cast %230 : vector<1x32x8xf32> to vector<32x8xf32>
    %cst_126 = arith.constant dense<0.000000e+00> : vector<80x8xf32>
    %232 = tpu.matmul %0, %231, %cst_126 {dimension_numbers = #tpu.dot_dimension_numbers<[1], [0], [0], [1], [0, 0, 1, 1], [], []>} : vector<80x32xf32>, vector<32x8xf32>, vector<80x8xf32> -> vector<80x8xf32>
    %c3_127 = arith.constant 3 : index
    %c0_128 = arith.constant 0 : index
    %c0_129 = arith.constant 0 : index
    %233 = vector.load %arg3[%c3_127, %c0_128, %c0_129] : memref<4x1x8xf32, #tpu.memory_space<vmem>>, vector<1x1x8xf32>
    %234 = vector.shape_cast %233 : vector<1x1x8xf32> to vector<1x8xf32>
    %235 = vector.broadcast %234 : vector<1x8xf32> to vector<80x8xf32>
    %236 = arith.addf %232, %235 : vector<80x8xf32>
    %c3_130 = arith.constant 3 : index
    %c0_131 = arith.constant 0 : index
    %c0_132 = arith.constant 0 : index
    %237 = vector.load %arg4[%c3_130, %c0_131, %c0_132] : memref<4x32x8xf32, #tpu.memory_space<vmem>>, vector<1x32x8xf32>
    %238 = vector.shape_cast %237 : vector<1x32x8xf32> to vector<32x8xf32>
    %cst_133 = arith.constant dense<0.000000e+00> : vector<80x8xf32>
    %239 = tpu.matmul %0, %238, %cst_133 {dimension_numbers = #tpu.dot_dimension_numbers<[1], [0], [0], [1], [0, 0, 1, 1], [], []>} : vector<80x32xf32>, vector<32x8xf32>, vector<80x8xf32> -> vector<80x8xf32>
    %c3_134 = arith.constant 3 : index
    %c0_135 = arith.constant 0 : index
    %c0_136 = arith.constant 0 : index
    %240 = vector.load %arg5[%c3_134, %c0_135, %c0_136] : memref<4x1x8xf32, #tpu.memory_space<vmem>>, vector<1x1x8xf32>
    %241 = vector.shape_cast %240 : vector<1x1x8xf32> to vector<1x8xf32>
    %242 = vector.broadcast %241 : vector<1x8xf32> to vector<80x8xf32>
    %243 = arith.addf %239, %242 : vector<80x8xf32>
    %c3_137 = arith.constant 3 : index
    %c0_138 = arith.constant 0 : index
    %c0_139 = arith.constant 0 : index
    %244 = vector.load %arg6[%c3_137, %c0_138, %c0_139] : memref<4x32x8xf32, #tpu.memory_space<vmem>>, vector<1x32x8xf32>
    %245 = vector.shape_cast %244 : vector<1x32x8xf32> to vector<32x8xf32>
    %cst_140 = arith.constant dense<0.000000e+00> : vector<80x8xf32>
    %246 = tpu.matmul %0, %245, %cst_140 {dimension_numbers = #tpu.dot_dimension_numbers<[1], [0], [0], [1], [0, 0, 1, 1], [], []>} : vector<80x32xf32>, vector<32x8xf32>, vector<80x8xf32> -> vector<80x8xf32>
    %c3_141 = arith.constant 3 : index
    %c0_142 = arith.constant 0 : index
    %c0_143 = arith.constant 0 : index
    %247 = vector.load %arg7[%c3_141, %c0_142, %c0_143] : memref<4x1x8xf32, #tpu.memory_space<vmem>>, vector<1x1x8xf32>
    %248 = vector.shape_cast %247 : vector<1x1x8xf32> to vector<1x8xf32>
    %249 = vector.broadcast %248 : vector<1x8xf32> to vector<80x8xf32>
    %250 = arith.addf %246, %249 : vector<80x8xf32>
    %c24 = arith.constant 24 : index
    %c0_144 = arith.constant 0 : index
    %251 = vector.load %arg8[%c24, %c0_144] : memref<32x32xf32, #tpu.memory_space<vmem>>, vector<8x32xf32>
    %252 = vector.extract_strided_slice %236 {offsets = [0, 0], sizes = [40, 8], strides = [1, 1]} : vector<80x8xf32> to vector<40x8xf32>
    %253 = vector.extract_strided_slice %243 {offsets = [0, 0], sizes = [40, 8], strides = [1, 1]} : vector<80x8xf32> to vector<40x8xf32>
    %254 = vector.extract_strided_slice %250 {offsets = [0, 0], sizes = [40, 8], strides = [1, 1]} : vector<80x8xf32> to vector<40x8xf32>
    %cst_145 = arith.constant dense<0.000000e+00> : vector<40x40xf32>
    %255 = tpu.matmul %252, %253, %cst_145 {dimension_numbers = #tpu.dot_dimension_numbers<[1], [1], [0], [0], [0, 0, 1, 0], [], []>} : vector<40x8xf32>, vector<40x8xf32>, vector<40x40xf32> -> vector<40x40xf32>
    %256 = vector.broadcast %6 : vector<1x40xf32> to vector<40x40xf32>
    %257 = arith.addf %255, %256 : vector<40x40xf32>
    %cst_146 = arith.constant dense<0xFF800000> : vector<40xf32>
    %258 = vector.multi_reduction <maximumf>, %257, %cst_146 [1] : vector<40x40xf32> to vector<40xf32>
    %259 = vector.shape_cast %258 : vector<40xf32> to vector<40x1xf32>
    %260 = vector.broadcast %259 : vector<40x1xf32> to vector<40x40xf32>
    %261 = arith.subf %257, %260 : vector<40x40xf32>
    %262 = math.exp %261 : vector<40x40xf32>
    %cst_147 = arith.constant dense<0.000000e+00> : vector<40xf32>
    %263 = vector.multi_reduction <add>, %262, %cst_147 [1] : vector<40x40xf32> to vector<40xf32>
    %264 = vector.shape_cast %263 : vector<40xf32> to vector<40x1xf32>
    %265 = tpu.reciprocal %264 {approx = true} : vector<40x1xf32> -> vector<40x1xf32>
    %266 = vector.broadcast %265 : vector<40x1xf32> to vector<40x40xf32>
    %267 = arith.mulf %262, %266 : vector<40x40xf32>
    %cst_148 = arith.constant dense<0.000000e+00> : vector<40x8xf32>
    %268 = tpu.matmul %267, %254, %cst_148 {dimension_numbers = #tpu.dot_dimension_numbers<[1], [0], [0], [1], [0, 0, 1, 1], [], []>} : vector<40x40xf32>, vector<40x8xf32>, vector<40x8xf32> -> vector<40x8xf32>
    %269 = arith.addf %268, %252 : vector<40x8xf32>
    %270 = vector.shape_cast %9 : vector<40x1xi1> to vector<40x1xi1>
    %271 = vector.broadcast %270 : vector<40x1xi1> to vector<40x8xi1>
    %272 = arith.select %271, %269, %268 : vector<40x8xi1>, vector<40x8xf32>
    %c0_149 = arith.constant 0 : index
    %c0_150 = arith.constant 0 : index
    %273 = vector.load %arg10[%c0_149, %c0_150] : memref<80x32xf32, #tpu.memory_space<vmem>>, vector<40x32xf32>
    %cst_151 = arith.constant dense<0.000000e+00> : vector<40x32xf32>
    %274 = tpu.matmul %272, %251, %cst_151 {dimension_numbers = #tpu.dot_dimension_numbers<[1], [0], [0], [1], [0, 0, 1, 1], [], []>} : vector<40x8xf32>, vector<8x32xf32>, vector<40x32xf32> -> vector<40x32xf32>
    %275 = arith.addf %273, %274 : vector<40x32xf32>
    %c0_152 = arith.constant 0 : index
    %c0_153 = arith.constant 0 : index
    %276 = vector.load %arg10[%c0_152, %c0_153] : memref<80x32xf32, #tpu.memory_space<vmem>>, vector<40x32xf32>
    tpu.vector_store %arg10[%c0_152, %c0_153], %275 {strides = array<i32>} : memref<80x32xf32, #tpu.memory_space<vmem>>, vector<40x32xf32>,
    %277 = vector.extract_strided_slice %236 {offsets = [40, 0], sizes = [40, 8], strides = [1, 1]} : vector<80x8xf32> to vector<40x8xf32>
    %278 = vector.extract_strided_slice %243 {offsets = [40, 0], sizes = [40, 8], strides = [1, 1]} : vector<80x8xf32> to vector<40x8xf32>
    %279 = vector.extract_strided_slice %250 {offsets = [40, 0], sizes = [40, 8], strides = [1, 1]} : vector<80x8xf32> to vector<40x8xf32>
    %cst_154 = arith.constant dense<0.000000e+00> : vector<40x40xf32>
    %280 = tpu.matmul %277, %278, %cst_154 {dimension_numbers = #tpu.dot_dimension_numbers<[1], [1], [0], [0], [0, 0, 1, 0], [], []>} : vector<40x8xf32>, vector<40x8xf32>, vector<40x40xf32> -> vector<40x40xf32>
    %281 = vector.broadcast %6 : vector<1x40xf32> to vector<40x40xf32>
    %282 = arith.addf %280, %281 : vector<40x40xf32>
    %cst_155 = arith.constant dense<0xFF800000> : vector<40xf32>
    %283 = vector.multi_reduction <maximumf>, %282, %cst_155 [1] : vector<40x40xf32> to vector<40xf32>
    %284 = vector.shape_cast %283 : vector<40xf32> to vector<40x1xf32>
    %285 = vector.broadcast %284 : vector<40x1xf32> to vector<40x40xf32>
    %286 = arith.subf %282, %285 : vector<40x40xf32>
    %287 = math.exp %286 : vector<40x40xf32>
    %cst_156 = arith.constant dense<0.000000e+00> : vector<40xf32>
    %288 = vector.multi_reduction <add>, %287, %cst_156 [1] : vector<40x40xf32> to vector<40xf32>
    %289 = vector.shape_cast %288 : vector<40xf32> to vector<40x1xf32>
    %290 = tpu.reciprocal %289 {approx = true} : vector<40x1xf32> -> vector<40x1xf32>
    %291 = vector.broadcast %290 : vector<40x1xf32> to vector<40x40xf32>
    %292 = arith.mulf %287, %291 : vector<40x40xf32>
    %cst_157 = arith.constant dense<0.000000e+00> : vector<40x8xf32>
    %293 = tpu.matmul %292, %279, %cst_157 {dimension_numbers = #tpu.dot_dimension_numbers<[1], [0], [0], [1], [0, 0, 1, 1], [], []>} : vector<40x40xf32>, vector<40x8xf32>, vector<40x8xf32> -> vector<40x8xf32>
    %294 = arith.addf %293, %277 : vector<40x8xf32>
    %295 = vector.shape_cast %9 : vector<40x1xi1> to vector<40x1xi1>
    %296 = vector.broadcast %295 : vector<40x1xi1> to vector<40x8xi1>
    %297 = arith.select %296, %294, %293 : vector<40x8xi1>, vector<40x8xf32>
    %c40_158 = arith.constant 40 : index
    %c0_159 = arith.constant 0 : index
    %298 = vector.load %arg10[%c40_158, %c0_159] : memref<80x32xf32, #tpu.memory_space<vmem>>, vector<40x32xf32>
    %cst_160 = arith.constant dense<0.000000e+00> : vector<40x32xf32>
    %299 = tpu.matmul %297, %251, %cst_160 {dimension_numbers = #tpu.dot_dimension_numbers<[1], [0], [0], [1], [0, 0, 1, 1], [], []>} : vector<40x8xf32>, vector<8x32xf32>, vector<40x32xf32> -> vector<40x32xf32>
    %300 = arith.addf %298, %299 : vector<40x32xf32>
    %c40_161 = arith.constant 40 : index
    %c0_162 = arith.constant 0 : index
    %301 = vector.load %arg10[%c40_161, %c0_162] : memref<80x32xf32, #tpu.memory_space<vmem>>, vector<40x32xf32>
    tpu.vector_store %arg10[%c40_161, %c0_162], %300 {strides = array<i32>} : memref<80x32xf32, #tpu.memory_space<vmem>>, vector<40x32xf32>,
    return
  }
  func.func @transform_0(%arg0: i32) -> (i32, i32) {
    %c0_i32 = arith.constant 0 : i32
    %c0_i32_0 = arith.constant 0 : i32
    %c0_i32_1 = arith.constant 0 : i32
    return %c0_i32, %c0_i32_0 : i32, i32
  }
  func.func @transform_1(%arg0: i32) -> (i32, i32, i32) {
    %c0_i32 = arith.constant 0 : i32
    %c0_i32_0 = arith.constant 0 : i32
    %c0_i32_1 = arith.constant 0 : i32
    %c0_i32_2 = arith.constant 0 : i32
    return %c0_i32, %c0_i32_0, %c0_i32_1 : i32, i32, i32
  }
  func.func @transform_2(%arg0: i32) -> (i32, i32, i32) {
    %c0_i32 = arith.constant 0 : i32
    %c0_i32_0 = arith.constant 0 : i32
    %c0_i32_1 = arith.constant 0 : i32
    %c0_i32_2 = arith.constant 0 : i32
    return %c0_i32, %c0_i32_0, %c0_i32_1 : i32, i32, i32
  }
  func.func @transform_3(%arg0: i32) -> (i32, i32, i32) {
    %c0_i32 = arith.constant 0 : i32
    %c0_i32_0 = arith.constant 0 : i32
    %c0_i32_1 = arith.constant 0 : i32
    %c0_i32_2 = arith.constant 0 : i32
    return %c0_i32, %c0_i32_0, %c0_i32_1 : i32, i32, i32
  }
  func.func @transform_4(%arg0: i32) -> (i32, i32, i32) {
    %c0_i32 = arith.constant 0 : i32
    %c0_i32_0 = arith.constant 0 : i32
    %c0_i32_1 = arith.constant 0 : i32
    %c0_i32_2 = arith.constant 0 : i32
    return %c0_i32, %c0_i32_0, %c0_i32_1 : i32, i32, i32
  }
  func.func @transform_5(%arg0: i32) -> (i32, i32, i32) {
    %c0_i32 = arith.constant 0 : i32
    %c0_i32_0 = arith.constant 0 : i32
    %c0_i32_1 = arith.constant 0 : i32
    %c0_i32_2 = arith.constant 0 : i32
    return %c0_i32, %c0_i32_0, %c0_i32_1 : i32, i32, i32
  }
  func.func @transform_6(%arg0: i32) -> (i32, i32, i32) {
    %c0_i32 = arith.constant 0 : i32
    %c0_i32_0 = arith.constant 0 : i32
    %c0_i32_1 = arith.constant 0 : i32
    %c0_i32_2 = arith.constant 0 : i32
    return %c0_i32, %c0_i32_0, %c0_i32_1 : i32, i32, i32
  }
  func.func @transform_7(%arg0: i32) -> (i32, i32) {
    %c0_i32 = arith.constant 0 : i32
    %c0_i32_0 = arith.constant 0 : i32
    %c0_i32_1 = arith.constant 0 : i32
    return %c0_i32, %c0_i32_0 : i32, i32
  }
  func.func @transform_8(%arg0: i32) -> (i32, i32) {
    %c0_i32 = arith.constant 0 : i32
    %c0_i32_0 = arith.constant 0 : i32
    %c0_i32_1 = arith.constant 0 : i32
    return %c0_i32, %c0_i32_0 : i32, i32
  }
  func.func @transform_9(%arg0: i32) -> (i32, i32) {
    %c0_i32 = arith.constant 0 : i32
    %c0_i32_0 = arith.constant 0 : i32
    %c0_i32_1 = arith.constant 0 : i32
    return %c0_i32, %c0_i32_0 : i32, i32
  }
}

</mosaic_0001>

<bundles_post_ra>
// kernel: _msa_pallas.1
= control target key start
LH: loop header
LB: loop body
LE: loop exit
PB: predicated region body
PF: predicated region fallthrough
CT: control target
= control target key end

     0   :  { %vm64_vm0 = vcmask 261120   ;;  %v6853_v20 = vmov 0.0|0.0   ;;  %vm6854_vm1 = vmmov 0   ;;  %v6855_v23 = vmov 0.0   ;;  %s8946_s3 = inlined_call_operand.vmem [shape: f32[4,32,8], index: 3, kind: input, shape index: {}]   ;;  %s8947_s0 = inlined_call_operand.vmem [shape: f32[80,32], index: 0, kind: input, shape index: {}]   ;;  %s8948_s1 = inlined_call_operand.vmem [shape: f32[4,32,8], index: 1, kind: input, shape index: {}]   ;;  %s8949_s4 = inlined_call_operand.vmem [shape: f32[4,1,8], index: 4, kind: input, shape index: {}]   ;;  %s8950_s2 = inlined_call_operand.vmem [shape: f32[4,1,8], index: 2, kind: input, shape index: {}]   ;;  %s8951_s5 = inlined_call_operand.vmem [shape: f32[4,32,8], index: 5, kind: input, shape index: {}]   ;;  %s8952_s6 = inlined_call_operand.vmem [shape: f32[4,1,8], index: 6, kind: input, shape index: {}]   ;;  %s8953_s7 = inlined_call_operand.vmem [shape: f32[32,32], index: 7, kind: input, shape index: {}]   ;;  %s8954_s8 = inlined_call_operand.vmem [shape: f32[1,32], index: 8, kind: input, shape index: {}]   ;;  %s8955_s9 = inlined_call_operand.vmem [shape: f32[80,32], index: 9, kind: output, shape index: {}]  }
   0x1   :  { %v231_v0 = vld [vmem:[%s8946_s3] sm:$0xff]  ;;  %v232_v1 = vld [vmem:[%s8946_s3 + $0x8] sm:$0xff]  ;;  %v233_v2 = vld [vmem:[%s8946_s3 + $0x10] sm:$0xff]  ;;  %vm484_vm2 = vcmask 64512   ;;  %vm605_vm5 = vcmask 326656  }
   0x2   :  { %v6469_v3 = vpack.c.bf16 %v232_v1, %v231_v0  ;;  %v234_v4 = vld [vmem:[%s8946_s3 + $0x18] sm:$0xff]  ;;  %v6922_v5 = vld [vmem:[%s8947_s0] sm:$0xff]  ;;  %v76_v8 = vld [vmem:[%s8948_s1 + $0x8] sm:$0xff] }
   0x3   :  { %v6473_v6 = vpack.c.bf16 %v234_v4, %v233_v2  ;;  %5680 = vmatprep.mubr.msk.f32.mxu1 %vm64_vm0, %v6922_v5  ;;  %v75_v7 = vld [vmem:[%s8948_s1] sm:$0xff]  ;;  %5657 = vmatprep.mubr.msk.f32.mxu0 %vm64_vm0, %v6922_v5  ;;  %v77_v10 = vld [vmem:[%s8948_s1 + $0x10] sm:$0xff]  ;;  %v78_v11 = vld [vmem:[%s8948_s1 + $0x18] sm:$0xff] }
   0x4   :  { %6470 = vmatprep.subr.bf16.mxu1 %v6469_v3  ;;  %v6461_v9 = vpack.c.bf16 %v76_v8, %v75_v7  ;;  %v6465_v12 = vpack.c.bf16 %v78_v11, %v77_v10  ;;  %v6943_v13 = vld [vmem:[%s8947_s0 + $0x8] sm:$0xff]  ;;  %v6948_v14 = vld [vmem:[%s8947_s0 + $0x10] sm:$0xff]  ;;  %v6957_v15 = vld [vmem:[%s8947_s0 + $0x18] sm:$0xff] }
   0x5   :  { %6472 = vmatpush3.bf16.msra.mxu1 %v6469_v3  ;;  %v6962_v16 = vld [vmem:[%s8947_s0 + $0x20] sm:$0xff]  ;;  %v6975_v17 = vld [vmem:[%s8947_s0 + $0x28] sm:$0xff]  ;;  %v6980_v18 = vld [vmem:[%s8947_s0 + $0x30] sm:$0xff]  ;;  %v42_v3 = vlaneseq }
   0x6   :  { %6474 = vmatprep.subr.bf16.mxu1 %v6473_v6  ;;  %6462 = vmatprep.subr.bf16.mxu0 %v6461_v9  ;;  %v6993_v19 = vld [vmem:[%s8947_s0 + $0x38] sm:$0xff]  ;;  %v7007_v21 = vld [vmem:[%s8947_s0 + $0x40] sm:$0xff]  ;;  %v7012_v22 = vld [vmem:[%s8947_s0 + $0x48] sm:$0xff] }
   0x7   :  { %6464 = vmatpush3.bf16.msra.mxu0 %v6461_v9  ;;  %v7029_v24 = vld [vmem:[%s8949_s4] ss:$0 sm:$0xff]  ;;  %vm7035_vm3 = vmpackc.low %vm484_vm2, %vm484_vm2  ;;  %v358_v62 = vld [vmem:[%s8951_s5 + $0x8] sm:$0xff]  ;;  %v43_v4 = vand.u32 127, %v42_v3 }
   0x8   :  { %6466 = vmatprep.subr.bf16.mxu0 %v6465_v12  ;;  %v7061_v50 = vld [vmem:[%s8950_s2] ss:$0 sm:$0xff]  ;;  %v359_v63 = vld [vmem:[%s8951_s5 + $0x10] sm:$0xff]  ;;  %v360_v1 = vld [vmem:[%s8951_s5 + $0x18] sm:$0xff] }
   0x9   :  { %6476 = vmatpush3.bf16.msra.mxu1 %v6473_v6  ;;  %v357_v61 = vld [vmem:[%s8951_s5] sm:$0xff]  ;;  %v6481_v2 = vpack.c.bf16 %v360_v1, %v359_v63  ;;  %vm44_vm4 = vcmp.lt.s32.totalorder %v43_v4, 33  ;;  %v6856_v6 = vmov -1e+30  }
   0xa   :  { %6485 = vmatprep.subr.bf16.mxu1 %v6853_v20  ;;  %v6477_v0 = vpack.c.bf16 %v358_v62, %v357_v61  ;;  %v7144_v7 = vsel %vm44_vm4, 0.0, %v6856_v6 }
   0xb   :  { %6468 = vmatpush3.bf16.msra.mxu0 %v6465_v12 }
   0xc   :  { %5681 = vmatmul.mubr.msk.f32.vlgmr.msra.gmra.mrb[0].mxu1 %vm64_vm0, %v6943_v13  ;;  %6478 = vmatprep.subr.bf16.mxu0 %v6477_v0 }
   0xd   :  { %5683 = vmatprep.mubr.msk.f32.mxu1 %vm64_vm0, %v6948_v14 }
   0xe   :  { %5658 = vmatmul.mubr.msk.f32.vlgmr.msra.gmra.mrb[0].mxu0 %vm64_vm0, %v6943_v13 }
   0xf   :  { %5660 = vmatprep.mubr.msk.f32.mxu0 %vm64_vm0, %v6948_v14  ;;  %6480 = vmatpush3.bf16.msra.mxu0 %v6477_v0 }
  0x10   :  { %5684 = vmatmul.mubr.msk.f32.gmra.mrb[2].mxu1 %vm64_vm0, %v6957_v15  ;;  %6482 = vmatprep.subr.bf16.mxu0 %v6481_v2 }
  0x11   :  { %5686 = vmatprep.mubr.msk.f32.mxu1 %vm64_vm0, %v6962_v16 }
  0x12   :  { %5661 = vmatmul.mubr.msk.f32.gmra.mrb[2].mxu0 %vm64_vm0, %v6957_v15 }
  0x13   :  { %5663 = vmatprep.mubr.msk.f32.mxu0 %vm64_vm0, %v6962_v16  ;;  %6484 = vmatpush3.bf16.msra.mxu0 %v6481_v2 }
  0x14   :  { %5687 = vmatmul.mubr.msk.f32.gmra.mrb[4].mxu1 %vm64_vm0, %v6975_v17  ;;  %6493 = vmatprep.subr.bf16.mxu0 %v6853_v20 }
  0x15   :  { %5689 = vmatprep.mubr.msk.f32.mxu1 %vm64_vm0, %v6980_v18 }
  0x16   :  { %5664 = vmatmul.mubr.msk.f32.gmra.mrb[4].mxu0 %vm64_vm0, %v6975_v17 }
  0x17   :  { %5666 = vmatprep.mubr.msk.f32.mxu0 %vm64_vm0, %v6980_v18 }
  0x18   :  { %5690 = vmatmul.mubr.msk.f32.gmra.mrb[6].mxu1 %vm64_vm0, %v6993_v19 }
  0x19   :  { %5692 = vmatprep.mubr.msk.f32.mxu1 %vm64_vm0, %v7007_v21 }
  0x1a   :  { %5667 = vmatmul.mubr.msk.f32.gmra.mrb[6].mxu0 %vm64_vm0, %v6993_v19 }
  0x1b   :  { %5669 = vmatprep.mubr.msk.f32.mxu0 %vm64_vm0, %v7007_v21 }
  0x1c   :  { %5693 = vmatmul.mubr.msk.f32.gmra.mrb[8].mxu1 %vm64_vm0, %v7012_v22 }
  0x1d   :  { %5728 = vmatprep.mubr.msk.f32.mxu1 %vm6854_vm1, %v6855_v23 }
  0x1e   :  { %5670 = vmatmul.mubr.msk.f32.gmra.mrb[8].mxu0 %vm64_vm0, %v7012_v22 }
  0x1f   :  { %5703 = vmatprep.mubr.msk.f32.mxu0 %vm64_vm0, %v6922_v5 }
  0x22   :  { %5704 = vmatmul.mubr.msk.f32.vlgmr.msra.gmra.mrb[10].mxu0 %vm64_vm0, %v6943_v13 }
  0x23   :  { %5706 = vmatprep.mubr.msk.f32.mxu0 %vm64_vm0, %v6948_v14 }
  0x26   :  { %5707 = vmatmul.mubr.msk.f32.gmra.mrb[12].mxu0 %vm64_vm0, %v6957_v15 }
  0x27   :  { %5709 = vmatprep.mubr.msk.f32.mxu0 %vm64_vm0, %v6962_v16 }
  0x2a   :  { %5710 = vmatmul.mubr.msk.f32.gmra.mrb[14].mxu0 %vm64_vm0, %v6975_v17 }
  0x2b   :  { %5712 = vmatprep.mubr.msk.f32.mxu0 %vm64_vm0, %v6980_v18 }
  0x2e   :  { %5713 = vmatmul.mubr.msk.f32.gmra.mrb[16].mxu0 %vm64_vm0, %v6993_v19 }
  0x2f   :  { %5715 = vmatprep.mubr.msk.f32.mxu0 %vm64_vm0, %v7007_v21 }
  0x32   :  { %5716 = vmatmul.mubr.msk.f32.gmra.mrb[18].mxu0 %vm64_vm0, %v7012_v22 }
  0x33   :  { %5753 = vmatprep.mubr.msk.f32.mxu0 %vm6854_vm1, %v6855_v23 }
  0xdf   :  { %v5682_v25 = vpop.f32.mrb[0].mxu1 }
  0xe0   :  { %v314_v26 = vadd.f32 %v5682_v25, %v7029_v24  ;;  %v308_v27 = vpop.f32.mrb[1].mxu1 }
  0xe1   :  { %v309_v28 = vadd.f32 %v7029_v24, %v308_v27  ;;  %v5659_v30 = vpop.f32.mrb[0].mxu0 }
  0xe2   :  { %v182_v33 = vpop.f32.mrb[1].mxu0  ;;  %v7073_v52 = vadd.f32 %v5659_v30, %v7061_v50 }
  0xe3   :  { %v6486_v31 = vpack.c.bf16 %v314_v26, %v309_v28  ;;  %v5685_v32 = vpop.f32.mrb[2].mxu1  ;;  %v7064_v51 = vadd.f32 %v7061_v50, %v182_v33 }
  0xe4   :  { %v324_v34 = vadd.f32 %v5685_v32, %v7029_v24  ;;  %v318_v35 = vpop.f32.mrb[3].mxu1 }
  0xe5   :  { %6488 = vmatpush3.bf16.xpose.msk.msra.mxu1 %vm7035_vm3, %v6486_v31  ;;  %v319_v36 = vadd.f32 %v7029_v24, %v318_v35  ;;  %v5662_v37 = vpop.f32.mrb[2].mxu0 }
  0xe6   :  { %6489 = vmatprep.subr.bf16.mxu1 %v6853_v20  ;;  %v192_v40 = vpop.f32.mrb[3].mxu0  ;;  %v7087_v54 = vadd.f32 %v5662_v37, %v7061_v50 }
  0xe7   :  { %v6490_v38 = vpack.c.bf16 %v324_v34, %v319_v36  ;;  %v5688_v39 = vpop.f32.mrb[4].mxu1  ;;  %v7076_v53 = vadd.f32 %v7061_v50, %v192_v40 }
  0xe8   :  { %v328_v41 = vpop.f32.mrb[5].mxu1  ;;  %v7047_v43 = vadd.f32 %v5688_v39, %v7029_v24 }
  0xe9   :  { %v7044_v42 = vpop.f32.mrb[4].mxu0  ;;  %v329_v49 = vadd.f32 %v7029_v24, %v328_v41 }
  0xea   :  { %v202_v45 = vpop.f32.mrb[5].mxu0 }
  0xeb   :  { %v5691_v44 = vpop.f32.mrb[6].mxu1  ;;  %v7090_v55 = vadd.f32 %v7061_v50, %v202_v45 }
  0xec   :  { %v338_v46 = vpop.f32.mrb[7].mxu1  ;;  %v7101_v56 = vadd.f32 %v5691_v44, %v7029_v24 }
  0xed   :  { %6492 = vmatpush3.bf16.xpose.msk.msra.mxu1 %vm7035_vm3, %v6490_v38  ;;  %v7052_v47 = vadd.f32 %v7029_v24, %v338_v46  ;;  %v7156_v41 = vpop.f32.mrb[6].mxu0 }
  0xee   :  { %5726 = vmatprep.subr.mxu1 %v6855_v23  ;;  %v7158_v44 = vpop.f32.mrb[7].mxu0 }
  0xef   :  { %v6500_v48 = vpack.c.bf16 %v7052_v47, %v7047_v43  ;;  %v7103_v57 = vpop.f32.mrb[8].mxu1 }
  0xf0   :  { %v348_v58 = vpop.f32.mrb[9].mxu1 }
  0xf1   :  { %v7106_v59 = vadd.f32 %v7029_v24, %v348_v58  ;;  %v7160_v45 = vpop.f32.mrb[8].mxu0 }
  0xf2   :  { %v7162_v46 = vpop.f32.mrb[9].mxu0 }
  0xf3   :  { %v6504_v60 = vpack.c.bf16 %v7106_v59, %v7101_v56  ;;  %v7232_v56 = vadd.f32 %v7044_v42, %v7061_v50  ;;  %v7249_v42 = vadd.f32 %v7156_v41, %v7061_v50  ;;  %v7265_v59 = vadd.f32 %v7160_v45, %v7061_v50 }
  0xf4   :  { %v7276_v41 = vshrl.u32 %v42_v3, 7 }
  0xf5   :  { %5727 = vmatpush3.xpose.msk.msra.mxu1 %vm484_vm2, %v329_v49  ;;  %v7167_v49 = vld [vmem:[%s8952_s6] ss:$0 sm:$0xff]  ;;  %v5705_v58 = vpop.f32.mrb[10].mxu0 }
  0xf6   :  { %5768 = vmatprep.subr.mxu1 %v6855_v23  ;;  %v440_v61 = vadd.f32 %v5705_v58, %v7167_v49  ;;  %v434_v62 = vpop.f32.mrb[11].mxu0  ;;  %vm52_vm6 = vcmp.ge.s32.totalorder %v7276_v41, 1 }
  0xf7   :  { %v435_v63 = vadd.f32 %v7167_v49, %v434_v62 }
  0xf8   :  { %5729 = vmatmul.mubr.msk.f32.vlgmr.msra.gmra.mrb[10].mxu1 %vm484_vm2, %v7064_v51 }
  0xf9   :  { %5731 = vmatprep.mubr.msk.f32.mxu1 %vm6854_vm1, %v6855_v23  ;;  %v6494_v0 = vpack.c.bf16 %v440_v61, %v435_v63  ;;  %v5708_v1 = vpop.f32.mrb[12].mxu0 }
  0xfa   :  { %v450_v2 = vadd.f32 %v5708_v1, %v7167_v49  ;;  %v444_v4 = vpop.f32.mrb[13].mxu0 }
  0xfb   :  { %6495 = vmatpush3.bf16.msra.mxu0 %v6494_v0  ;;  %v445_v6 = vadd.f32 %v7167_v49, %v444_v4 }
  0xfc   :  { %5732 = vmatmul.mubr.msk.f32.gmra.mrb[12].mxu1 %vm484_vm2, %v7073_v52  ;;  %6496 = vmatprep.subr.bf16.mxu0 %v6853_v20 }
  0xfd   :  { %5734 = vmatprep.mubr.msk.f32.mxu1 %vm6854_vm1, %v6855_v23 }
 0x100   :  { %5735 = vmatmul.mubr.msk.f32.gmra.mrb[14].mxu1 %vm484_vm2, %v7076_v53 }
 0x101   :  { %5737 = vmatprep.mubr.msk.f32.mxu1 %vm6854_vm1, %v6855_v23 }
 0x104   :  { %5738 = vmatmul.mubr.msk.f32.gmra.mrb[16].mxu1 %vm484_vm2, %v7087_v54 }
 0x105   :  { %5740 = vmatprep.mubr.msk.f32.mxu1 %vm6854_vm1, %v6855_v23 }
 0x108   :  { %5741 = vmatmul.mubr.msk.f32.gmra.mrb[18].mxu1 %vm484_vm2, %v7090_v55 }
 0x109   :  { %5770 = vmatprep.mubr.msk.f32.mxu1 %vm6854_vm1, %v6855_v23 }
 0x1cb   :  { %v581_v8 = vpop.f32.mrb[10].mxu1 }
 0x1cc   :  { %v582_v9 = vadd.f32 %v581_v8, %v7144_v7  ;;  %v5730_v10 = vpop.f32.mrb[11].mxu1  ;;  %v6497_v8 = vpack.c.bf16 %v450_v2, %v445_v6  ;;  %v5711_v2 = vpop.f32.mrb[14].mxu0 }
 0x1ce   :  { %v606_v11 = vsel %vm605_vm5, %v582_v9, -inf  ;;  %6498 = vmatpush3.bf16.msra.mxu0 %v6497_v8 }
 0x1cf   :  { %607 = vmax.xlane.f32.xlu0 %v606_v11  ;;  %v586_v12 = vpop.f32.mrb[12].mxu1  ;;  %5751 = vmatprep.subr.mxu0 %v6855_v23 }
 0x1d0   :  { %v587_v25 = vadd.f32 %v586_v12, %v7144_v7  ;;  %v5733_v26 = vpop.f32.mrb[13].mxu1 }
 0x1d2   :  { %v609_v27 = vsel %vm605_vm5, %v587_v25, -inf }
 0x1d3   :  { %610 = vmax.xlane.f32.xlu0 %v609_v27  ;;  %v591_v28 = vpop.f32.mrb[14].mxu1 }
 0x1d4   :  { %v592_v30 = vadd.f32 %v591_v28, %v7144_v7  ;;  %v5736_v31 = vpop.f32.mrb[15].mxu1 }
 0x1d6   :  { %v612_v32 = vsel %vm605_vm5, %v592_v30, -inf }
 0x1d7   :  { %613 = vmax.xlane.f32.xlu1 %v612_v32  ;;  %v596_v33 = vpop.f32.mrb[16].mxu1 }
 0x1d8   :  { %v597_v34 = vadd.f32 %v596_v33, %v7144_v7  ;;  %v5739_v35 = vpop.f32.mrb[17].mxu1 }
 0x1da   :  { %v615_v36 = vsel %vm605_vm5, %v597_v34, -inf }
 0x1db   :  { %616 = vmax.xlane.f32.xlu1 %v615_v36  ;;  %v601_v37 = vpop.f32.mrb[18].mxu1 }
 0x1dc   :  { %v602_v38 = vadd.f32 %v601_v37, %v7144_v7  ;;  %v5742_v39 = vpop.f32.mrb[19].mxu1 }
 0x1de   :  { %v618_v40 = vsel %vm605_vm5, %v602_v38, -inf }
 0x1df   :  { %619 = vmax.xlane.f32.xlu0 %v618_v40 }
 0x25c   :  { %v608_v10 = vpop.xlane.xlu0 %607 }
 0x25d   :  { %v621_v11 = vsub.f32 %v582_v9, %v608_v10  ;;  %v7181_v10 = vadd.f32 %v5711_v2, %v7167_v49 }
 0x25f   :  { %v626_v12 = vmul.f32 1.442695, %v621_v11 }
 0x260   :  { %v611_v26 = vpop.xlane.xlu0 %610 }
 0x261   :  { %6673 = vpow2.f32 %v626_v12  ;;  %v622_v27 = vsub.f32 %v587_v25, %v611_v26 }
 0x263   :  { %v628_v28 = vmul.f32 1.442695, %v622_v27 }
 0x264   :  { %v614_v31 = vpop.xlane.xlu1 %613 }
 0x265   :  { %6675 = vpow2.f32 %v628_v28  ;;  %v623_v32 = vsub.f32 %v592_v30, %v614_v31 }
 0x267   :  { %v630_v33 = vmul.f32 1.442695, %v623_v32 }
 0x268   :  { %v617_v35 = vpop.xlane.xlu1 %616 }
 0x269   :  { %6677 = vpow2.f32 %v630_v33  ;;  %v624_v36 = vsub.f32 %v597_v34, %v617_v35 }
 0x26b   :  { %v6674_v37 = vpop.eup %6673  ;;  %v632_v39 = vmul.f32 1.442695, %v624_v36 }
 0x26c   :  { %v620_v40 = vpop.xlane.xlu0 %619  ;;  %v636_v58 = vsel %vm605_vm5, %v6674_v37, 0.0 }
 0x26d   :  { %6679 = vpow2.f32 %v632_v39  ;;  %v625_v61 = vsub.f32 %v602_v38, %v620_v40  ;;  %637 = vadd.xlane.f32.xlu1 %v636_v58  ;;  %v454_v38 = vpop.f32.mrb[15].mxu0 }
 0x26e   :  { %v5714_v6 = vpop.f32.mrb[16].mxu0  ;;  %v455_v11 = vadd.f32 %v7167_v49, %v454_v38 }
 0x26f   :  { %v6676_v9 = vpop.eup %6675  ;;  %v634_v62 = vmul.f32 1.442695, %v625_v61  ;;  %v464_v8 = vpop.f32.mrb[17].mxu0  ;;  %v7191_v27 = vadd.f32 %v5714_v6, %v7167_v49 }
 0x270   :  { %v639_v25 = vsel %vm605_vm5, %v6676_v9, 0.0  ;;  %v7185_v12 = vadd.f32 %v7167_v49, %v464_v8  ;;  %5752 = vmatpush3.msra.mxu0 %v455_v11  ;;  %v7193_v28 = vpop.f32.mrb[18].mxu0 }
 0x271   :  { %6681 = vpow2.f32 %v634_v62  ;;  %640 = vadd.xlane.f32.xlu0 %v639_v25  ;;  %6499 = vmatprep.subr.bf16.mxu0 %v6853_v20  ;;  %v474_v31 = vpop.f32.mrb[19].mxu0 }
 0x272   :  { %v6508_v26 = vpack.c.bf16 %v7185_v12, %v7181_v10  ;;  %v7196_v32 = vadd.f32 %v7167_v49, %v474_v31 }
 0x273   :  { %v6678_v63 = vpop.eup %6677 }
 0x274   :  { %v642_v30 = vsel %vm605_vm5, %v6678_v63, 0.0  ;;  %v6511_v33 = vpack.c.bf16 %v7196_v32, %v7191_v27 }
 0x275   :  { %643 = vadd.xlane.f32.xlu1 %v642_v30 }
 0x277   :  { %v6680_v0 = vpop.eup %6679 }
 0x278   :  { %v645_v34 = vsel %vm605_vm5, %v6680_v0, 0.0 }
 0x279   :  { %646 = vadd.xlane.f32.xlu0 %v645_v34 }
 0x27b   :  { %v6682_v1 = vpop.eup %6681 }
 0x27c   :  { %v648_v4 = vsel %vm605_vm5, %v6682_v1, 0.0 }
 0x27d   :  { %649 = vadd.xlane.f32.xlu1 %v648_v4  ;;  %v480_v4 = vadd.f32 %v7193_v28, %v7167_v49 }
 0x2fa   :  { %v638_v35 = vpop.xlane.xlu1 %637 }
 0x2fb   :  { %6683 = vrcp.f32 %v638_v35 }
 0x2fe   :  { %v641_v36 = vpop.xlane.xlu0 %640 }
 0x2ff   :  { %6685 = vrcp.f32 %v641_v36 }
 0x302   :  { %v644_v39 = vpop.xlane.xlu1 %643 }
 0x303   :  { %6687 = vrcp.f32 %v644_v39 }
 0x305   :  { %v6684_v40 = vpop.eup %6683 }
 0x306   :  { %v656_v58 = vmul.f32 %v6684_v40, %v6674_v37  ;;  %v647_v61 = vpop.xlane.xlu0 %646 }
 0x307   :  { %6689 = vrcp.f32 %v647_v61 }
 0x308   :  { %5754 = vmatmul.mubr.msk.f32.vlgmr.msra.gmra.mrb[20].mxu0 %vm605_vm5, %v656_v58 }
 0x309   :  { %v6686_v62 = vpop.eup %6685  ;;  %6502 = vmatpush3.bf16.xpose.msk.msra.mxu0 %vm7035_vm3, %v6500_v48  ;;  %5756 = vmatprep.mubr.msk.f32.mxu0 %vm6854_vm1, %v6855_v23 }
 0x30a   :  { %v650_v25 = vpop.xlane.xlu1 %649  ;;  %v657_v30 = vmul.f32 %v6686_v62, %v6676_v9  ;;  %6503 = vmatprep.subr.bf16.mxu0 %v6853_v20 }
 0x30b   :  { %6691 = vrcp.f32 %v650_v25 }
 0x30c   :  { %5757 = vmatmul.mubr.msk.f32.gmra.mrb[22].mxu0 %vm605_vm5, %v657_v30 }
 0x30d   :  { %v6688_v37 = vpop.eup %6687  ;;  %5759 = vmatprep.mubr.msk.f32.mxu0 %vm6854_vm1, %v6855_v23 }
 0x30e   :  { %v658_v34 = vmul.f32 %v6688_v37, %v6678_v63  ;;  %v354_v63 = vadd.f32 %v7103_v57, %v7029_v24  ;;  %v7241_v24 = vadd.f32 %v7061_v50, %v7158_v44  ;;  %v7257_v57 = vadd.f32 %v7061_v50, %v7162_v46 }
 0x310   :  { %5760 = vmatmul.mubr.msk.f32.gmra.mrb[24].mxu0 %vm605_vm5, %v658_v34  ;;  %v4935_v34 = vld [vmem:[%s8954_s8] ss:$0 sm:$0xff] }
 0x311   :  { %v6690_v43 = vpop.eup %6689  ;;  %6506 = vmatpush3.bf16.xpose.msk.msra.mxu0 %vm7035_vm3, %v6504_v60  ;;  %5762 = vmatprep.mubr.msk.f32.mxu0 %vm6854_vm1, %v6855_v23  ;;  %v483_v60 = vld [vmem:[%s8953_s7] sm:$0xff]  ;;  %65 = vst.msk [vmem:[%s8955_s9] sm:$0xff] %vm64_vm0, %v4935_v34  ;;  %66 = vst.msk [vmem:[%s8955_s9 + $0x8] sm:$0xff] %vm64_vm0, %v4935_v34 }
 0x312   :  { %v659_v47 = vmul.f32 %v6690_v43, %v6680_v0  ;;  %5793 = vmatprep.subr.mxu0 %v6855_v23  ;;  %5769 = vmatpush3.msra.mxu1 %v483_v60  ;;  %67 = vst.msk [vmem:[%s8955_s9 + $0x10] sm:$0xff] %vm64_vm0, %v4935_v34  ;;  %68 = vst.msk [vmem:[%s8955_s9 + $0x18] sm:$0xff] %vm64_vm0, %v4935_v34 }
 0x313   :  { %6507 = vmatprep.subr.bf16.mxu1 %v6853_v20  ;;  %69 = vst.msk [vmem:[%s8955_s9 + $0x20] sm:$0xff] %vm64_vm0, %v4935_v34  ;;  %70 = vst.msk [vmem:[%s8955_s9 + $0x28] sm:$0xff] %vm64_vm0, %v4935_v34 }
 0x314   :  { %5763 = vmatmul.mubr.msk.f32.gmra.mrb[26].mxu0 %vm605_vm5, %v659_v47  ;;  %71 = vst.msk [vmem:[%s8955_s9 + $0x30] sm:$0xff] %vm64_vm0, %v4935_v34  ;;  %72 = vst.msk [vmem:[%s8955_s9 + $0x38] sm:$0xff] %vm64_vm0, %v4935_v34 }
 0x315   :  { %v6692_v48 = vpop.eup %6691  ;;  %5765 = vmatprep.mubr.msk.f32.mxu0 %vm6854_vm1, %v6855_v23  ;;  %73 = vst.msk [vmem:[%s8955_s9 + $0x40] sm:$0xff] %vm64_vm0, %v4935_v34  ;;  %74 = vst.msk [vmem:[%s8955_s9 + $0x48] sm:$0xff] %vm64_vm0, %v4935_v34 }
 0x316   :  { %v660_v9 = vmul.f32 %v6692_v48, %v6682_v1 }
 0x318   :  { %5766 = vmatmul.mubr.msk.f32.gmra.mrb[28].mxu0 %vm605_vm5, %v660_v9 }
 0x319   :  { %5794 = vmatpush3.xpose.msk.msra.mxu0 %vm484_vm2, %v354_v63  ;;  %5795 = vmatprep.mubr.msk.f32.mxu0 %vm6854_vm1, %v6855_v23 }
 0x31a   :  { %5835 = vmatprep.subr.mxu0 %v6855_v23 }
 0x31c   :  { %5796 = vmatmul.mubr.msk.f32.vlgmr.msra.gmra.mrb[30].mxu0 %vm484_vm2, %v7232_v56 }
 0x31d   :  { %5798 = vmatprep.mubr.msk.f32.mxu0 %vm6854_vm1, %v6855_v23  ;;  %5836 = vmatpush3.msra.mxu0 %v483_v60 }
 0x320   :  { %5799 = vmatmul.mubr.msk.f32.gmra.mrb[32].mxu0 %vm484_vm2, %v7241_v24 }
 0x321   :  { %5801 = vmatprep.mubr.msk.f32.mxu0 %vm6854_vm1, %v6855_v23 }
 0x324   :  { %5802 = vmatmul.mubr.msk.f32.gmra.mrb[34].mxu0 %vm484_vm2, %v7249_v42 }
 0x325   :  { %5804 = vmatprep.mubr.msk.f32.mxu0 %vm6854_vm1, %v6855_v23 }
 0x328   :  { %5805 = vmatmul.mubr.msk.f32.gmra.mrb[36].mxu0 %vm484_vm2, %v7257_v57 }
 0x329   :  { %5807 = vmatprep.mubr.msk.f32.mxu0 %vm6854_vm1, %v6855_v23 }
 0x32c   :  { %5808 = vmatmul.mubr.msk.f32.gmra.mrb[38].mxu0 %vm484_vm2, %v7265_v59 }
 0x32d   :  { %5837 = vmatprep.mubr.msk.f32.mxu0 %vm6854_vm1, %v6855_v23 }
 0x3db   :  { %v742_v50 = vpop.f32.mrb[20].mxu0 }
 0x3dc   :  { %v766_v44 = vadd.f32 %v742_v50, %v7064_v51  ;;  %v5755_v45 = vpop.f32.mrb[21].mxu0 }
 0x3de   :  { %v781_v46 = vsel %vm52_vm6, %v766_v44, %v742_v50 }
 0x3df   :  { %v747_v0 = vpop.f32.mrb[22].mxu0  ;;  %5771 = vmatmul.mubr.msk.f32.vlgmr.msra.gmra.mrb[20].mxu1 %vm484_vm2, %v781_v46 }
 0x3e0   :  { %v767_v1 = vadd.f32 %v747_v0, %v7073_v52  ;;  %6509 = vmatpush3.bf16.msra.mxu1 %v6508_v26  ;;  %v5758_v3 = vpop.f32.mrb[23].mxu0  ;;  %5773 = vmatprep.mubr.msk.f32.mxu1 %vm6854_vm1, %v6855_v23 }
 0x3e1   :  { %6510 = vmatprep.subr.bf16.mxu1 %v6853_v20 }
 0x3e3   :  { %v752_v51 = vpop.f32.mrb[24].mxu0  ;;  %5774 = vmatmul.mubr.msk.f32.gmra.mrb[22].mxu1 %vm484_vm2, %v767_v1 }
 0x3e4   :  { %v768_v2 = vadd.f32 %v752_v51, %v7076_v53  ;;  %6512 = vmatpush3.bf16.msra.mxu1 %v6511_v33  ;;  %v5761_v52 = vpop.f32.mrb[25].mxu0  ;;  %5776 = vmatprep.mubr.msk.f32.mxu1 %vm6854_vm1, %v6855_v23 }
 0x3e5   :  { %5818 = vmatprep.subr.mxu1 %v6855_v23 }
 0x3e7   :  { %v757_v38 = vpop.f32.mrb[26].mxu0  ;;  %5777 = vmatmul.mubr.msk.f32.gmra.mrb[24].mxu1 %vm484_vm2, %v768_v2 }
 0x3e8   :  { %v769_v6 = vadd.f32 %v757_v38, %v7087_v54  ;;  %5819 = vmatpush3.msra.mxu1 %v480_v4  ;;  %v5764_v53 = vpop.f32.mrb[27].mxu0  ;;  %5779 = vmatprep.mubr.msk.f32.mxu1 %vm6854_vm1, %v6855_v23 }
 0x3eb   :  { %v762_v8 = vpop.f32.mrb[28].mxu0  ;;  %5780 = vmatmul.mubr.msk.f32.gmra.mrb[26].mxu1 %vm484_vm2, %v769_v6 }
 0x3ec   :  { %v770_v10 = vadd.f32 %v762_v8, %v7090_v55  ;;  %v5767_v11 = vpop.f32.mrb[29].mxu0  ;;  %5782 = vmatprep.mubr.msk.f32.mxu1 %vm6854_vm1, %v6855_v23 }
 0x3ef   :  { %5783 = vmatmul.mubr.msk.f32.gmra.mrb[28].mxu1 %vm484_vm2, %v770_v10  ;;  %v1002_v49 = vpop.f32.mrb[30].mxu0 }
 0x3f0   :  { %v1003_v12 = vadd.f32 %v1002_v49, %v7144_v7  ;;  %v5797_v54 = vpop.f32.mrb[31].mxu0  ;;  %5820 = vmatprep.mubr.msk.f32.mxu1 %vm6854_vm1, %v6855_v23 }
 0x3f1   :  { %v786_v54 = vld [vmem:[%s8955_s9] sm:$0xff] }
 0x3f2   :  { %v1026_v26 = vsel %vm605_vm5, %v1003_v12, -inf }
 0x3f3   :  { %1027 = vmax.xlane.f32.xlu0 %v1026_v26  ;;  %v1007_v27 = vpop.f32.mrb[32].mxu0 }
 0x3f4   :  { %v1008_v28 = vadd.f32 %v1007_v27, %v7144_v7  ;;  %v5800_v55 = vpop.f32.mrb[33].mxu0 }
 0x3f5   :  { %v787_v55 = vld [vmem:[%s8955_s9 + $0x8] sm:$0xff] }
 0x3f6   :  { %v1029_v31 = vsel %vm605_vm5, %v1008_v28, -inf }
 0x3f7   :  { %1030 = vmax.xlane.f32.xlu1 %v1029_v31  ;;  %v1012_v32 = vpop.f32.mrb[34].mxu0 }
 0x3f8   :  { %v1013_v33 = vadd.f32 %v1012_v32, %v7144_v7  ;;  %v5803_v35 = vpop.f32.mrb[35].mxu0 }
 0x3f9   :  { %v788_v35 = vld [vmem:[%s8955_s9 + $0x10] sm:$0xff] }
 0x3fa   :  { %v1032_v36 = vsel %vm605_vm5, %v1013_v33, -inf }
 0x3fb   :  { %1033 = vmax.xlane.f32.xlu0 %v1032_v36  ;;  %v1017_v39 = vpop.f32.mrb[36].mxu0 }
 0x3fc   :  { %v1018_v40 = vadd.f32 %v1017_v39, %v7144_v7  ;;  %v5806_v58 = vpop.f32.mrb[37].mxu0 }
 0x3fd   :  { %v789_v58 = vld [vmem:[%s8955_s9 + $0x18] sm:$0xff] }
 0x3fe   :  { %v1035_v61 = vsel %vm605_vm5, %v1018_v40, -inf }
 0x3ff   :  { %1036 = vmax.xlane.f32.xlu1 %v1035_v61  ;;  %v1022_v62 = vpop.f32.mrb[38].mxu0 }
 0x400   :  { %v1023_v25 = vadd.f32 %v1022_v62, %v7144_v7  ;;  %v5809_v30 = vpop.f32.mrb[39].mxu0 }
 0x401   :  { %v790_v30 = vld [vmem:[%s8955_s9 + $0x20] sm:$0xff] }
 0x402   :  { %v1038_v37 = vsel %vm605_vm5, %v1023_v25, -inf }
 0x403   :  { %1039 = vmax.xlane.f32.xlu0 %v1038_v37 }
 0x480   :  { %v1028_v43 = vpop.xlane.xlu0 %1027 }
 0x481   :  { %v1041_v47 = vsub.f32 %v1003_v12, %v1028_v43 }
 0x483   :  { %v1046_v48 = vmul.f32 1.442695, %v1041_v47 }
 0x484   :  { %v1031_v9 = vpop.xlane.xlu1 %1030 }
 0x485   :  { %6693 = vpow2.f32 %v1046_v48  ;;  %v1042_v63 = vsub.f32 %v1008_v28, %v1031_v9 }
 0x487   :  { %v1048_v60 = vmul.f32 1.442695, %v1042_v63 }
 0x488   :  { %v1034_v50 = vpop.xlane.xlu0 %1033 }
 0x489   :  { %6695 = vpow2.f32 %v1048_v60  ;;  %v1043_v44 = vsub.f32 %v1013_v33, %v1034_v50 }
 0x48b   :  { %v1050_v45 = vmul.f32 1.442695, %v1043_v44 }
 0x48c   :  { %v1037_v46 = vpop.xlane.xlu1 %1036 }
 0x48d   :  { %6697 = vpow2.f32 %v1050_v45  ;;  %v1044_v0 = vsub.f32 %v1018_v40, %v1037_v46 }
 0x48f   :  { %v6694_v1 = vpop.eup %6693  ;;  %v1052_v3 = vmul.f32 1.442695, %v1044_v0 }
 0x490   :  { %v1040_v51 = vpop.xlane.xlu0 %1039  ;;  %v1056_v2 = vsel %vm605_vm5, %v6694_v1, 0.0 }
 0x491   :  { %6699 = vpow2.f32 %v1052_v3  ;;  %v1045_v52 = vsub.f32 %v1023_v25, %v1040_v51  ;;  %1057 = vadd.xlane.f32.xlu1 %v1056_v2 }
 0x493   :  { %v6696_v4 = vpop.eup %6695  ;;  %v1054_v38 = vmul.f32 1.442695, %v1045_v52 }
 0x494   :  { %v1059_v6 = vsel %vm605_vm5, %v6696_v4, 0.0 }
 0x495   :  { %6701 = vpow2.f32 %v1054_v38  ;;  %1060 = vadd.xlane.f32.xlu0 %v1059_v6  ;;  %v5026_v38 = vld [vmem:[%s8946_s3 + $0x28] sm:$0xff] }
 0x497   :  { %v6698_v53 = vpop.eup %6697 }
 0x498   :  { %v1062_v8 = vsel %vm605_vm5, %v6698_v53, 0.0 }
 0x499   :  { %1063 = vadd.xlane.f32.xlu1 %v1062_v8  ;;  %v5010_v8 = vld [vmem:[%s8948_s1 + $0x28] sm:$0xff] }
 0x49b   :  { %v6700_v10 = vpop.eup %6699 }
 0x49c   :  { %v1065_v11 = vsel %vm605_vm5, %v6700_v10, 0.0 }
 0x49d   :  { %1066 = vadd.xlane.f32.xlu0 %v1065_v11  ;;  %v5011_v11 = vld [vmem:[%s8948_s1 + $0x30] sm:$0xff] }
 0x49f   :  { %v6702_v49 = vpop.eup %6701 }
 0x4a0   :  { %v1068_v12 = vsel %vm605_vm5, %v6702_v49, 0.0 }
 0x4a1   :  { %1069 = vadd.xlane.f32.xlu1 %v1068_v12 }
 0x4b2   :  { %v872_v26 = vpop.f32.mrb[20].mxu1 }
 0x4b3   :  { %v896_v27 = vadd.f32 %v872_v26, %v786_v54  ;;  %v5772_v28 = vpop.f32.mrb[21].mxu1  ;;  %v5027_v54 = vld [vmem:[%s8946_s3 + $0x30] sm:$0xff]  ;;  %v5028_v26 = vld [vmem:[%s8946_s3 + $0x38] sm:$0xff] }
 0x4b5   :  { %901 = vst.msk [vmem:[%s8955_s9] sm:$0xff] %vm64_vm0, %v896_v27 }
 0x4b6   :  { %v877_v31 = vpop.f32.mrb[22].mxu1 }
 0x4b7   :  { %v897_v32 = vadd.f32 %v877_v31, %v787_v55  ;;  %v5775_v33 = vpop.f32.mrb[23].mxu1  ;;  %v6525_v31 = vpack.c.bf16 %v5028_v26, %v5027_v54 }
 0x4b9   :  { %902 = vst.msk [vmem:[%s8955_s9 + $0x8] sm:$0xff] %vm64_vm0, %v897_v32 }
 0x4ba   :  { %v882_v36 = vpop.f32.mrb[24].mxu1 }
 0x4bb   :  { %v898_v39 = vadd.f32 %v882_v36, %v788_v35  ;;  %v5778_v40 = vpop.f32.mrb[25].mxu1 }
 0x4bd   :  { %903 = vst.msk [vmem:[%s8955_s9 + $0x10] sm:$0xff] %vm64_vm0, %v898_v39 }
 0x4be   :  { %v887_v61 = vpop.f32.mrb[26].mxu1 }
 0x4bf   :  { %v899_v62 = vadd.f32 %v887_v61, %v789_v58  ;;  %v5781_v25 = vpop.f32.mrb[27].mxu1 }
 0x4c1   :  { %904 = vst.msk [vmem:[%s8955_s9 + $0x18] sm:$0xff] %vm64_vm0, %v899_v62 }
 0x4c2   :  { %v892_v37 = vpop.f32.mrb[28].mxu1 }
 0x4c3   :  { %v900_v34 = vadd.f32 %v892_v37, %v790_v30  ;;  %v5784_v43 = vpop.f32.mrb[29].mxu1 }
 0x4c5   :  { %905 = vst.msk [vmem:[%s8955_s9 + $0x20] sm:$0xff] %vm64_vm0, %v900_v34  ;;  %v1198_v34 = vld [vmem:[%s8955_s9 + $0x38] sm:$0xff] }
 0x51e   :  { %v1058_v47 = vpop.xlane.xlu1 %1057 }
 0x51f   :  { %6703 = vrcp.f32 %v1058_v47 }
 0x522   :  { %v1061_v48 = vpop.xlane.xlu0 %1060 }
 0x523   :  { %6705 = vrcp.f32 %v1061_v48 }
 0x526   :  { %v1064_v9 = vpop.xlane.xlu1 %1063 }
 0x527   :  { %6707 = vrcp.f32 %v1064_v9  ;;  %v1199_v9 = vld [vmem:[%s8955_s9 + $0x40] sm:$0xff] }
 0x529   :  { %v6704_v63 = vpop.eup %6703 }
 0x52a   :  { %v1076_v60 = vmul.f32 %v6704_v63, %v6694_v1  ;;  %v1067_v50 = vpop.xlane.xlu0 %1066 }
 0x52b   :  { %6709 = vrcp.f32 %v1067_v50 }
 0x52c   :  { %5821 = vmatmul.mubr.msk.f32.vlgmr.msra.gmra.mrb[30].mxu1 %vm605_vm5, %v1076_v60 }
 0x52d   :  { %v6706_v44 = vpop.eup %6705  ;;  %5823 = vmatprep.mubr.msk.f32.mxu1 %vm6854_vm1, %v6855_v23 }
 0x52e   :  { %v1070_v45 = vpop.xlane.xlu1 %1069  ;;  %v1077_v46 = vmul.f32 %v6706_v44, %v6696_v4  ;;  %v5025_v4 = vld [vmem:[%s8946_s3 + $0x20] sm:$0xff]  ;;  %v1200_v44 = vld [vmem:[%s8955_s9 + $0x48] sm:$0xff] }
 0x52f   :  { %6711 = vrcp.f32 %v1070_v45  ;;  %v6521_v6 = vpack.c.bf16 %v5026_v38, %v5025_v4 }
 0x530   :  { %5824 = vmatmul.mubr.msk.f32.gmra.mrb[32].mxu1 %vm605_vm5, %v1077_v46 }
 0x531   :  { %v6708_v0 = vpop.eup %6707  ;;  %5826 = vmatprep.mubr.msk.f32.mxu1 %vm6854_vm1, %v6855_v23  ;;  %6522 = vmatprep.subr.bf16.mxu0 %v6521_v6 }
 0x532   :  { %v1078_v3 = vmul.f32 %v6708_v0, %v6698_v53  ;;  %v5009_v53 = vld [vmem:[%s8948_s1 + $0x20] sm:$0xff] }
 0x534   :  { %5827 = vmatmul.mubr.msk.f32.gmra.mrb[34].mxu1 %vm605_vm5, %v1078_v3  ;;  %v5030_v3 = vld [vmem:[%s8949_s4 + $0x1] ss:$0 sm:$0xff] }
 0x535   :  { %v6710_v1 = vpop.eup %6709  ;;  %5829 = vmatprep.mubr.msk.f32.mxu1 %vm6854_vm1, %v6855_v23 }
 0x536   :  { %v1079_v51 = vmul.f32 %v6710_v1, %v6700_v10  ;;  %v6513_v10 = vpack.c.bf16 %v5010_v8, %v5009_v53 }
 0x538   :  { %5830 = vmatmul.mubr.msk.f32.gmra.mrb[36].mxu1 %vm605_vm5, %v1079_v51  ;;  %6514 = vmatprep.subr.bf16.mxu1 %v6513_v10 }
 0x539   :  { %v6712_v2 = vpop.eup %6711  ;;  %5832 = vmatprep.mubr.msk.f32.mxu1 %vm6854_vm1, %v6855_v23  ;;  %6516 = vmatpush3.bf16.msra.mxu1 %v6513_v10 }
 0x53a   :  { %v1080_v52 = vmul.f32 %v6712_v2, %v6702_v49  ;;  %v5012_v49 = vld [vmem:[%s8948_s1 + $0x38] sm:$0xff] }
 0x53b   :  { %v6517_v12 = vpack.c.bf16 %v5012_v49, %v5011_v11 }
 0x53c   :  { %5833 = vmatmul.mubr.msk.f32.gmra.mrb[38].mxu1 %vm605_vm5, %v1080_v52 }
 0x53d   :  { %5860 = vmatprep.mubr.msk.f32.mxu1 %vm64_vm0, %v6922_v5  ;;  %6518 = vmatprep.subr.bf16.mxu1 %v6517_v12 }
 0x53e   :  { %6520 = vmatpush3.bf16.msra.mxu1 %v6517_v12 }
 0x541   :  { %5861 = vmatmul.mubr.msk.f32.vlgmr.msra.gmra.mrb[40].mxu1 %vm64_vm0, %v6943_v13 }
 0x542   :  { %5863 = vmatprep.mubr.msk.f32.mxu1 %vm64_vm0, %v6948_v14 }
 0x545   :  { %5864 = vmatmul.mubr.msk.f32.gmra.mrb[42].mxu1 %vm64_vm0, %v6957_v15 }
 0x546   :  { %5866 = vmatprep.mubr.msk.f32.mxu1 %vm64_vm0, %v6962_v16 }
 0x549   :  { %5867 = vmatmul.mubr.msk.f32.gmra.mrb[44].mxu1 %vm64_vm0, %v6975_v17 }
 0x54a   :  { %5869 = vmatprep.mubr.msk.f32.mxu1 %vm64_vm0, %v6980_v18 }
 0x54d   :  { %5870 = vmatmul.mubr.msk.f32.gmra.mrb[46].mxu1 %vm64_vm0, %v6993_v19 }
 0x54e   :  { %5872 = vmatprep.mubr.msk.f32.mxu1 %vm64_vm0, %v7007_v21 }
 0x551   :  { %5873 = vmatmul.mubr.msk.f32.gmra.mrb[48].mxu1 %vm64_vm0, %v7012_v22 }
 0x552   :  { %5906 = vmatprep.mubr.msk.f32.mxu1 %vm64_vm0, %v6922_v5 }
 0x5ff   :  { %v1162_v27 = vpop.f32.mrb[30].mxu1 }
 0x600   :  { %v1186_v28 = vadd.f32 %v1162_v27, %v7232_v56  ;;  %v5822_v55 = vpop.f32.mrb[31].mxu1 }
 0x602   :  { %v1191_v32 = vsel %vm52_vm6, %v1186_v28, %v1162_v27 }
 0x603   :  { %v1167_v33 = vpop.f32.mrb[32].mxu1  ;;  %5838 = vmatmul.mubr.msk.f32.vlgmr.msra.gmra.mrb[40].mxu0 %vm484_vm2, %v1191_v32 }
 0x604   :  { %v1187_v35 = vadd.f32 %v1167_v33, %v7241_v24  ;;  %v5825_v36 = vpop.f32.mrb[33].mxu1  ;;  %5840 = vmatprep.mubr.msk.f32.mxu0 %vm6854_vm1, %v6855_v23  ;;  %6524 = vmatpush3.bf16.msra.mxu0 %v6521_v6 }
 0x605   :  { %6526 = vmatprep.subr.bf16.mxu0 %v6525_v31  ;;  %v7573_v36 = vld [vmem:[%s8950_s2 + $0x1] ss:$0 sm:$0xff] }
 0x607   :  { %v1172_v39 = vpop.f32.mrb[34].mxu1  ;;  %5841 = vmatmul.mubr.msk.f32.gmra.mrb[42].mxu0 %vm484_vm2, %v1187_v35 }
 0x608   :  { %v1188_v56 = vadd.f32 %v1172_v39, %v7249_v42  ;;  %v5828_v40 = vpop.f32.mrb[35].mxu1  ;;  %5843 = vmatprep.mubr.msk.f32.mxu0 %vm6854_vm1, %v6855_v23  ;;  %6528 = vmatpush3.bf16.msra.mxu0 %v6525_v31 }
 0x609   :  { %6537 = vmatprep.subr.bf16.mxu0 %v6853_v20 }
 0x60b   :  { %v1177_v58 = vpop.f32.mrb[36].mxu1  ;;  %5844 = vmatmul.mubr.msk.f32.gmra.mrb[44].mxu0 %vm484_vm2, %v1188_v56 }
 0x60c   :  { %v1189_v24 = vadd.f32 %v1177_v58, %v7257_v57  ;;  %v5831_v61 = vpop.f32.mrb[37].mxu1  ;;  %5846 = vmatprep.mubr.msk.f32.mxu0 %vm6854_vm1, %v6855_v23  ;;  %v1197_v57 = vld [vmem:[%s8955_s9 + $0x30] sm:$0xff] }
 0x60f   :  { %v1182_v62 = vpop.f32.mrb[38].mxu1  ;;  %5847 = vmatmul.mubr.msk.f32.gmra.mrb[46].mxu0 %vm484_vm2, %v1189_v24 }
 0x610   :  { %v1190_v42 = vadd.f32 %v1182_v62, %v7265_v59  ;;  %v5834_v25 = vpop.f32.mrb[39].mxu1  ;;  %5849 = vmatprep.mubr.msk.f32.mxu0 %vm6854_vm1, %v6855_v23 }
 0x611   :  { %v5042_v25 = vld [vmem:[%s8951_s5 + $0x28] sm:$0xff] }
 0x613   :  { %5850 = vmatmul.mubr.msk.f32.gmra.mrb[48].mxu0 %vm484_vm2, %v1190_v42  ;;  %v5041_v42 = vld [vmem:[%s8951_s5 + $0x20] sm:$0xff] }
 0x614   :  { %5883 = vmatprep.mubr.msk.f32.mxu0 %vm64_vm0, %v6922_v5  ;;  %v7506_v5 = vpop.f32.mrb[40].mxu1 }
 0x615   :  { %v7590_v58 = vadd.f32 %v7506_v5, %v7573_v36  ;;  %v5043_v5 = vld [vmem:[%s8951_s5 + $0x30] sm:$0xff] }
 0x617   :  { %5884 = vmatmul.mubr.msk.f32.vlgmr.msra.gmra.mrb[50].mxu0 %vm64_vm0, %v6943_v13  ;;  %v1395_v13 = vpop.f32.mrb[41].mxu1 }
 0x618   :  { %5886 = vmatprep.mubr.msk.f32.mxu0 %vm64_vm0, %v6948_v14  ;;  %v7508_v14 = vpop.f32.mrb[42].mxu1  ;;  %v7580_v40 = vadd.f32 %v7573_v36, %v1395_v13  ;;  %v6529_v13 = vpack.c.bf16 %v5042_v25, %v5041_v42 }
 0x619   :  { %v7606_v61 = vadd.f32 %v7508_v14, %v7573_v36  ;;  %v5044_v14 = vld [vmem:[%s8951_s5 + $0x38] sm:$0xff] }
 0x61a   :  { %6530 = vmatprep.subr.bf16.mxu1 %v6529_v13 }
 0x61b   :  { %5887 = vmatmul.mubr.msk.f32.gmra.mrb[52].mxu0 %vm64_vm0, %v6957_v15  ;;  %v7510_v15 = vpop.f32.mrb[43].mxu1  ;;  %6532 = vmatpush3.bf16.msra.mxu1 %v6529_v13 }
 0x61c   :  { %5889 = vmatprep.mubr.msk.f32.mxu0 %vm64_vm0, %v6962_v16  ;;  %v7512_v16 = vpop.f32.mrb[44].mxu1  ;;  %v7594_v24 = vadd.f32 %v7573_v36, %v7510_v15  ;;  %v6533_v15 = vpack.c.bf16 %v5044_v14, %v5043_v5 }
 0x61e   :  { %6534 = vmatprep.subr.bf16.mxu1 %v6533_v15 }
 0x61f   :  { %5890 = vmatmul.mubr.msk.f32.gmra.mrb[54].mxu0 %vm64_vm0, %v6975_v17  ;;  %v7514_v17 = vpop.f32.mrb[45].mxu1  ;;  %6536 = vmatpush3.bf16.msra.mxu1 %v6533_v15 }
 0x620   :  { %5892 = vmatprep.mubr.msk.f32.mxu0 %vm64_vm0, %v6980_v18  ;;  %v1196_v18 = vld [vmem:[%s8955_s9 + $0x28] sm:$0xff]  ;;  %v7610_v62 = vadd.f32 %v7573_v36, %v7514_v17  ;;  %6545 = vmatprep.subr.bf16.mxu1 %v6853_v20 }
 0x621   :  { %v7636_v17 = vld [vmem:[%s8947_s0 + $0x8] sm:$0xff] }
 0x622   :  { %5907 = vmatmul.mubr.msk.f32.vlgmr.msra.gmra.mrb[50].mxu1 %vm64_vm0, %v7636_v17 }
 0x623   :  { %5893 = vmatmul.mubr.msk.f32.gmra.mrb[56].mxu0 %vm64_vm0, %v6993_v19 }
 0x624   :  { %5895 = vmatprep.mubr.msk.f32.mxu0 %vm64_vm0, %v7007_v21 }
 0x627   :  { %5896 = vmatmul.mubr.msk.f32.gmra.mrb[58].mxu0 %vm64_vm0, %v7012_v22 }
 0x628   :  { %5931 = vmatprep.mubr.msk.f32.mxu0 %vm6854_vm1, %v6855_v23 }
 0x6d6   :  { %v1282_v19 = vpop.f32.mrb[40].mxu0 }
 0x6d7   :  { %v1306_v21 = vadd.f32 %v1282_v19, %v1196_v18  ;;  %v5839_v22 = vpop.f32.mrb[41].mxu0  ;;  %v7643_v18 = vld [vmem:[%s8947_s0 + $0x10] sm:$0xff]  ;;  %v7650_v19 = vld [vmem:[%s8947_s0 + $0x18] sm:$0xff] }
 0x6d8   :  { %5909 = vmatprep.mubr.msk.f32.mxu1 %vm64_vm0, %v7643_v18  ;;  %v7664_v22 = vld [vmem:[%s8947_s0 + $0x28] sm:$0xff] }
 0x6d9   :  { %1311 = vst.msk [vmem:[%s8955_s9 + $0x28] sm:$0xff] %vm64_vm0, %v1306_v21  ;;  %5910 = vmatmul.mubr.msk.f32.gmra.mrb[52].mxu1 %vm64_vm0, %v7650_v19  ;;  %v7657_v21 = vld [vmem:[%s8947_s0 + $0x20] sm:$0xff] }
 0x6da   :  { %v1287_v59 = vpop.f32.mrb[42].mxu0  ;;  %5912 = vmatprep.mubr.msk.f32.mxu1 %vm64_vm0, %v7657_v21 }
 0x6db   :  { %v1307_v30 = vadd.f32 %v1287_v59, %v1197_v57  ;;  %v5842_v37 = vpop.f32.mrb[43].mxu0  ;;  %v7671_v57 = vld [vmem:[%s8947_s0 + $0x30] sm:$0xff]  ;;  %v7678_v59 = vld [vmem:[%s8947_s0 + $0x38] sm:$0xff] }
 0x6dc   :  { %v7692_v37 = vld [vmem:[%s8947_s0 + $0x48] sm:$0xff] }
 0x6dd   :  { %1312 = vst.msk [vmem:[%s8955_s9 + $0x30] sm:$0xff] %vm64_vm0, %v1307_v30  ;;  %5913 = vmatmul.mubr.msk.f32.gmra.mrb[54].mxu1 %vm64_vm0, %v7664_v22  ;;  %v7685_v30 = vld [vmem:[%s8947_s0 + $0x40] sm:$0xff] }
 0x6de   :  { %v1292_v43 = vpop.f32.mrb[44].mxu0  ;;  %5915 = vmatprep.mubr.msk.f32.mxu1 %vm64_vm0, %v7671_v57 }
 0x6df   :  { %v1308_v47 = vadd.f32 %v1292_v43, %v1198_v34  ;;  %v5845_v48 = vpop.f32.mrb[45].mxu0 }
 0x6e1   :  { %1313 = vst.msk [vmem:[%s8955_s9 + $0x38] sm:$0xff] %vm64_vm0, %v1308_v47  ;;  %5916 = vmatmul.mubr.msk.f32.gmra.mrb[56].mxu1 %vm64_vm0, %v7678_v59 }
 0x6e2   :  { %v1297_v63 = vpop.f32.mrb[46].mxu0  ;;  %5918 = vmatprep.mubr.msk.f32.mxu1 %vm64_vm0, %v7685_v30 }
 0x6e3   :  { %v1309_v60 = vadd.f32 %v1297_v63, %v1199_v9  ;;  %v5848_v50 = vpop.f32.mrb[47].mxu0 }
 0x6e5   :  { %1314 = vst.msk [vmem:[%s8955_s9 + $0x40] sm:$0xff] %vm64_vm0, %v1309_v60  ;;  %5919 = vmatmul.mubr.msk.f32.gmra.mrb[58].mxu1 %vm64_vm0, %v7692_v37 }
 0x6e6   :  { %v1302_v45 = vpop.f32.mrb[48].mxu0  ;;  %5956 = vmatprep.mubr.msk.f32.mxu1 %vm6854_vm1, %v6855_v23 }
 0x6e7   :  { %v1310_v46 = vadd.f32 %v1302_v45, %v1200_v44  ;;  %v5851_v0 = vpop.f32.mrb[49].mxu0 }
 0x6e9   :  { %1315 = vst.msk [vmem:[%s8955_s9 + $0x48] sm:$0xff] %vm64_vm0, %v1310_v46 }
 0x6ea   :  { %v5885_v1 = vpop.f32.mrb[50].mxu0 }
 0x6eb   :  { %v1529_v51 = vadd.f32 %v5885_v1, %v5030_v3  ;;  %v1523_v2 = vpop.f32.mrb[51].mxu0 }
 0x6ec   :  { %v1524_v52 = vadd.f32 %v5030_v3, %v1523_v2 }
 0x6ee   :  { %v6538_v4 = vpack.c.bf16 %v1529_v51, %v1524_v52  ;;  %v5888_v38 = vpop.f32.mrb[52].mxu0 }
 0x6ef   :  { %v1539_v6 = vadd.f32 %v5888_v38, %v5030_v3  ;;  %v1533_v53 = vpop.f32.mrb[53].mxu0 }
 0x6f0   :  { %6540 = vmatpush3.bf16.xpose.msk.msra.mxu0 %vm7035_vm3, %v6538_v4  ;;  %v1534_v8 = vadd.f32 %v5030_v3, %v1533_v53  ;;  %v7708_v53 = vpop.f32.mrb[46].mxu1 }
 0x6f1   :  { %6541 = vmatprep.subr.bf16.mxu0 %v6853_v20 }
 0x6f2   :  { %v6542_v10 = vpack.c.bf16 %v1539_v6, %v1534_v8  ;;  %v5891_v11 = vpop.f32.mrb[54].mxu0  ;;  %v7710_v8 = vpop.f32.mrb[47].mxu1 }
 0x6f3   :  { %v7557_v49 = vadd.f32 %v5891_v11, %v5030_v3  ;;  %v1543_v12 = vpop.f32.mrb[55].mxu0 }
 0x6f4   :  { %v1544_v35 = vadd.f32 %v5030_v3, %v1543_v12  ;;  %v7719_v12 = vld [vmem:[%s8952_s6 + $0x1] ss:$0 sm:$0xff] }
 0x6f6   :  { %v5894_v54 = vpop.f32.mrb[56].mxu0 }
 0x6f7   :  { %v7559_v26 = vadd.f32 %v5894_v54, %v5030_v3  ;;  %v1553_v27 = vpop.f32.mrb[57].mxu0 }
 0x6f8   :  { %6544 = vmatpush3.bf16.xpose.msk.msra.mxu0 %vm7035_vm3, %v6542_v10  ;;  %v7563_v28 = vadd.f32 %v5030_v3, %v1553_v27  ;;  %v7712_v10 = vpop.f32.mrb[48].mxu1 }
 0x6f9   :  { %5929 = vmatprep.subr.mxu0 %v6855_v23  ;;  %v7714_v11 = vpop.f32.mrb[49].mxu1 }
 0x6fa   :  { %v6552_v55 = vpack.c.bf16 %v7563_v28, %v7557_v49  ;;  %v5897_v31 = vpop.f32.mrb[58].mxu0  ;;  %v5908_v54 = vpop.f32.mrb[50].mxu1 }
 0x6fb   :  { %v7568_v32 = vadd.f32 %v5897_v31, %v5030_v3  ;;  %v1563_v33 = vpop.f32.mrb[59].mxu0  ;;  %v1657_v27 = vadd.f32 %v5908_v54, %v7719_v12  ;;  %v1651_v31 = vpop.f32.mrb[51].mxu1 }
 0x6fc   :  { %v7575_v39 = vadd.f32 %v5030_v3, %v1563_v33  ;;  %v1652_v33 = vadd.f32 %v7719_v12, %v1651_v31 }
 0x6fe   :  { %v6556_v56 = vpack.c.bf16 %v7575_v39, %v7559_v26  ;;  %v7783_v26 = vadd.f32 %v7512_v16, %v7573_v36  ;;  %v7792_v39 = vadd.f32 %v7573_v36, %v7710_v8  ;;  %v7800_v16 = vadd.f32 %v7708_v53, %v7573_v36  ;;  %v1700_v53 = vld [vmem:[%s8953_s7 + $0x8] sm:$0xff] }
 0x700   :  { %5930 = vmatpush3.xpose.msk.msra.mxu0 %vm484_vm2, %v1544_v35  ;;  %v6546_v35 = vpack.c.bf16 %v1657_v27, %v1652_v33 }
 0x701   :  { %5971 = vmatprep.subr.mxu0 %v6855_v23 }
 0x702   :  { %6547 = vmatpush3.bf16.msra.mxu1 %v6546_v35 }
 0x703   :  { %5932 = vmatmul.mubr.msk.f32.vlgmr.msra.gmra.mrb[60].mxu0 %vm484_vm2, %v7580_v40  ;;  %6548 = vmatprep.subr.bf16.mxu1 %v6853_v20 }
 0x704   :  { %5934 = vmatprep.mubr.msk.f32.mxu0 %vm6854_vm1, %v6855_v23  ;;  %5972 = vmatpush3.msra.mxu0 %v1700_v53 }
 0x705   :  { %6559 = vmatprep.subr.bf16.mxu0 %v6853_v20 }
 0x707   :  { %5935 = vmatmul.mubr.msk.f32.gmra.mrb[62].mxu0 %vm484_vm2, %v7590_v58 }
 0x708   :  { %5937 = vmatprep.mubr.msk.f32.mxu0 %vm6854_vm1, %v6855_v23 }
 0x70b   :  { %5938 = vmatmul.mubr.msk.f32.gmra.mrb[64].mxu0 %vm484_vm2, %v7594_v24 }
 0x70c   :  { %5940 = vmatprep.mubr.msk.f32.mxu0 %vm6854_vm1, %v6855_v23 }
 0x70f   :  { %5941 = vmatmul.mubr.msk.f32.gmra.mrb[66].mxu0 %vm484_vm2, %v7606_v61 }
 0x710   :  { %5943 = vmatprep.mubr.msk.f32.mxu0 %vm6854_vm1, %v6855_v23 }
 0x713   :  { %5944 = vmatmul.mubr.msk.f32.gmra.mrb[68].mxu0 %vm484_vm2, %v7610_v62 }
 0x714   :  { %5973 = vmatprep.mubr.msk.f32.mxu0 %vm6854_vm1, %v6855_v23 }
 0x7ac   :  { %v5911_v42 = vpop.f32.mrb[52].mxu1 }
 0x7ad   :  { %v1667_v25 = vadd.f32 %v5911_v42, %v7719_v12  ;;  %v1661_v5 = vpop.f32.mrb[53].mxu1 }
 0x7ae   :  { %v1662_v13 = vadd.f32 %v7719_v12, %v1661_v5 }
 0x7b0   :  { %v6549_v14 = vpack.c.bf16 %v1667_v25, %v1662_v13  ;;  %v5914_v42 = vpop.f32.mrb[54].mxu1 }
 0x7b1   :  { %v7733_v13 = vadd.f32 %v5914_v42, %v7719_v12 }
 0x7b2   :  { %6550 = vmatpush3.bf16.msra.mxu1 %v6549_v14 }
 0x7b3   :  { %5954 = vmatprep.subr.mxu1 %v6855_v23 }
 0x7d6   :  { %v1797_v34 = vpop.f32.mrb[60].mxu0 }
 0x7d7   :  { %v1798_v43 = vadd.f32 %v1797_v34, %v7144_v7  ;;  %v5933_v47 = vpop.f32.mrb[61].mxu0 }
 0x7d9   :  { %v1821_v48 = vsel %vm605_vm5, %v1798_v43, -inf }
 0x7da   :  { %1822 = vmax.xlane.f32.xlu0 %v1821_v48  ;;  %v1802_v9 = vpop.f32.mrb[62].mxu0 }
 0x7db   :  { %v1803_v63 = vadd.f32 %v1802_v9, %v7144_v7  ;;  %v5936_v60 = vpop.f32.mrb[63].mxu0 }
 0x7dd   :  { %v1824_v50 = vsel %vm605_vm5, %v1803_v63, -inf }
 0x7de   :  { %1825 = vmax.xlane.f32.xlu1 %v1824_v50  ;;  %v1807_v44 = vpop.f32.mrb[64].mxu0 }
 0x7df   :  { %v1808_v45 = vadd.f32 %v1807_v44, %v7144_v7  ;;  %v5939_v46 = vpop.f32.mrb[65].mxu0 }
 0x7e1   :  { %v1827_v0 = vsel %vm605_vm5, %v1808_v45, -inf }
 0x7e2   :  { %1828 = vmax.xlane.f32.xlu0 %v1827_v0  ;;  %v1812_v3 = vpop.f32.mrb[66].mxu0 }
 0x7e3   :  { %v1813_v1 = vadd.f32 %v1812_v3, %v7144_v7  ;;  %v5942_v51 = vpop.f32.mrb[67].mxu0 }
 0x7e5   :  { %v1830_v2 = vsel %vm605_vm5, %v1813_v1, -inf }
 0x7e6   :  { %1831 = vmax.xlane.f32.xlu1 %v1830_v2  ;;  %v1817_v52 = vpop.f32.mrb[68].mxu0 }
 0x7e7   :  { %v1818_v4 = vadd.f32 %v1817_v52, %v7144_v7  ;;  %v5945_v38 = vpop.f32.mrb[69].mxu0 }
 0x7e9   :  { %v1833_v6 = vsel %vm605_vm5, %v1818_v4, -inf }
 0x7ea   :  { %1834 = vmax.xlane.f32.xlu0 %v1833_v6 }
 0x867   :  { %v1823_v15 = vpop.xlane.xlu0 %1822 }
 0x868   :  { %v1836_v34 = vsub.f32 %v1798_v43, %v1823_v15 }
 0x86a   :  { %v1841_v47 = vmul.f32 1.442695, %v1836_v34 }
 0x86b   :  { %v1826_v48 = vpop.xlane.xlu1 %1825 }
 0x86c   :  { %6713 = vpow2.f32 %v1841_v47  ;;  %v1837_v9 = vsub.f32 %v1803_v63, %v1826_v48 }
 0x86e   :  { %v1843_v60 = vmul.f32 1.442695, %v1837_v9 }
 0x86f   :  { %v1829_v50 = vpop.xlane.xlu0 %1828 }
 0x870   :  { %6715 = vpow2.f32 %v1843_v60  ;;  %v1838_v44 = vsub.f32 %v1808_v45, %v1829_v50 }
 0x872   :  { %v1845_v46 = vmul.f32 1.442695, %v1838_v44 }
 0x873   :  { %v1832_v0 = vpop.xlane.xlu1 %1831 }
 0x874   :  { %6717 = vpow2.f32 %v1845_v46  ;;  %v1839_v3 = vsub.f32 %v1813_v1, %v1832_v0 }
 0x876   :  { %v6714_v51 = vpop.eup %6713  ;;  %v1847_v2 = vmul.f32 1.442695, %v1839_v3 }
 0x877   :  { %v1835_v52 = vpop.xlane.xlu0 %1834  ;;  %v1851_v38 = vsel %vm605_vm5, %v6714_v51, 0.0 }
 0x878   :  { %6719 = vpow2.f32 %v1847_v2  ;;  %v1840_v6 = vsub.f32 %v1818_v4, %v1835_v52  ;;  %1852 = vadd.xlane.f32.xlu1 %v1851_v38  ;;  %v1671_v4 = vpop.f32.mrb[55].mxu1 }
 0x879   :  { %v5917_v25 = vpop.f32.mrb[56].mxu1  ;;  %v1672_v14 = vadd.f32 %v7719_v12, %v1671_v4 }
 0x87a   :  { %v6716_v43 = vpop.eup %6715  ;;  %v1849_v54 = vmul.f32 1.442695, %v1840_v6  ;;  %v1681_v5 = vpop.f32.mrb[57].mxu1  ;;  %v7743_v47 = vadd.f32 %v5917_v25, %v7719_v12 }
 0x87b   :  { %v1854_v63 = vsel %vm605_vm5, %v6716_v43, 0.0  ;;  %v7737_v15 = vadd.f32 %v7719_v12, %v1681_v5  ;;  %5955 = vmatpush3.msra.mxu1 %v1672_v14  ;;  %v7745_v48 = vpop.f32.mrb[58].mxu1 }
 0x87c   :  { %6721 = vpow2.f32 %v1849_v54  ;;  %1855 = vadd.xlane.f32.xlu0 %v1854_v63  ;;  %6551 = vmatprep.subr.bf16.mxu1 %v6853_v20  ;;  %v1691_v9 = vpop.f32.mrb[59].mxu1 }
 0x87d   :  { %v6560_v34 = vpack.c.bf16 %v7737_v15, %v7733_v13  ;;  %v7748_v60 = vadd.f32 %v7719_v12, %v1691_v9 }
 0x87e   :  { %v6718_v27 = vpop.eup %6717 }
 0x87f   :  { %v1857_v45 = vsel %vm605_vm5, %v6718_v27, 0.0  ;;  %v6563_v50 = vpack.c.bf16 %v7748_v60, %v7743_v47 }
 0x880   :  { %1858 = vadd.xlane.f32.xlu1 %v1857_v45 }
 0x882   :  { %v6720_v31 = vpop.eup %6719 }
 0x883   :  { %v1860_v1 = vsel %vm605_vm5, %v6720_v31, 0.0 }
 0x884   :  { %1861 = vadd.xlane.f32.xlu0 %v1860_v1 }
 0x886   :  { %v6722_v33 = vpop.eup %6721 }
 0x887   :  { %v1863_v35 = vsel %vm605_vm5, %v6722_v33, 0.0 }
 0x888   :  { %1864 = vadd.xlane.f32.xlu1 %v1863_v35 }
 0x905   :  { %v1853_v44 = vpop.xlane.xlu1 %1852 }
 0x906   :  { %6723 = vrcp.f32 %v1853_v44 }
 0x909   :  { %v1856_v46 = vpop.xlane.xlu0 %1855 }
 0x90a   :  { %6725 = vrcp.f32 %v1856_v46 }
 0x90d   :  { %v1859_v0 = vpop.xlane.xlu1 %1858 }
 0x90e   :  { %6727 = vrcp.f32 %v1859_v0 }
 0x910   :  { %v6724_v3 = vpop.eup %6723 }
 0x911   :  { %v1871_v2 = vmul.f32 %v6724_v3, %v6714_v51  ;;  %v1862_v52 = vpop.xlane.xlu0 %1861 }
 0x912   :  { %6729 = vrcp.f32 %v1862_v52 }
 0x913   :  { %5957 = vmatmul.mubr.msk.f32.vlgmr.msra.gmra.mrb[60].mxu1 %vm605_vm5, %v1871_v2 }
 0x914   :  { %v6726_v38 = vpop.eup %6725  ;;  %6554 = vmatpush3.bf16.xpose.msk.msra.mxu1 %vm7035_vm3, %v6552_v55  ;;  %5959 = vmatprep.mubr.msk.f32.mxu1 %vm6854_vm1, %v6855_v23 }
 0x915   :  { %v1865_v6 = vpop.xlane.xlu1 %1864  ;;  %v1872_v54 = vmul.f32 %v6726_v38, %v6716_v43  ;;  %6555 = vmatprep.subr.bf16.mxu1 %v6853_v20 }
 0x916   :  { %6731 = vrcp.f32 %v1865_v6 }
 0x917   :  { %5960 = vmatmul.mubr.msk.f32.gmra.mrb[62].mxu1 %vm605_vm5, %v1872_v54 }
 0x918   :  { %v6728_v51 = vpop.eup %6727  ;;  %5962 = vmatprep.mubr.msk.f32.mxu1 %vm6854_vm1, %v6855_v23 }
 0x919   :  { %v1873_v63 = vmul.f32 %v6728_v51, %v6718_v27 }
 0x91b   :  { %5963 = vmatmul.mubr.msk.f32.gmra.mrb[64].mxu1 %vm605_vm5, %v1873_v63 }
 0x91c   :  { %v6730_v49 = vpop.eup %6729  ;;  %6558 = vmatpush3.bf16.xpose.msk.msra.mxu1 %vm7035_vm3, %v6556_v56  ;;  %5965 = vmatprep.mubr.msk.f32.mxu1 %vm6854_vm1, %v6855_v23  ;;  %v7816_v56 = vadd.f32 %v7712_v10, %v7573_v36 }
 0x91d   :  { %v1874_v28 = vmul.f32 %v6730_v49, %v6720_v31  ;;  %5996 = vmatprep.subr.mxu1 %v6855_v23 }
 0x91f   :  { %5966 = vmatmul.mubr.msk.f32.gmra.mrb[66].mxu1 %vm605_vm5, %v1874_v28 }
 0x920   :  { %v6732_v55 = vpop.eup %6731  ;;  %5968 = vmatprep.mubr.msk.f32.mxu1 %vm6854_vm1, %v6855_v23 }
 0x921   :  { %v1875_v43 = vmul.f32 %v6732_v55, %v6722_v33  ;;  %v1697_v33 = vadd.f32 %v7745_v48, %v7719_v12 }
 0x923   :  { %5969 = vmatmul.mubr.msk.f32.gmra.mrb[68].mxu1 %vm605_vm5, %v1875_v43 }
 0x924   :  { %5997 = vmatpush3.xpose.msk.msra.mxu1 %vm484_vm2, %v7568_v32  ;;  %5998 = vmatprep.mubr.msk.f32.mxu1 %vm6854_vm1, %v6855_v23  ;;  %v7808_v32 = vadd.f32 %v7573_v36, %v7714_v11 }
 0x925   :  { %6038 = vmatprep.subr.mxu1 %v6855_v23 }
 0x927   :  { %5999 = vmatmul.mubr.msk.f32.vlgmr.msra.gmra.mrb[70].mxu1 %vm484_vm2, %v7783_v26 }
 0x928   :  { %6001 = vmatprep.mubr.msk.f32.mxu1 %vm6854_vm1, %v6855_v23  ;;  %6039 = vmatpush3.msra.mxu1 %v1700_v53 }
 0x92b   :  { %6002 = vmatmul.mubr.msk.f32.gmra.mrb[72].mxu1 %vm484_vm2, %v7792_v39 }
 0x92c   :  { %6004 = vmatprep.mubr.msk.f32.mxu1 %vm6854_vm1, %v6855_v23 }
 0x92f   :  { %6005 = vmatmul.mubr.msk.f32.gmra.mrb[74].mxu1 %vm484_vm2, %v7800_v16 }
 0x930   :  { %6007 = vmatprep.mubr.msk.f32.mxu1 %vm6854_vm1, %v6855_v23 }
 0x933   :  { %6008 = vmatmul.mubr.msk.f32.gmra.mrb[76].mxu1 %vm484_vm2, %v7808_v32 }
 0x934   :  { %6010 = vmatprep.mubr.msk.f32.mxu1 %vm6854_vm1, %v6855_v23 }
 0x937   :  { %6011 = vmatmul.mubr.msk.f32.gmra.mrb[78].mxu1 %vm484_vm2, %v7816_v56 }
 0x938   :  { %6040 = vmatprep.mubr.msk.f32.mxu1 %vm6854_vm1, %v6855_v23 }
 0x9e6   :  { %v1957_v8 = vpop.f32.mrb[60].mxu1 }
 0x9e7   :  { %v1981_v11 = vadd.f32 %v1957_v8, %v7580_v40  ;;  %v5958_v27 = vpop.f32.mrb[61].mxu1 }
 0x9e9   :  { %v1986_v36 = vsel %vm52_vm6, %v1981_v11, %v1957_v8 }
 0x9ea   :  { %v1962_v10 = vpop.f32.mrb[62].mxu1  ;;  %5974 = vmatmul.mubr.msk.f32.vlgmr.msra.gmra.mrb[70].mxu0 %vm484_vm2, %v1986_v36 }
 0x9eb   :  { %v1982_v45 = vadd.f32 %v1962_v10, %v7590_v58  ;;  %6561 = vmatpush3.bf16.msra.mxu0 %v6560_v34  ;;  %v5961_v31 = vpop.f32.mrb[63].mxu1  ;;  %5976 = vmatprep.mubr.msk.f32.mxu0 %vm6854_vm1, %v6855_v23 }
 0x9ec   :  { %6562 = vmatprep.subr.bf16.mxu0 %v6853_v20 }
 0x9ee   :  { %v1967_v40 = vpop.f32.mrb[64].mxu1  ;;  %5977 = vmatmul.mubr.msk.f32.gmra.mrb[72].mxu0 %vm484_vm2, %v1982_v45 }
 0x9ef   :  { %v1983_v1 = vadd.f32 %v1967_v40, %v7594_v24  ;;  %6564 = vmatpush3.bf16.msra.mxu0 %v6563_v50  ;;  %v5964_v58 = vpop.f32.mrb[65].mxu1  ;;  %5979 = vmatprep.mubr.msk.f32.mxu0 %vm6854_vm1, %v6855_v23 }
 0x9f0   :  { %6021 = vmatprep.subr.mxu0 %v6855_v23 }
 0x9f2   :  { %v1972_v35 = vpop.f32.mrb[66].mxu1  ;;  %5980 = vmatmul.mubr.msk.f32.gmra.mrb[74].mxu0 %vm484_vm2, %v1983_v1 }
 0x9f3   :  { %v1984_v42 = vadd.f32 %v1972_v35, %v7606_v61  ;;  %6022 = vmatpush3.msra.mxu0 %v1697_v33  ;;  %v5967_v24 = vpop.f32.mrb[67].mxu1  ;;  %5982 = vmatprep.mubr.msk.f32.mxu0 %vm6854_vm1, %v6855_v23 }
 0x9f6   :  { %v1977_v4 = vpop.f32.mrb[68].mxu1  ;;  %5983 = vmatmul.mubr.msk.f32.gmra.mrb[76].mxu0 %vm484_vm2, %v1984_v42 }
 0x9f7   :  { %v1985_v25 = vadd.f32 %v1977_v4, %v7610_v62  ;;  %v5970_v5 = vpop.f32.mrb[69].mxu1  ;;  %5985 = vmatprep.mubr.msk.f32.mxu0 %vm6854_vm1, %v6855_v23 }
 0x9fa   :  { %5986 = vmatmul.mubr.msk.f32.gmra.mrb[78].mxu0 %vm484_vm2, %v1985_v25  ;;  %v2207_v12 = vpop.f32.mrb[70].mxu1 }
 0x9fb   :  { %v2208_v13 = vadd.f32 %v2207_v12, %v7144_v7  ;;  %v6000_v61 = vpop.f32.mrb[71].mxu1  ;;  %6023 = vmatprep.mubr.msk.f32.mxu0 %vm6854_vm1, %v6855_v23  ;;  %v1991_v12 = vld [vmem:[%s8955_s9] sm:$0xff] }
 0x9fd   :  { %v2231_v14 = vsel %vm605_vm5, %v2208_v13, -inf }
 0x9fe   :  { %2232 = vmax.xlane.f32.xlu0 %v2231_v14  ;;  %v2212_v15 = vpop.f32.mrb[72].mxu1 }
 0x9ff   :  { %v2213_v34 = vadd.f32 %v2212_v15, %v7144_v7  ;;  %v6003_v62 = vpop.f32.mrb[73].mxu1  ;;  %v1992_v15 = vld [vmem:[%s8955_s9 + $0x8] sm:$0xff] }
 0xa01   :  { %v2234_v47 = vsel %vm605_vm5, %v2213_v34, -inf }
 0xa02   :  { %2235 = vmax.xlane.f32.xlu1 %v2234_v47  ;;  %v2217_v48 = vpop.f32.mrb[74].mxu1 }
 0xa03   :  { %v2218_v9 = vadd.f32 %v2217_v48, %v7144_v7  ;;  %v6006_v60 = vpop.f32.mrb[75].mxu1  ;;  %v1993_v48 = vld [vmem:[%s8955_s9 + $0x10] sm:$0xff] }
 0xa05   :  { %v2237_v50 = vsel %vm605_vm5, %v2218_v9, -inf }
 0xa06   :  { %2238 = vmax.xlane.f32.xlu0 %v2237_v50  ;;  %v2222_v44 = vpop.f32.mrb[76].mxu1 }
 0xa07   :  { %v2223_v46 = vadd.f32 %v2222_v44, %v7144_v7  ;;  %v6009_v0 = vpop.f32.mrb[77].mxu1  ;;  %v1994_v44 = vld [vmem:[%s8955_s9 + $0x18] sm:$0xff] }
 0xa09   :  { %v2240_v3 = vsel %vm605_vm5, %v2223_v46, -inf }
 0xa0a   :  { %2241 = vmax.xlane.f32.xlu1 %v2240_v3  ;;  %v2227_v2 = vpop.f32.mrb[78].mxu1 }
 0xa0b   :  { %v2228_v52 = vadd.f32 %v2227_v2, %v7144_v7  ;;  %v6012_v38 = vpop.f32.mrb[79].mxu1  ;;  %v1995_v2 = vld [vmem:[%s8955_s9 + $0x20] sm:$0xff] }
 0xa0d   :  { %v2243_v6 = vsel %vm605_vm5, %v2228_v52, -inf }
 0xa0e   :  { %2244 = vmax.xlane.f32.xlu0 %v2243_v6 }
 0xa8b   :  { %v2233_v54 = vpop.xlane.xlu0 %2232 }
 0xa8c   :  { %v2246_v51 = vsub.f32 %v2208_v13, %v2233_v54 }
 0xa8e   :  { %v2251_v63 = vmul.f32 1.442695, %v2246_v51 }
 0xa8f   :  { %v2236_v49 = vpop.xlane.xlu1 %2235 }
 0xa90   :  { %6733 = vpow2.f32 %v2251_v63  ;;  %v2247_v28 = vsub.f32 %v2213_v34, %v2236_v49 }
 0xa92   :  { %v2253_v55 = vmul.f32 1.442695, %v2247_v28 }
 0xa93   :  { %v2239_v43 = vpop.xlane.xlu0 %2238 }
 0xa94   :  { %6735 = vpow2.f32 %v2253_v55  ;;  %v2248_v53 = vsub.f32 %v2218_v9, %v2239_v43 }
 0xa96   :  { %v2255_v8 = vmul.f32 1.442695, %v2248_v53 }
 0xa97   :  { %v2242_v11 = vpop.xlane.xlu1 %2241 }
 0xa98   :  { %6737 = vpow2.f32 %v2255_v8  ;;  %v2249_v27 = vsub.f32 %v2223_v46, %v2242_v11 }
 0xa9a   :  { %v6734_v36 = vpop.eup %6733  ;;  %v2257_v10 = vmul.f32 1.442695, %v2249_v27 }
 0xa9b   :  { %v2245_v45 = vpop.xlane.xlu0 %2244  ;;  %v2261_v31 = vsel %vm605_vm5, %v6734_v36, 0.0 }
 0xa9c   :  { %6739 = vpow2.f32 %v2257_v10  ;;  %v2250_v40 = vsub.f32 %v2228_v52, %v2245_v45  ;;  %2262 = vadd.xlane.f32.xlu1 %v2261_v31 }
 0xa9e   :  { %v6736_v1 = vpop.eup %6735  ;;  %v2259_v58 = vmul.f32 1.442695, %v2250_v40  ;;  %v7924_v40 = vld [vmem:[%s8947_s0] sm:$0xff] }
 0xa9f   :  { %v2264_v33 = vsel %vm605_vm5, %v6736_v1, 0.0 }
 0xaa0   :  { %6741 = vpow2.f32 %v2259_v58  ;;  %2265 = vadd.xlane.f32.xlu0 %v2264_v33  ;;  %v5114_v58 = vld [vmem:[%s8946_s3 + $0x48] sm:$0xff] }
 0xaa2   :  { %v6738_v35 = vpop.eup %6737 }
 0xaa3   :  { %v2267_v42 = vsel %vm605_vm5, %v6738_v35, 0.0 }
 0xaa4   :  { %2268 = vadd.xlane.f32.xlu1 %v2267_v42  ;;  %v5098_v42 = vld [vmem:[%s8948_s1 + $0x48] sm:$0xff] }
 0xaa6   :  { %v6740_v24 = vpop.eup %6739 }
 0xaa7   :  { %v2270_v4 = vsel %vm605_vm5, %v6740_v24, 0.0 }
 0xaa8   :  { %2271 = vadd.xlane.f32.xlu0 %v2270_v4  ;;  %v5099_v4 = vld [vmem:[%s8948_s1 + $0x50] sm:$0xff] }
 0xaaa   :  { %v6742_v25 = vpop.eup %6741 }
 0xaab   :  { %v2273_v5 = vsel %vm605_vm5, %v6742_v25, 0.0 }
 0xaac   :  { %2274 = vadd.xlane.f32.xlu1 %v2273_v5 }
 0xabd   :  { %v2077_v13 = vpop.f32.mrb[70].mxu0 }
 0xabe   :  { %v2101_v61 = vadd.f32 %v2077_v13, %v1991_v12  ;;  %v5975_v14 = vpop.f32.mrb[71].mxu0  ;;  %v5115_v12 = vld [vmem:[%s8946_s3 + $0x50] sm:$0xff]  ;;  %v5116_v13 = vld [vmem:[%s8946_s3 + $0x58] sm:$0xff] }
 0xac0   :  { %2106 = vst.msk [vmem:[%s8955_s9] sm:$0xff] %vm64_vm0, %v2101_v61 }
 0xac1   :  { %v2082_v34 = vpop.f32.mrb[72].mxu0 }
 0xac2   :  { %v2102_v62 = vadd.f32 %v2082_v34, %v1992_v15  ;;  %v5978_v47 = vpop.f32.mrb[73].mxu0  ;;  %v6577_v34 = vpack.c.bf16 %v5116_v13, %v5115_v12 }
 0xac4   :  { %2107 = vst.msk [vmem:[%s8955_s9 + $0x8] sm:$0xff] %vm64_vm0, %v2102_v62 }
 0xac5   :  { %v2087_v9 = vpop.f32.mrb[74].mxu0 }
 0xac6   :  { %v2103_v60 = vadd.f32 %v2087_v9, %v1993_v48  ;;  %v5981_v50 = vpop.f32.mrb[75].mxu0 }
 0xac8   :  { %2108 = vst.msk [vmem:[%s8955_s9 + $0x10] sm:$0xff] %vm64_vm0, %v2103_v60 }
 0xac9   :  { %v2092_v46 = vpop.f32.mrb[76].mxu0 }
 0xaca   :  { %v2104_v0 = vadd.f32 %v2092_v46, %v1994_v44  ;;  %v5984_v3 = vpop.f32.mrb[77].mxu0 }
 0xacc   :  { %2109 = vst.msk [vmem:[%s8955_s9 + $0x18] sm:$0xff] %vm64_vm0, %v2104_v0 }
 0xacd   :  { %v2097_v52 = vpop.f32.mrb[78].mxu0 }
 0xace   :  { %v2105_v38 = vadd.f32 %v2097_v52, %v1995_v2  ;;  %v5987_v6 = vpop.f32.mrb[79].mxu0 }
 0xad0   :  { %2110 = vst.msk [vmem:[%s8955_s9 + $0x20] sm:$0xff] %vm64_vm0, %v2105_v38 }
 0xb29   :  { %v2263_v54 = vpop.xlane.xlu1 %2262 }
 0xb2a   :  { %6743 = vrcp.f32 %v2263_v54  ;;  %v2401_v54 = vld [vmem:[%s8955_s9 + $0x28] sm:$0xff] }
 0xb2d   :  { %v2266_v51 = vpop.xlane.xlu0 %2265 }
 0xb2e   :  { %6745 = vrcp.f32 %v2266_v51 }
 0xb31   :  { %v2269_v63 = vpop.xlane.xlu1 %2268 }
 0xb32   :  { %6747 = vrcp.f32 %v2269_v63 }
 0xb34   :  { %v6744_v49 = vpop.eup %6743 }
 0xb35   :  { %v2281_v28 = vmul.f32 %v6744_v49, %v6734_v36  ;;  %v2272_v55 = vpop.xlane.xlu0 %2271 }
 0xb36   :  { %6749 = vrcp.f32 %v2272_v55 }
 0xb37   :  { %6024 = vmatmul.mubr.msk.f32.vlgmr.msra.gmra.mrb[80].mxu0 %vm605_vm5, %v2281_v28  ;;  %v2402_v28 = vld [vmem:[%s8955_s9 + $0x30] sm:$0xff] }
 0xb38   :  { %v6746_v43 = vpop.eup %6745  ;;  %6026 = vmatprep.mubr.msk.f32.mxu0 %vm6854_vm1, %v6855_v23 }
 0xb39   :  { %v2275_v53 = vpop.xlane.xlu1 %2274  ;;  %v2282_v8 = vmul.f32 %v6746_v43, %v6736_v1  ;;  %v5113_v1 = vld [vmem:[%s8946_s3 + $0x40] sm:$0xff] }
 0xb3a   :  { %6751 = vrcp.f32 %v2275_v53  ;;  %v6573_v33 = vpack.c.bf16 %v5114_v58, %v5113_v1  ;;  %v2405_v58 = vld [vmem:[%s8955_s9 + $0x48] sm:$0xff] }
 0xb3b   :  { %6027 = vmatmul.mubr.msk.f32.gmra.mrb[82].mxu0 %vm605_vm5, %v2282_v8  ;;  %v2403_v8 = vld [vmem:[%s8955_s9 + $0x38] sm:$0xff] }
 0xb3c   :  { %v6748_v11 = vpop.eup %6747  ;;  %6029 = vmatprep.mubr.msk.f32.mxu0 %vm6854_vm1, %v6855_v23  ;;  %6574 = vmatprep.subr.bf16.mxu1 %v6573_v33 }
 0xb3d   :  { %v2283_v27 = vmul.f32 %v6748_v11, %v6738_v35  ;;  %v5097_v35 = vld [vmem:[%s8948_s1 + $0x40] sm:$0xff] }
 0xb3f   :  { %6030 = vmatmul.mubr.msk.f32.gmra.mrb[84].mxu0 %vm605_vm5, %v2283_v27 }
 0xb40   :  { %v6750_v36 = vpop.eup %6749  ;;  %6032 = vmatprep.mubr.msk.f32.mxu0 %vm6854_vm1, %v6855_v23 }
 0xb41   :  { %v2284_v10 = vmul.f32 %v6750_v36, %v6740_v24  ;;  %v6565_v24 = vpack.c.bf16 %v5098_v42, %v5097_v35 }
 0xb43   :  { %6033 = vmatmul.mubr.msk.f32.gmra.mrb[86].mxu0 %vm605_vm5, %v2284_v10  ;;  %6566 = vmatprep.subr.bf16.mxu0 %v6565_v24  ;;  %v2404_v10 = vld [vmem:[%s8955_s9 + $0x40] sm:$0xff] }
 0xb44   :  { %v6752_v45 = vpop.eup %6751  ;;  %6035 = vmatprep.mubr.msk.f32.mxu0 %vm6854_vm1, %v6855_v23  ;;  %6568 = vmatpush3.bf16.msra.mxu0 %v6565_v24  ;;  %v5118_v24 = vld [vmem:[%s8949_s4 + $0x2] ss:$0 sm:$0xff] }
 0xb45   :  { %v2285_v31 = vmul.f32 %v6752_v45, %v6742_v25  ;;  %v5100_v25 = vld [vmem:[%s8948_s1 + $0x58] sm:$0xff] }
 0xb46   :  { %v6569_v5 = vpack.c.bf16 %v5100_v25, %v5099_v4 }
 0xb47   :  { %6036 = vmatmul.mubr.msk.f32.gmra.mrb[88].mxu0 %vm605_vm5, %v2285_v31 }
 0xb48   :  { %6063 = vmatprep.mubr.msk.f32.mxu0 %vm64_vm0, %v7924_v40  ;;  %6570 = vmatprep.subr.bf16.mxu0 %v6569_v5 }
 0xb49   :  { %6572 = vmatpush3.bf16.msra.mxu0 %v6569_v5 }
 0xb4c   :  { %6064 = vmatmul.mubr.msk.f32.vlgmr.msra.gmra.mrb[90].mxu0 %vm64_vm0, %v7636_v17 }
 0xb4d   :  { %6066 = vmatprep.mubr.msk.f32.mxu0 %vm64_vm0, %v7643_v18 }
 0xb50   :  { %6067 = vmatmul.mubr.msk.f32.gmra.mrb[92].mxu0 %vm64_vm0, %v7650_v19 }
 0xb51   :  { %6069 = vmatprep.mubr.msk.f32.mxu0 %vm64_vm0, %v7657_v21 }
 0xb54   :  { %6070 = vmatmul.mubr.msk.f32.gmra.mrb[94].mxu0 %vm64_vm0, %v7664_v22 }
 0xb55   :  { %6072 = vmatprep.mubr.msk.f32.mxu0 %vm64_vm0, %v7671_v57 }
 0xb58   :  { %6073 = vmatmul.mubr.msk.f32.gmra.mrb[96].mxu0 %vm64_vm0, %v7678_v59 }
 0xb59   :  { %6075 = vmatprep.mubr.msk.f32.mxu0 %vm64_vm0, %v7685_v30 }
 0xb5c   :  { %6076 = vmatmul.mubr.msk.f32.gmra.mrb[98].mxu0 %vm64_vm0, %v7692_v37 }
 0xb5d   :  { %6109 = vmatprep.mubr.msk.f32.mxu0 %vm64_vm0, %v7924_v40 }
 0xc0a   :  { %v2367_v61 = vpop.f32.mrb[80].mxu0 }
 0xc0b   :  { %v2391_v14 = vadd.f32 %v2367_v61, %v7783_v26  ;;  %v6025_v15 = vpop.f32.mrb[81].mxu0 }
 0xc0d   :  { %v2396_v62 = vsel %vm52_vm6, %v2391_v14, %v2367_v61 }
 0xc0e   :  { %v2372_v47 = vpop.f32.mrb[82].mxu0  ;;  %6041 = vmatmul.mubr.msk.f32.vlgmr.msra.gmra.mrb[80].mxu1 %vm484_vm2, %v2396_v62 }
 0xc0f   :  { %v2392_v48 = vadd.f32 %v2372_v47, %v7792_v39  ;;  %v6028_v9 = vpop.f32.mrb[83].mxu0  ;;  %6043 = vmatprep.mubr.msk.f32.mxu1 %vm6854_vm1, %v6855_v23  ;;  %6576 = vmatpush3.bf16.msra.mxu1 %v6573_v33 }
 0xc10   :  { %6578 = vmatprep.subr.bf16.mxu1 %v6577_v34 }
 0xc12   :  { %v2377_v60 = vpop.f32.mrb[84].mxu0  ;;  %6044 = vmatmul.mubr.msk.f32.gmra.mrb[82].mxu1 %vm484_vm2, %v2392_v48 }
 0xc13   :  { %v2393_v26 = vadd.f32 %v2377_v60, %v7800_v16  ;;  %v6031_v50 = vpop.f32.mrb[85].mxu0  ;;  %6046 = vmatprep.mubr.msk.f32.mxu1 %vm6854_vm1, %v6855_v23  ;;  %6580 = vmatpush3.bf16.msra.mxu1 %v6577_v34 }
 0xc14   :  { %6589 = vmatprep.subr.bf16.mxu1 %v6853_v20 }
 0xc16   :  { %v2382_v44 = vpop.f32.mrb[86].mxu0  ;;  %6047 = vmatmul.mubr.msk.f32.gmra.mrb[84].mxu1 %vm484_vm2, %v2393_v26 }
 0xc17   :  { %v2394_v39 = vadd.f32 %v2382_v44, %v7808_v32  ;;  %v6034_v46 = vpop.f32.mrb[87].mxu0  ;;  %6049 = vmatprep.mubr.msk.f32.mxu1 %vm6854_vm1, %v6855_v23 }
 0xc1a   :  { %v2387_v0 = vpop.f32.mrb[88].mxu0  ;;  %6050 = vmatmul.mubr.msk.f32.gmra.mrb[86].mxu1 %vm484_vm2, %v2394_v39 }
 0xc1b   :  { %v2395_v16 = vadd.f32 %v2387_v0, %v7816_v56  ;;  %v6037_v3 = vpop.f32.mrb[89].mxu0  ;;  %6052 = vmatprep.mubr.msk.f32.mxu1 %vm6854_vm1, %v6855_v23 }
 0xc1e   :  { %6053 = vmatmul.mubr.msk.f32.gmra.mrb[88].mxu1 %vm484_vm2, %v2395_v16 }
 0xc1f   :  { %6086 = vmatprep.mubr.msk.f32.mxu1 %vm64_vm0, %v7924_v40  ;;  %v8015_v32 = vpop.f32.mrb[90].mxu0 }
 0xc20   :  { %v2600_v56 = vpop.f32.mrb[91].mxu0 }
 0xc22   :  { %6087 = vmatmul.mubr.msk.f32.vlgmr.msra.gmra.mrb[90].mxu1 %vm64_vm0, %v7636_v17 }
 0xc23   :  { %6089 = vmatprep.mubr.msk.f32.mxu1 %vm64_vm0, %v7643_v18  ;;  %v8017_v2 = vpop.f32.mrb[92].mxu0 }
 0xc24   :  { %v8019_v52 = vpop.f32.mrb[93].mxu0 }
 0xc26   :  { %6090 = vmatmul.mubr.msk.f32.gmra.mrb[92].mxu1 %vm64_vm0, %v7650_v19 }
 0xc27   :  { %6092 = vmatprep.mubr.msk.f32.mxu1 %vm64_vm0, %v7657_v21  ;;  %v8021_v38 = vpop.f32.mrb[94].mxu0 }
 0xc28   :  { %v8023_v6 = vpop.f32.mrb[95].mxu0 }
 0xc2a   :  { %6093 = vmatmul.mubr.msk.f32.gmra.mrb[94].mxu1 %vm64_vm0, %v7664_v22 }
 0xc2b   :  { %6095 = vmatprep.mubr.msk.f32.mxu1 %vm64_vm0, %v7671_v57 }
 0xc2e   :  { %6096 = vmatmul.mubr.msk.f32.gmra.mrb[96].mxu1 %vm64_vm0, %v7678_v59 }
 0xc2f   :  { %6098 = vmatprep.mubr.msk.f32.mxu1 %vm64_vm0, %v7685_v30 }
 0xc32   :  { %6099 = vmatmul.mubr.msk.f32.gmra.mrb[98].mxu1 %vm64_vm0, %v7692_v37 }
 0xc33   :  { %6134 = vmatprep.mubr.msk.f32.mxu1 %vm6854_vm1, %v6855_v23 }
 0xce1   :  { %v2487_v51 = vpop.f32.mrb[80].mxu1 }
 0xce2   :  { %v2511_v63 = vadd.f32 %v2487_v51, %v2401_v54  ;;  %v6042_v49 = vpop.f32.mrb[81].mxu1  ;;  %v8082_v54 = vld [vmem:[%s8950_s2 + $0x2] ss:$0 sm:$0xff] }
 0xce3   :  { %v8089_v49 = vadd.f32 %v8082_v54, %v2600_v56  ;;  %v8119_v56 = vadd.f32 %v8082_v54, %v8023_v6  ;;  %v5131_v6 = vld [vmem:[%s8951_s5 + $0x50] sm:$0xff] }
 0xce4   :  { %2516 = vst.msk [vmem:[%s8955_s9 + $0x28] sm:$0xff] %vm64_vm0, %v2511_v63 }
 0xce5   :  { %v2492_v55 = vpop.f32.mrb[82].mxu1 }
 0xce6   :  { %v2512_v43 = vadd.f32 %v2492_v55, %v2402_v28  ;;  %v6045_v53 = vpop.f32.mrb[83].mxu1  ;;  %v8099_v28 = vadd.f32 %v8015_v32, %v8082_v54  ;;  %v8103_v55 = vadd.f32 %v8082_v54, %v8019_v52  ;;  %v8115_v32 = vadd.f32 %v8017_v2, %v8082_v54  ;;  %v5129_v2 = vld [vmem:[%s8951_s5 + $0x40] sm:$0xff]  ;;  %v5130_v52 = vld [vmem:[%s8951_s5 + $0x48] sm:$0xff] }
 0xce7   :  { %v5132_v53 = vld [vmem:[%s8951_s5 + $0x58] sm:$0xff] }
 0xce8   :  { %2517 = vst.msk [vmem:[%s8955_s9 + $0x30] sm:$0xff] %vm64_vm0, %v2512_v43  ;;  %v6581_v43 = vpack.c.bf16 %v5130_v52, %v5129_v2 }
 0xce9   :  { %v2497_v11 = vpop.f32.mrb[84].mxu1 }
 0xcea   :  { %v2513_v27 = vadd.f32 %v2497_v11, %v2403_v8  ;;  %v6048_v36 = vpop.f32.mrb[85].mxu1  ;;  %v6585_v8 = vpack.c.bf16 %v5132_v53, %v5131_v6  ;;  %6582 = vmatprep.subr.bf16.mxu0 %v6581_v43 }
 0xceb   :  { %6584 = vmatpush3.bf16.msra.mxu0 %v6581_v43 }
 0xcec   :  { %2518 = vst.msk [vmem:[%s8955_s9 + $0x38] sm:$0xff] %vm64_vm0, %v2513_v27  ;;  %6586 = vmatprep.subr.bf16.mxu0 %v6585_v8 }
 0xced   :  { %v2502_v45 = vpop.f32.mrb[86].mxu1 }
 0xcee   :  { %v2514_v31 = vadd.f32 %v2502_v45, %v2404_v10  ;;  %v6051_v1 = vpop.f32.mrb[87].mxu1 }
 0xcef   :  { %6588 = vmatpush3.bf16.msra.mxu0 %v6585_v8 }
 0xcf0   :  { %2519 = vst.msk [vmem:[%s8955_s9 + $0x40] sm:$0xff] %vm64_vm0, %v2514_v31  ;;  %6597 = vmatprep.subr.bf16.mxu0 %v6853_v20 }
 0xcf1   :  { %v2507_v33 = vpop.f32.mrb[88].mxu1 }
 0xcf2   :  { %v2515_v35 = vadd.f32 %v2507_v33, %v2405_v58  ;;  %v6054_v42 = vpop.f32.mrb[89].mxu1  ;;  %6110 = vmatmul.mubr.msk.f32.vlgmr.msra.gmra.mrb[100].mxu0 %vm64_vm0, %v7636_v17 }
 0xcf3   :  { %6112 = vmatprep.mubr.msk.f32.mxu0 %vm64_vm0, %v7643_v18 }
 0xcf4   :  { %2520 = vst.msk [vmem:[%s8955_s9 + $0x48] sm:$0xff] %vm64_vm0, %v2515_v35 }
 0xcf5   :  { %v6088_v4 = vpop.f32.mrb[90].mxu1 }
 0xcf6   :  { %v2734_v25 = vadd.f32 %v6088_v4, %v5118_v24  ;;  %v2728_v5 = vpop.f32.mrb[91].mxu1  ;;  %6113 = vmatmul.mubr.msk.f32.gmra.mrb[102].mxu0 %vm64_vm0, %v7650_v19 }
 0xcf7   :  { %v2729_v12 = vadd.f32 %v5118_v24, %v2728_v5  ;;  %6115 = vmatprep.mubr.msk.f32.mxu0 %vm64_vm0, %v7657_v21 }
 0xcf9   :  { %v6590_v13 = vpack.c.bf16 %v2734_v25, %v2729_v12  ;;  %v6091_v61 = vpop.f32.mrb[92].mxu1  ;;  %v8183_v12 = vld [vmem:[%s8952_s6 + $0x2] ss:$0 sm:$0xff] }
 0xcfa   :  { %v2744_v14 = vadd.f32 %v6091_v61, %v5118_v24  ;;  %v2738_v15 = vpop.f32.mrb[93].mxu1  ;;  %6116 = vmatmul.mubr.msk.f32.gmra.mrb[104].mxu0 %vm64_vm0, %v7664_v22 }
 0xcfb   :  { %6592 = vmatpush3.bf16.xpose.msk.msra.mxu1 %vm7035_vm3, %v6590_v13  ;;  %v2739_v34 = vadd.f32 %v5118_v24, %v2738_v15  ;;  %6118 = vmatprep.mubr.msk.f32.mxu0 %vm64_vm0, %v7671_v57 }
 0xcfc   :  { %6593 = vmatprep.subr.bf16.mxu1 %v6853_v20 }
 0xcfd   :  { %v6594_v62 = vpack.c.bf16 %v2744_v14, %v2739_v34  ;;  %v6094_v47 = vpop.f32.mrb[94].mxu1 }
 0xcfe   :  { %v8066_v48 = vadd.f32 %v6094_v47, %v5118_v24  ;;  %v2748_v9 = vpop.f32.mrb[95].mxu1  ;;  %6119 = vmatmul.mubr.msk.f32.gmra.mrb[106].mxu0 %vm64_vm0, %v7678_v59 }
 0xcff   :  { %v2749_v3 = vadd.f32 %v5118_v24, %v2748_v9  ;;  %6121 = vmatprep.mubr.msk.f32.mxu0 %vm64_vm0, %v7685_v30 }
 0xd01   :  { %v6097_v60 = vpop.f32.mrb[96].mxu1 }
 0xd02   :  { %v8068_v26 = vadd.f32 %v6097_v60, %v5118_v24  ;;  %v2758_v50 = vpop.f32.mrb[97].mxu1  ;;  %6122 = vmatmul.mubr.msk.f32.gmra.mrb[108].mxu0 %vm64_vm0, %v7692_v37 }
 0xd03   :  { %6596 = vmatpush3.bf16.xpose.msk.msra.mxu1 %vm7035_vm3, %v6594_v62  ;;  %v8072_v44 = vadd.f32 %v5118_v24, %v2758_v50  ;;  %6159 = vmatprep.mubr.msk.f32.mxu0 %vm6854_vm1, %v6855_v23 }
 0xd04   :  { %6132 = vmatprep.subr.mxu1 %v6855_v23 }
 0xd05   :  { %v6604_v39 = vpack.c.bf16 %v8072_v44, %v8066_v48  ;;  %v6100_v46 = vpop.f32.mrb[98].mxu1 }
 0xd06   :  { %v8077_v0 = vadd.f32 %v6100_v46, %v5118_v24  ;;  %v2768_v16 = vpop.f32.mrb[99].mxu1 }
 0xd07   :  { %v8084_v51 = vadd.f32 %v5118_v24, %v2768_v16  ;;  %v8172_v24 = vpop.f32.mrb[96].mxu0 }
 0xd08   :  { %v8174_v4 = vpop.f32.mrb[97].mxu0 }
 0xd09   :  { %v6608_v63 = vpack.c.bf16 %v8084_v51, %v8068_v26  ;;  %v8176_v25 = vpop.f32.mrb[98].mxu0  ;;  %v8247_v26 = vadd.f32 %v8021_v38, %v8082_v54  ;;  %v8256_v51 = vadd.f32 %v8082_v54, %v8174_v4  ;;  %v8264_v38 = vadd.f32 %v8172_v24, %v8082_v54  ;;  %v2905_v24 = vld [vmem:[%s8953_s7 + $0x10] sm:$0xff] }
 0xd0a   :  { %v8178_v5 = vpop.f32.mrb[99].mxu0 }
 0xd0b   :  { %6133 = vmatpush3.xpose.msk.msra.mxu1 %vm484_vm2, %v2749_v3 }
 0xd0c   :  { %6174 = vmatprep.subr.mxu1 %v6855_v23 }
 0xd0e   :  { %6135 = vmatmul.mubr.msk.f32.vlgmr.msra.gmra.mrb[100].mxu1 %vm484_vm2, %v8089_v49 }
 0xd0f   :  { %6137 = vmatprep.mubr.msk.f32.mxu1 %vm6854_vm1, %v6855_v23  ;;  %6175 = vmatpush3.msra.mxu1 %v2905_v24 }
 0xd10   :  { %6611 = vmatprep.subr.bf16.mxu1 %v6853_v20 }
 0xd12   :  { %6138 = vmatmul.mubr.msk.f32.gmra.mrb[102].mxu1 %vm484_vm2, %v8099_v28 }
 0xd13   :  { %6140 = vmatprep.mubr.msk.f32.mxu1 %vm6854_vm1, %v6855_v23 }
 0xd16   :  { %6141 = vmatmul.mubr.msk.f32.gmra.mrb[104].mxu1 %vm484_vm2, %v8103_v55 }
 0xd17   :  { %6143 = vmatprep.mubr.msk.f32.mxu1 %vm6854_vm1, %v6855_v23 }
 0xd1a   :  { %6144 = vmatmul.mubr.msk.f32.gmra.mrb[106].mxu1 %vm484_vm2, %v8115_v32 }
 0xd1b   :  { %6146 = vmatprep.mubr.msk.f32.mxu1 %vm6854_vm1, %v6855_v23 }
 0xd1e   :  { %6147 = vmatmul.mubr.msk.f32.gmra.mrb[108].mxu1 %vm484_vm2, %v8119_v56 }
 0xd1f   :  { %6176 = vmatprep.mubr.msk.f32.mxu1 %vm6854_vm1, %v6855_v23 }
 0xdc5   :  { %v6111_v13 = vpop.f32.mrb[100].mxu0 }
 0xdc6   :  { %v2862_v61 = vadd.f32 %v6111_v13, %v8183_v12  ;;  %v2856_v14 = vpop.f32.mrb[101].mxu0 }
 0xdc7   :  { %v2857_v15 = vadd.f32 %v8183_v12, %v2856_v14 }
 0xdc9   :  { %v6598_v34 = vpack.c.bf16 %v2862_v61, %v2857_v15  ;;  %v6114_v62 = vpop.f32.mrb[102].mxu0 }
 0xdca   :  { %v2872_v47 = vadd.f32 %v6114_v62, %v8183_v12  ;;  %v2866_v9 = vpop.f32.mrb[103].mxu0 }
 0xdcb   :  { %6599 = vmatpush3.bf16.msra.mxu0 %v6598_v34  ;;  %v2867_v60 = vadd.f32 %v8183_v12, %v2866_v9 }
 0xdcc   :  { %6600 = vmatprep.subr.bf16.mxu0 %v6853_v20 }
 0xdcd   :  { %v6601_v50 = vpack.c.bf16 %v2872_v47, %v2867_v60 }
 0xdcf   :  { %6602 = vmatpush3.bf16.msra.mxu0 %v6601_v50 }
 0xdd0   :  { %6157 = vmatprep.subr.mxu0 %v6855_v23 }
 0xde1   :  { %v3002_v17 = vpop.f32.mrb[100].mxu1 }
 0xde2   :  { %v3003_v18 = vadd.f32 %v3002_v17, %v7144_v7  ;;  %v6136_v19 = vpop.f32.mrb[101].mxu1 }
 0xde4   :  { %v3026_v21 = vsel %vm605_vm5, %v3003_v18, -inf }
 0xde5   :  { %3027 = vmax.xlane.f32.xlu0 %v3026_v21  ;;  %v3007_v22 = vpop.f32.mrb[102].mxu1 }
 0xde6   :  { %v3008_v57 = vadd.f32 %v3007_v22, %v7144_v7  ;;  %v6139_v59 = vpop.f32.mrb[103].mxu1 }
 0xde8   :  { %v3029_v11 = vsel %vm605_vm5, %v3008_v57, -inf }
 0xde9   :  { %3030 = vmax.xlane.f32.xlu1 %v3029_v11  ;;  %v3012_v30 = vpop.f32.mrb[104].mxu1 }
 0xdea   :  { %v3013_v37 = vadd.f32 %v3012_v30, %v7144_v7  ;;  %v6142_v27 = vpop.f32.mrb[105].mxu1 }
 0xdec   :  { %v3032_v36 = vsel %vm605_vm5, %v3013_v37, -inf }
 0xded   :  { %3033 = vmax.xlane.f32.xlu0 %v3032_v36  ;;  %v3017_v10 = vpop.f32.mrb[106].mxu1 }
 0xdee   :  { %v3018_v45 = vadd.f32 %v3017_v10, %v7144_v7  ;;  %v6145_v31 = vpop.f32.mrb[107].mxu1 }
 0xdf0   :  { %v3035_v1 = vsel %vm605_vm5, %v3018_v45, -inf }
 0xdf1   :  { %3036 = vmax.xlane.f32.xlu1 %v3035_v1  ;;  %v3022_v58 = vpop.f32.mrb[108].mxu1 }
 0xdf2   :  { %v3023_v33 = vadd.f32 %v3022_v58, %v7144_v7  ;;  %v6148_v35 = vpop.f32.mrb[109].mxu1  ;;  %v6117_v58 = vpop.f32.mrb[104].mxu0 }
 0xdf3   :  { %v8197_v13 = vadd.f32 %v6117_v58, %v8183_v12 }
 0xdf4   :  { %v3038_v42 = vsel %vm605_vm5, %v3023_v33, -inf }
 0xdf5   :  { %3039 = vmax.xlane.f32.xlu0 %v3038_v42 }
 0xe72   :  { %v3028_v46 = vpop.xlane.xlu0 %3027 }
 0xe73   :  { %v3041_v16 = vsub.f32 %v3003_v18, %v3028_v46 }
 0xe75   :  { %v3046_v3 = vmul.f32 1.442695, %v3041_v16 }
 0xe76   :  { %v3031_v2 = vpop.xlane.xlu1 %3030 }
 0xe77   :  { %6753 = vpow2.f32 %v3046_v3  ;;  %v3042_v52 = vsub.f32 %v3008_v57, %v3031_v2 }
 0xe79   :  { %v3048_v6 = vmul.f32 1.442695, %v3042_v52 }
 0xe7a   :  { %v3034_v43 = vpop.xlane.xlu0 %3033 }
 0xe7b   :  { %6755 = vpow2.f32 %v3048_v6  ;;  %v3043_v53 = vsub.f32 %v3013_v37, %v3034_v43 }
 0xe7d   :  { %v3050_v8 = vmul.f32 1.442695, %v3043_v53 }
 0xe7e   :  { %v3037_v17 = vpop.xlane.xlu1 %3036 }
 0xe7f   :  { %6757 = vpow2.f32 %v3050_v8  ;;  %v3044_v19 = vsub.f32 %v3018_v45, %v3037_v17 }
 0xe81   :  { %v6754_v21 = vpop.eup %6753  ;;  %v3052_v22 = vmul.f32 1.442695, %v3044_v19 }
 0xe82   :  { %v3040_v59 = vpop.xlane.xlu0 %3039  ;;  %v3056_v11 = vsel %vm605_vm5, %v6754_v21, 0.0 }
 0xe83   :  { %6759 = vpow2.f32 %v3052_v22  ;;  %v3045_v30 = vsub.f32 %v3023_v33, %v3040_v59  ;;  %3057 = vadd.xlane.f32.xlu1 %v3056_v11  ;;  %v2876_v33 = vpop.f32.mrb[105].mxu0 }
 0xe84   :  { %v6120_v35 = vpop.f32.mrb[106].mxu0  ;;  %v2877_v61 = vadd.f32 %v8183_v12, %v2876_v33 }
 0xe85   :  { %v6756_v18 = vpop.eup %6755  ;;  %v3054_v27 = vmul.f32 1.442695, %v3045_v30  ;;  %v2886_v42 = vpop.f32.mrb[107].mxu0  ;;  %v8207_v34 = vadd.f32 %v6120_v35, %v8183_v12 }
 0xe86   :  { %v3059_v57 = vsel %vm605_vm5, %v6756_v18, 0.0  ;;  %v8201_v14 = vadd.f32 %v8183_v12, %v2886_v42  ;;  %6158 = vmatpush3.msra.mxu0 %v2877_v61  ;;  %v8209_v62 = vpop.f32.mrb[108].mxu0 }
 0xe87   :  { %6761 = vpow2.f32 %v3054_v27  ;;  %3060 = vadd.xlane.f32.xlu0 %v3059_v57  ;;  %6603 = vmatprep.subr.bf16.mxu0 %v6853_v20  ;;  %v2896_v47 = vpop.f32.mrb[109].mxu0  ;;  %v2902_v30 = vadd.f32 %v8209_v62, %v8183_v12 }
 0xe88   :  { %v6612_v15 = vpack.c.bf16 %v8201_v14, %v8197_v13  ;;  %v8212_v9 = vadd.f32 %v8183_v12, %v2896_v47 }
 0xe89   :  { %v6758_v36 = vpop.eup %6757 }
 0xe8a   :  { %v3062_v37 = vsel %vm605_vm5, %v6758_v36, 0.0  ;;  %v6615_v60 = vpack.c.bf16 %v8212_v9, %v8207_v34 }
 0xe8b   :  { %3063 = vadd.xlane.f32.xlu1 %v3062_v37 }
 0xe8d   :  { %v6760_v10 = vpop.eup %6759 }
 0xe8e   :  { %v3065_v45 = vsel %vm605_vm5, %v6760_v10, 0.0 }
 0xe8f   :  { %3066 = vadd.xlane.f32.xlu0 %v3065_v45 }
 0xe91   :  { %v6762_v31 = vpop.eup %6761 }
 0xe92   :  { %v3068_v1 = vsel %vm605_vm5, %v6762_v31, 0.0 }
 0xe93   :  { %3069 = vadd.xlane.f32.xlu1 %v3068_v1 }
 0xf10   :  { %v3058_v50 = vpop.xlane.xlu1 %3057 }
 0xf11   :  { %6763 = vrcp.f32 %v3058_v50 }
 0xf14   :  { %v3061_v46 = vpop.xlane.xlu0 %3060 }
 0xf15   :  { %6765 = vrcp.f32 %v3061_v46 }
 0xf18   :  { %v3064_v16 = vpop.xlane.xlu1 %3063 }
 0xf19   :  { %6767 = vrcp.f32 %v3064_v16 }
 0xf1b   :  { %v6764_v3 = vpop.eup %6763 }
 0xf1c   :  { %v3076_v2 = vmul.f32 %v6764_v3, %v6754_v21  ;;  %v3067_v52 = vpop.xlane.xlu0 %3066 }
 0xf1d   :  { %6769 = vrcp.f32 %v3067_v52 }
 0xf1e   :  { %6160 = vmatmul.mubr.msk.f32.vlgmr.msra.gmra.mrb[110].mxu0 %vm605_vm5, %v3076_v2 }
 0xf1f   :  { %v6766_v6 = vpop.eup %6765  ;;  %6606 = vmatpush3.bf16.xpose.msk.msra.mxu0 %vm7035_vm3, %v6604_v39  ;;  %6162 = vmatprep.mubr.msk.f32.mxu0 %vm6854_vm1, %v6855_v23 }
 0xf20   :  { %v3070_v43 = vpop.xlane.xlu1 %3069  ;;  %v3077_v53 = vmul.f32 %v6766_v6, %v6756_v18  ;;  %6607 = vmatprep.subr.bf16.mxu0 %v6853_v20 }
 0xf21   :  { %6771 = vrcp.f32 %v3070_v43 }
 0xf22   :  { %6163 = vmatmul.mubr.msk.f32.gmra.mrb[112].mxu0 %vm605_vm5, %v3077_v53 }
 0xf23   :  { %v6768_v8 = vpop.eup %6767  ;;  %6165 = vmatprep.mubr.msk.f32.mxu0 %vm6854_vm1, %v6855_v23 }
 0xf24   :  { %v3078_v17 = vmul.f32 %v6768_v8, %v6758_v36 }
 0xf26   :  { %6166 = vmatmul.mubr.msk.f32.gmra.mrb[114].mxu0 %vm605_vm5, %v3078_v17 }
 0xf27   :  { %v6770_v48 = vpop.eup %6769  ;;  %6610 = vmatpush3.bf16.xpose.msk.msra.mxu0 %vm7035_vm3, %v6608_v63  ;;  %6168 = vmatprep.mubr.msk.f32.mxu0 %vm6854_vm1, %v6855_v23  ;;  %v8280_v63 = vadd.f32 %v8176_v25, %v8082_v54 }
 0xf28   :  { %v3079_v44 = vmul.f32 %v6770_v48, %v6760_v10  ;;  %6199 = vmatprep.subr.mxu0 %v6855_v23 }
 0xf2a   :  { %6169 = vmatmul.mubr.msk.f32.gmra.mrb[116].mxu0 %vm605_vm5, %v3079_v44 }
 0xf2b   :  { %v6772_v39 = vpop.eup %6771  ;;  %6171 = vmatprep.mubr.msk.f32.mxu0 %vm6854_vm1, %v6855_v23 }
 0xf2c   :  { %v3080_v19 = vmul.f32 %v6772_v39, %v6762_v31 }
 0xf2e   :  { %6172 = vmatmul.mubr.msk.f32.gmra.mrb[118].mxu0 %vm605_vm5, %v3080_v19 }
 0xf2f   :  { %6200 = vmatpush3.xpose.msk.msra.mxu0 %vm484_vm2, %v8077_v0  ;;  %6201 = vmatprep.mubr.msk.f32.mxu0 %vm6854_vm1, %v6855_v23  ;;  %v8272_v0 = vadd.f32 %v8082_v54, %v8178_v5 }
 0xf30   :  { %6241 = vmatprep.subr.mxu0 %v6855_v23 }
 0xf32   :  { %6202 = vmatmul.mubr.msk.f32.vlgmr.msra.gmra.mrb[120].mxu0 %vm484_vm2, %v8247_v26 }
 0xf33   :  { %6204 = vmatprep.mubr.msk.f32.mxu0 %vm6854_vm1, %v6855_v23  ;;  %6242 = vmatpush3.msra.mxu0 %v2905_v24 }
 0xf36   :  { %6205 = vmatmul.mubr.msk.f32.gmra.mrb[122].mxu0 %vm484_vm2, %v8256_v51 }
 0xf37   :  { %6207 = vmatprep.mubr.msk.f32.mxu0 %vm6854_vm1, %v6855_v23 }
 0xf3a   :  { %6208 = vmatmul.mubr.msk.f32.gmra.mrb[124].mxu0 %vm484_vm2, %v8264_v38 }
 0xf3b   :  { %6210 = vmatprep.mubr.msk.f32.mxu0 %vm6854_vm1, %v6855_v23 }
 0xf3e   :  { %6211 = vmatmul.mubr.msk.f32.gmra.mrb[126].mxu0 %vm484_vm2, %v8272_v0 }
 0xf3f   :  { %6213 = vmatprep.mubr.msk.f32.mxu0 %vm6854_vm1, %v6855_v23 }
 0xf42   :  { %6214 = vmatmul.mubr.msk.f32.gmra.mrb[128].mxu0 %vm484_vm2, %v8280_v63 }
 0xf43   :  { %6243 = vmatprep.mubr.msk.f32.mxu0 %vm6854_vm1, %v6855_v23 }
 0xff1   :  { %v3162_v4 = vpop.f32.mrb[110].mxu0 }
 0xff2   :  { %v3186_v5 = vadd.f32 %v3162_v4, %v8089_v49  ;;  %v6161_v21 = vpop.f32.mrb[111].mxu0 }
 0xff4   :  { %v3191_v54 = vsel %vm52_vm6, %v3186_v5, %v3162_v4 }
 0xff5   :  { %v3167_v25 = vpop.f32.mrb[112].mxu0  ;;  %6177 = vmatmul.mubr.msk.f32.vlgmr.msra.gmra.mrb[110].mxu1 %vm484_vm2, %v3191_v54 }
 0xff6   :  { %v3187_v22 = vadd.f32 %v3167_v25, %v8099_v28  ;;  %6613 = vmatpush3.bf16.msra.mxu1 %v6612_v15  ;;  %v6164_v59 = vpop.f32.mrb[113].mxu0  ;;  %6179 = vmatprep.mubr.msk.f32.mxu1 %vm6854_vm1, %v6855_v23 }
 0xff7   :  { %6614 = vmatprep.subr.bf16.mxu1 %v6853_v20 }
 0xff9   :  { %v3172_v49 = vpop.f32.mrb[114].mxu0  ;;  %6180 = vmatmul.mubr.msk.f32.gmra.mrb[112].mxu1 %vm484_vm2, %v3187_v22 }
 0xffa   :  { %v3188_v11 = vadd.f32 %v3172_v49, %v8103_v55  ;;  %6616 = vmatpush3.bf16.msra.mxu1 %v6615_v60  ;;  %v6167_v28 = vpop.f32.mrb[115].mxu0  ;;  %6182 = vmatprep.mubr.msk.f32.mxu1 %vm6854_vm1, %v6855_v23 }
 0xffb   :  { %6224 = vmatprep.subr.mxu1 %v6855_v23  ;;  %v3196_v28 = vld [vmem:[%s8955_s9] sm:$0xff] }
 0xffd   :  { %v3177_v18 = vpop.f32.mrb[116].mxu0  ;;  %6183 = vmatmul.mubr.msk.f32.gmra.mrb[114].mxu1 %vm484_vm2, %v3188_v11 }
 0xffe   :  { %v3189_v27 = vadd.f32 %v3177_v18, %v8115_v32  ;;  %6225 = vmatpush3.msra.mxu1 %v2902_v30  ;;  %v6170_v55 = vpop.f32.mrb[117].mxu0  ;;  %6185 = vmatprep.mubr.msk.f32.mxu1 %vm6854_vm1, %v6855_v23 }
 0xfff   :  { %v3197_v55 = vld [vmem:[%s8955_s9 + $0x8] sm:$0xff] }
0x1001   :  { %v3182_v57 = vpop.f32.mrb[118].mxu0  ;;  %6186 = vmatmul.mubr.msk.f32.gmra.mrb[116].mxu1 %vm484_vm2, %v3189_v27 }
0x1002   :  { %v3190_v36 = vadd.f32 %v3182_v57, %v8119_v56  ;;  %v6173_v37 = vpop.f32.mrb[119].mxu0  ;;  %6188 = vmatprep.mubr.msk.f32.mxu1 %vm6854_vm1, %v6855_v23 }
0x1005   :  { %6189 = vmatmul.mubr.msk.f32.gmra.mrb[118].mxu1 %vm484_vm2, %v3190_v36  ;;  %v3412_v12 = vpop.f32.mrb[120].mxu0 }
0x1006   :  { %v3413_v10 = vadd.f32 %v3412_v12, %v7144_v7  ;;  %v6203_v32 = vpop.f32.mrb[121].mxu0  ;;  %6226 = vmatprep.mubr.msk.f32.mxu1 %vm6854_vm1, %v6855_v23  ;;  %v3198_v12 = vld [vmem:[%s8955_s9 + $0x10] sm:$0xff] }
0x1008   :  { %v3436_v45 = vsel %vm605_vm5, %v3413_v10, -inf }
0x1009   :  { %3437 = vmax.xlane.f32.xlu0 %v3436_v45  ;;  %v3417_v31 = vpop.f32.mrb[122].mxu0 }
0x100a   :  { %v3418_v1 = vadd.f32 %v3417_v31, %v7144_v7  ;;  %v6206_v56 = vpop.f32.mrb[123].mxu0  ;;  %v3199_v31 = vld [vmem:[%s8955_s9 + $0x18] sm:$0xff] }
0x100c   :  { %v3439_v58 = vsel %vm605_vm5, %v3418_v1, -inf }
0x100d   :  { %3440 = vmax.xlane.f32.xlu1 %v3439_v58  ;;  %v3422_v33 = vpop.f32.mrb[124].mxu0 }
0x100e   :  { %v3423_v35 = vadd.f32 %v3422_v33, %v7144_v7  ;;  %v6209_v42 = vpop.f32.mrb[125].mxu0  ;;  %v3200_v33 = vld [vmem:[%s8955_s9 + $0x20] sm:$0xff] }
0x1010   :  { %v3442_v13 = vsel %vm605_vm5, %v3423_v35, -inf }
0x1011   :  { %3443 = vmax.xlane.f32.xlu0 %v3442_v13  ;;  %v3427_v61 = vpop.f32.mrb[126].mxu0 }
0x1012   :  { %v3428_v14 = vadd.f32 %v3427_v61, %v7144_v7  ;;  %v6212_v15 = vpop.f32.mrb[127].mxu0 }
0x1014   :  { %v3445_v34 = vsel %vm605_vm5, %v3428_v14, -inf }
0x1015   :  { %3446 = vmax.xlane.f32.xlu1 %v3445_v34  ;;  %v3432_v62 = vpop.f32.mrb[128].mxu0 }
0x1016   :  { %v3433_v47 = vadd.f32 %v3432_v62, %v7144_v7  ;;  %v6215_v9 = vpop.f32.mrb[129].mxu0 }
0x1018   :  { %v3448_v60 = vsel %vm605_vm5, %v3433_v47, -inf }
0x1019   :  { %3449 = vmax.xlane.f32.xlu0 %v3448_v60 }
0x1096   :  { %v3438_v50 = vpop.xlane.xlu0 %3437 }
0x1097   :  { %v3451_v46 = vsub.f32 %v3413_v10, %v3438_v50 }
0x1099   :  { %v3456_v16 = vmul.f32 1.442695, %v3451_v46 }
0x109a   :  { %v3441_v3 = vpop.xlane.xlu1 %3440 }
0x109b   :  { %6773 = vpow2.f32 %v3456_v16  ;;  %v3452_v2 = vsub.f32 %v3418_v1, %v3441_v3 }
0x109d   :  { %v3458_v52 = vmul.f32 1.442695, %v3452_v2 }
0x109e   :  { %v3444_v6 = vpop.xlane.xlu0 %3443 }
0x109f   :  { %6775 = vpow2.f32 %v3458_v52  ;;  %v3453_v43 = vsub.f32 %v3423_v35, %v3444_v6 }
0x10a1   :  { %v3460_v53 = vmul.f32 1.442695, %v3453_v43  ;;  %v5201_v43 = vld [vmem:[%s8946_s3 + $0x60] sm:$0xff] }
0x10a2   :  { %v3447_v8 = vpop.xlane.xlu1 %3446 }
0x10a3   :  { %6777 = vpow2.f32 %v3460_v53  ;;  %v3454_v17 = vsub.f32 %v3428_v14, %v3447_v8  ;;  %v5202_v53 = vld [vmem:[%s8946_s3 + $0x68] sm:$0xff] }
0x10a4   :  { %v6625_v8 = vpack.c.bf16 %v5202_v53, %v5201_v43  ;;  %v3610_v53 = vld [vmem:[%s8955_s9 + $0x48] sm:$0xff] }
0x10a5   :  { %v6774_v48 = vpop.eup %6773  ;;  %v3462_v44 = vmul.f32 1.442695, %v3454_v17  ;;  %v5185_v17 = vld [vmem:[%s8948_s1 + $0x60] sm:$0xff] }
0x10a6   :  { %v3450_v39 = vpop.xlane.xlu0 %3449  ;;  %v3466_v19 = vsel %vm605_vm5, %v6774_v48, 0.0  ;;  %6626 = vmatprep.subr.bf16.mxu0 %v6625_v8 }
0x10a7   :  { %6779 = vpow2.f32 %v3462_v44  ;;  %v3455_v24 = vsub.f32 %v3433_v47, %v3450_v39  ;;  %3467 = vadd.xlane.f32.xlu1 %v3466_v19  ;;  %v5187_v39 = vld [vmem:[%s8948_s1 + $0x70] sm:$0xff]  ;;  %v5188_v19 = vld [vmem:[%s8948_s1 + $0x78] sm:$0xff] }
0x10a9   :  { %v6776_v4 = vpop.eup %6775  ;;  %v3464_v5 = vmul.f32 1.442695, %v3455_v24  ;;  %v6621_v24 = vpack.c.bf16 %v5188_v19, %v5187_v39 }
0x10aa   :  { %v3469_v21 = vsel %vm605_vm5, %v6776_v4, 0.0 }
0x10ab   :  { %6781 = vpow2.f32 %v3464_v5  ;;  %3470 = vadd.xlane.f32.xlu0 %v3469_v21  ;;  %v8415_v5 = vld [vmem:[%s8947_s0 + $0x10] sm:$0xff]  ;;  %v8422_v21 = vld [vmem:[%s8947_s0 + $0x18] sm:$0xff] }
0x10ad   :  { %v6778_v54 = vpop.eup %6777 }
0x10ae   :  { %v3472_v25 = vsel %vm605_vm5, %v6778_v54, 0.0 }
0x10af   :  { %3473 = vadd.xlane.f32.xlu1 %v3472_v25  ;;  %v8436_v25 = vld [vmem:[%s8947_s0 + $0x28] sm:$0xff] }
0x10b1   :  { %v6780_v22 = vpop.eup %6779 }
0x10b2   :  { %v3475_v59 = vsel %vm605_vm5, %v6780_v22, 0.0 }
0x10b3   :  { %3476 = vadd.xlane.f32.xlu0 %v3475_v59  ;;  %v8450_v59 = vld [vmem:[%s8947_s0 + $0x38] sm:$0xff] }
0x10b5   :  { %v6782_v49 = vpop.eup %6781 }
0x10b6   :  { %v3478_v11 = vsel %vm605_vm5, %v6782_v49, 0.0 }
0x10b7   :  { %3479 = vadd.xlane.f32.xlu1 %v3478_v11  ;;  %v8464_v11 = vld [vmem:[%s8947_s0 + $0x48] sm:$0xff] }
0x10c8   :  { %v3282_v30 = vpop.f32.mrb[110].mxu1 }
0x10c9   :  { %v3306_v18 = vadd.f32 %v3282_v30, %v3196_v28  ;;  %v6178_v27 = vpop.f32.mrb[111].mxu1  ;;  %v5203_v28 = vld [vmem:[%s8946_s3 + $0x70] sm:$0xff]  ;;  %v5204_v30 = vld [vmem:[%s8946_s3 + $0x78] sm:$0xff] }
0x10cb   :  { %3311 = vst.msk [vmem:[%s8955_s9] sm:$0xff] %vm64_vm0, %v3306_v18 }
0x10cc   :  { %v3287_v57 = vpop.f32.mrb[112].mxu1 }
0x10cd   :  { %v3307_v36 = vadd.f32 %v3287_v57, %v3197_v55  ;;  %v6181_v37 = vpop.f32.mrb[113].mxu1  ;;  %v6629_v57 = vpack.c.bf16 %v5204_v30, %v5203_v28 }
0x10cf   :  { %3312 = vst.msk [vmem:[%s8955_s9 + $0x8] sm:$0xff] %vm64_vm0, %v3307_v36 }
0x10d0   :  { %v3292_v10 = vpop.f32.mrb[114].mxu1 }
0x10d1   :  { %v3308_v32 = vadd.f32 %v3292_v10, %v3198_v12  ;;  %v6184_v45 = vpop.f32.mrb[115].mxu1 }
0x10d3   :  { %3313 = vst.msk [vmem:[%s8955_s9 + $0x10] sm:$0xff] %vm64_vm0, %v3308_v32 }
0x10d4   :  { %v3297_v1 = vpop.f32.mrb[116].mxu1 }
0x10d5   :  { %v3309_v56 = vadd.f32 %v3297_v1, %v3199_v31  ;;  %v6187_v58 = vpop.f32.mrb[117].mxu1 }
0x10d6   :  { %v6852_v58 = vld [vmem:[%s8947_s0] sm:$0xff] }
0x10d7   :  { %3314 = vst.msk [vmem:[%s8955_s9 + $0x18] sm:$0xff] %vm64_vm0, %v3309_v56 }
0x10d8   :  { %v3302_v35 = vpop.f32.mrb[118].mxu1 }
0x10d9   :  { %v3310_v42 = vadd.f32 %v3302_v35, %v3200_v33  ;;  %v6190_v13 = vpop.f32.mrb[119].mxu1 }
0x10db   :  { %3315 = vst.msk [vmem:[%s8955_s9 + $0x20] sm:$0xff] %vm64_vm0, %v3310_v42 }
0x1134   :  { %v3468_v61 = vpop.xlane.xlu1 %3467 }
0x1135   :  { %6783 = vrcp.f32 %v3468_v61  ;;  %v3606_v61 = vld [vmem:[%s8955_s9 + $0x28] sm:$0xff] }
0x1138   :  { %v3471_v14 = vpop.xlane.xlu0 %3470 }
0x1139   :  { %6785 = vrcp.f32 %v3471_v14 }
0x113c   :  { %v3474_v15 = vpop.xlane.xlu1 %3473 }
0x113d   :  { %6787 = vrcp.f32 %v3474_v15 }
0x113f   :  { %v6784_v34 = vpop.eup %6783 }
0x1140   :  { %v3486_v62 = vmul.f32 %v6784_v34, %v6774_v48  ;;  %v3477_v47 = vpop.xlane.xlu0 %3476  ;;  %v5186_v48 = vld [vmem:[%s8948_s1 + $0x68] sm:$0xff] }
0x1141   :  { %6789 = vrcp.f32 %v3477_v47  ;;  %v6617_v44 = vpack.c.bf16 %v5186_v48, %v5185_v17 }
0x1142   :  { %6227 = vmatmul.mubr.msk.f32.vlgmr.msra.gmra.mrb[120].mxu1 %vm605_vm5, %v3486_v62  ;;  %v3607_v62 = vld [vmem:[%s8955_s9 + $0x30] sm:$0xff] }
0x1143   :  { %v6786_v9 = vpop.eup %6785  ;;  %6229 = vmatprep.mubr.msk.f32.mxu1 %vm6854_vm1, %v6855_v23  ;;  %6618 = vmatprep.subr.bf16.mxu1 %v6617_v44 }
0x1144   :  { %v3480_v60 = vpop.xlane.xlu1 %3479  ;;  %v3487_v50 = vmul.f32 %v6786_v9, %v6776_v4  ;;  %6620 = vmatpush3.bf16.msra.mxu1 %v6617_v44  ;;  %v8408_v4 = vld [vmem:[%s8947_s0 + $0x8] sm:$0xff]  ;;  %v5206_v44 = vld [vmem:[%s8949_s4 + $0x3] ss:$0 sm:$0xff] }
0x1145   :  { %6791 = vrcp.f32 %v3480_v60  ;;  %6622 = vmatprep.subr.bf16.mxu1 %v6621_v24 }
0x1146   :  { %6230 = vmatmul.mubr.msk.f32.gmra.mrb[122].mxu1 %vm605_vm5, %v3487_v50  ;;  %v3608_v50 = vld [vmem:[%s8955_s9 + $0x38] sm:$0xff] }
0x1147   :  { %v6788_v46 = vpop.eup %6787  ;;  %6232 = vmatprep.mubr.msk.f32.mxu1 %vm6854_vm1, %v6855_v23 }
0x1148   :  { %v3488_v16 = vmul.f32 %v6788_v46, %v6778_v54  ;;  %6624 = vmatpush3.bf16.msra.mxu1 %v6621_v24  ;;  %v8429_v54 = vld [vmem:[%s8947_s0 + $0x20] sm:$0xff] }
0x114a   :  { %6233 = vmatmul.mubr.msk.f32.gmra.mrb[124].mxu1 %vm605_vm5, %v3488_v16 }
0x114b   :  { %v6790_v3 = vpop.eup %6789  ;;  %6235 = vmatprep.mubr.msk.f32.mxu1 %vm6854_vm1, %v6855_v23 }
0x114c   :  { %v3489_v2 = vmul.f32 %v6790_v3, %v6780_v22  ;;  %v8443_v22 = vld [vmem:[%s8947_s0 + $0x30] sm:$0xff] }
0x114e   :  { %6236 = vmatmul.mubr.msk.f32.gmra.mrb[126].mxu1 %vm605_vm5, %v3489_v2  ;;  %v3609_v2 = vld [vmem:[%s8955_s9 + $0x40] sm:$0xff] }
0x114f   :  { %v6792_v52 = vpop.eup %6791  ;;  %6238 = vmatprep.mubr.msk.f32.mxu1 %vm6854_vm1, %v6855_v23 }
0x1150   :  { %v3490_v6 = vmul.f32 %v6792_v52, %v6782_v49  ;;  %v8457_v49 = vld [vmem:[%s8947_s0 + $0x40] sm:$0xff] }
0x1152   :  { %6239 = vmatmul.mubr.msk.f32.gmra.mrb[128].mxu1 %vm605_vm5, %v3490_v6 }
0x1153   :  { %6266 = vmatprep.mubr.msk.f32.mxu1 %vm64_vm0, %v7924_v40 }
0x1156   :  { %6267 = vmatmul.mubr.msk.f32.vlgmr.msra.gmra.mrb[130].mxu1 %vm64_vm0, %v8408_v4 }
0x1157   :  { %6269 = vmatprep.mubr.msk.f32.mxu1 %vm64_vm0, %v8415_v5 }
0x115a   :  { %6270 = vmatmul.mubr.msk.f32.gmra.mrb[132].mxu1 %vm64_vm0, %v8422_v21 }
0x115b   :  { %6272 = vmatprep.mubr.msk.f32.mxu1 %vm64_vm0, %v8429_v54 }
0x115e   :  { %6273 = vmatmul.mubr.msk.f32.gmra.mrb[134].mxu1 %vm64_vm0, %v8436_v25 }
0x115f   :  { %6275 = vmatprep.mubr.msk.f32.mxu1 %vm64_vm0, %v8443_v22 }
0x1162   :  { %6276 = vmatmul.mubr.msk.f32.gmra.mrb[136].mxu1 %vm64_vm0, %v8450_v59 }
0x1163   :  { %6278 = vmatprep.mubr.msk.f32.mxu1 %vm64_vm0, %v8457_v49 }
0x1166   :  { %6279 = vmatmul.mubr.msk.f32.gmra.mrb[138].mxu1 %vm64_vm0, %v8464_v11 }
0x1167   :  { %6312 = vmatprep.mubr.msk.f32.mxu1 %vm64_vm0, %v7924_v40 }
0x1215   :  { %v3572_v18 = vpop.f32.mrb[120].mxu1 }
0x1216   :  { %v3596_v27 = vadd.f32 %v3572_v18, %v8247_v26  ;;  %v6228_v55 = vpop.f32.mrb[121].mxu1 }
0x1218   :  { %v3601_v36 = vsel %vm52_vm6, %v3596_v27, %v3572_v18 }
0x1219   :  { %v3577_v37 = vpop.f32.mrb[122].mxu1  ;;  %6244 = vmatmul.mubr.msk.f32.vlgmr.msra.gmra.mrb[130].mxu0 %vm484_vm2, %v3601_v36 }
0x121a   :  { %v3597_v40 = vadd.f32 %v3577_v37, %v8256_v51  ;;  %v6231_v12 = vpop.f32.mrb[123].mxu1  ;;  %6246 = vmatprep.mubr.msk.f32.mxu0 %vm6854_vm1, %v6855_v23  ;;  %6628 = vmatpush3.bf16.msra.mxu0 %v6625_v8 }
0x121b   :  { %6630 = vmatprep.subr.bf16.mxu0 %v6629_v57 }
0x121d   :  { %v3582_v10 = vpop.f32.mrb[124].mxu1  ;;  %6247 = vmatmul.mubr.msk.f32.gmra.mrb[132].mxu0 %vm484_vm2, %v3597_v40 }
0x121e   :  { %v3598_v26 = vadd.f32 %v3582_v10, %v8264_v38  ;;  %v6234_v32 = vpop.f32.mrb[125].mxu1  ;;  %6249 = vmatprep.mubr.msk.f32.mxu0 %vm6854_vm1, %v6855_v23  ;;  %6632 = vmatpush3.bf16.msra.mxu0 %v6629_v57 }
0x121f   :  { %6641 = vmatprep.subr.bf16.mxu0 %v6853_v20 }
0x1221   :  { %v3587_v45 = vpop.f32.mrb[126].mxu1  ;;  %6250 = vmatmul.mubr.msk.f32.gmra.mrb[134].mxu0 %vm484_vm2, %v3598_v26 }
0x1222   :  { %v3599_v51 = vadd.f32 %v3587_v45, %v8272_v0  ;;  %v6237_v31 = vpop.f32.mrb[127].mxu1  ;;  %6252 = vmatprep.mubr.msk.f32.mxu0 %vm6854_vm1, %v6855_v23 }
0x1225   :  { %v3592_v1 = vpop.f32.mrb[128].mxu1  ;;  %6253 = vmatmul.mubr.msk.f32.gmra.mrb[136].mxu0 %vm484_vm2, %v3599_v51 }
0x1226   :  { %v3600_v38 = vadd.f32 %v3592_v1, %v8280_v63  ;;  %v6240_v56 = vpop.f32.mrb[129].mxu1  ;;  %6255 = vmatprep.mubr.msk.f32.mxu0 %vm6854_vm1, %v6855_v23 }
0x1229   :  { %6256 = vmatmul.mubr.msk.f32.gmra.mrb[138].mxu0 %vm484_vm2, %v3600_v38  ;;  %v8521_v0 = vpop.f32.mrb[130].mxu1 }
0x122a   :  { %6289 = vmatprep.mubr.msk.f32.mxu0 %vm64_vm0, %v6852_v58  ;;  %v3805_v63 = vpop.f32.mrb[131].mxu1  ;;  %v8588_v58 = vld [vmem:[%s8950_s2 + $0x3] ss:$0 sm:$0xff] }
0x122d   :  { %6290 = vmatmul.mubr.msk.f32.vlgmr.msra.gmra.mrb[140].mxu0 %vm64_vm0, %v8408_v4  ;;  %v8523_v33 = vpop.f32.mrb[132].mxu1 }
0x122e   :  { %6292 = vmatprep.mubr.msk.f32.mxu0 %vm64_vm0, %v8415_v5  ;;  %v8525_v35 = vpop.f32.mrb[133].mxu1 }
0x1231   :  { %6293 = vmatmul.mubr.msk.f32.gmra.mrb[142].mxu0 %vm64_vm0, %v8422_v21  ;;  %v8527_v42 = vpop.f32.mrb[134].mxu1 }
0x1232   :  { %6295 = vmatprep.mubr.msk.f32.mxu0 %vm64_vm0, %v8429_v54  ;;  %v8529_v13 = vpop.f32.mrb[135].mxu1  ;;  %v8753_v29 = vadd.f32 %v8527_v42, %v8588_v58 }
0x1235   :  { %6296 = vmatmul.mubr.msk.f32.gmra.mrb[144].mxu0 %vm64_vm0, %v8436_v25 }
0x1236   :  { %6298 = vmatprep.mubr.msk.f32.mxu0 %vm64_vm0, %v8443_v22 }
0x1239   :  { %6299 = vmatmul.mubr.msk.f32.gmra.mrb[146].mxu0 %vm64_vm0, %v8450_v59 }
0x123a   :  { %6301 = vmatprep.mubr.msk.f32.mxu0 %vm64_vm0, %v8457_v49 }
0x123d   :  { %6302 = vmatmul.mubr.msk.f32.gmra.mrb[148].mxu0 %vm64_vm0, %v8464_v11 }
0x123e   :  { %6337 = vmatprep.mubr.msk.f32.mxu0 %vm6854_vm1, %v6855_v23 }
0x12ec   :  { %v3692_v14 = vpop.f32.mrb[130].mxu0 }
0x12ed   :  { %v3716_v15 = vadd.f32 %v3692_v14, %v3606_v61  ;;  %v6245_v34 = vpop.f32.mrb[131].mxu0 }
0x12ee   :  { %v8605_v34 = vadd.f32 %v8521_v0, %v8588_v58  ;;  %v8621_v0 = vadd.f32 %v8523_v33, %v8588_v58  ;;  %v5217_v33 = vld [vmem:[%s8951_s5 + $0x60] sm:$0xff] }
0x12ef   :  { %3721 = vst.msk [vmem:[%s8955_s9 + $0x28] sm:$0xff] %vm64_vm0, %v3716_v15  ;;  %v8595_v15 = vadd.f32 %v8588_v58, %v3805_v63  ;;  %v8611_v63 = vadd.f32 %v8588_v58, %v8525_v35  ;;  %v8627_v35 = vadd.f32 %v8588_v58, %v8529_v13  ;;  %v5219_v13 = vld [vmem:[%s8951_s5 + $0x70] sm:$0xff] }
0x12f0   :  { %v3697_v47 = vpop.f32.mrb[132].mxu0 }
0x12f1   :  { %v3717_v9 = vadd.f32 %v3697_v47, %v3607_v62  ;;  %v6248_v60 = vpop.f32.mrb[133].mxu0  ;;  %v5218_v62 = vld [vmem:[%s8951_s5 + $0x68] sm:$0xff] }
0x12f2   :  { %v6633_v47 = vpack.c.bf16 %v5218_v62, %v5217_v33 }
0x12f3   :  { %3722 = vst.msk [vmem:[%s8955_s9 + $0x30] sm:$0xff] %vm64_vm0, %v3717_v9  ;;  %v5220_v9 = vld [vmem:[%s8951_s5 + $0x78] sm:$0xff] }
0x12f4   :  { %v3702_v46 = vpop.f32.mrb[134].mxu0  ;;  %v6637_v60 = vpack.c.bf16 %v5220_v9, %v5219_v13  ;;  %6634 = vmatprep.subr.bf16.mxu1 %v6633_v47 }
0x12f5   :  { %v3718_v16 = vadd.f32 %v3702_v46, %v3608_v50  ;;  %v6251_v3 = vpop.f32.mrb[135].mxu0  ;;  %6636 = vmatpush3.bf16.msra.mxu1 %v6633_v47 }
0x12f6   :  { %6638 = vmatprep.subr.bf16.mxu1 %v6637_v60 }
0x12f7   :  { %3723 = vst.msk [vmem:[%s8955_s9 + $0x38] sm:$0xff] %vm64_vm0, %v3718_v16 }
0x12f8   :  { %v3707_v52 = vpop.f32.mrb[136].mxu0 }
0x12f9   :  { %v3719_v6 = vadd.f32 %v3707_v52, %v3609_v2  ;;  %v6254_v43 = vpop.f32.mrb[137].mxu0  ;;  %6640 = vmatpush3.bf16.msra.mxu1 %v6637_v60 }
0x12fa   :  { %6649 = vmatprep.subr.bf16.mxu1 %v6853_v20 }
0x12fb   :  { %3724 = vst.msk [vmem:[%s8955_s9 + $0x40] sm:$0xff] %vm64_vm0, %v3719_v6 }
0x12fc   :  { %v3712_v8 = vpop.f32.mrb[138].mxu0  ;;  %6313 = vmatmul.mubr.msk.f32.vlgmr.msra.gmra.mrb[140].mxu1 %vm64_vm0, %v8408_v4 }
0x12fd   :  { %v3720_v17 = vadd.f32 %v3712_v8, %v3610_v53  ;;  %v6257_v48 = vpop.f32.mrb[139].mxu0  ;;  %6315 = vmatprep.mubr.msk.f32.mxu1 %vm64_vm0, %v8415_v5 }
0x12fe   :  { %v8678_v48 = vpop.f32.mrb[136].mxu1 }
0x12ff   :  { %3725 = vst.msk [vmem:[%s8955_s9 + $0x48] sm:$0xff] %vm64_vm0, %v3720_v17  ;;  %v8770_v42 = vadd.f32 %v8678_v48, %v8588_v58 }
0x1300   :  { %v6291_v39 = vpop.f32.mrb[140].mxu0  ;;  %6316 = vmatmul.mubr.msk.f32.gmra.mrb[142].mxu1 %vm64_vm0, %v8422_v21 }
0x1301   :  { %v3939_v19 = vadd.f32 %v6291_v39, %v5206_v44  ;;  %v3933_v24 = vpop.f32.mrb[141].mxu0  ;;  %6318 = vmatprep.mubr.msk.f32.mxu1 %vm64_vm0, %v8429_v54 }
0x1302   :  { %v3934_v28 = vadd.f32 %v5206_v44, %v3933_v24  ;;  %v8689_v24 = vld [vmem:[%s8952_s6 + $0x3] ss:$0 sm:$0xff] }
0x1304   :  { %v6642_v30 = vpack.c.bf16 %v3939_v19, %v3934_v28  ;;  %v6294_v18 = vpop.f32.mrb[142].mxu0  ;;  %6319 = vmatmul.mubr.msk.f32.gmra.mrb[144].mxu1 %vm64_vm0, %v8436_v25 }
0x1305   :  { %v3949_v27 = vadd.f32 %v6294_v18, %v5206_v44  ;;  %v3943_v55 = vpop.f32.mrb[143].mxu0  ;;  %6321 = vmatprep.mubr.msk.f32.mxu1 %vm64_vm0, %v8443_v22 }
0x1306   :  { %6644 = vmatpush3.bf16.xpose.msk.msra.mxu0 %vm7035_vm3, %v6642_v30  ;;  %v3944_v57 = vadd.f32 %v5206_v44, %v3943_v55 }
0x1307   :  { %6645 = vmatprep.subr.bf16.mxu0 %v6853_v20 }
0x1308   :  { %v6646_v36 = vpack.c.bf16 %v3949_v27, %v3944_v57  ;;  %v6297_v37 = vpop.f32.mrb[144].mxu0  ;;  %6322 = vmatmul.mubr.msk.f32.gmra.mrb[146].mxu1 %vm64_vm0, %v8450_v59 }
0x1309   :  { %v8572_v40 = vadd.f32 %v6297_v37, %v5206_v44  ;;  %v3953_v12 = vpop.f32.mrb[145].mxu0  ;;  %6324 = vmatprep.mubr.msk.f32.mxu1 %vm64_vm0, %v8457_v49 }
0x130a   :  { %v3954_v56 = vadd.f32 %v5206_v44, %v3953_v12 }
0x130c   :  { %v6300_v10 = vpop.f32.mrb[146].mxu0  ;;  %6325 = vmatmul.mubr.msk.f32.gmra.mrb[148].mxu1 %vm64_vm0, %v8464_v11 }
0x130d   :  { %v8574_v26 = vadd.f32 %v6300_v10, %v5206_v44  ;;  %v3963_v32 = vpop.f32.mrb[147].mxu0  ;;  %6362 = vmatprep.mubr.msk.f32.mxu1 %vm6854_vm1, %v6855_v23 }
0x130e   :  { %6648 = vmatpush3.bf16.xpose.msk.msra.mxu0 %vm7035_vm3, %v6646_v36  ;;  %v8578_v45 = vadd.f32 %v5206_v44, %v3963_v32 }
0x130f   :  { %6335 = vmatprep.subr.mxu0 %v6855_v23 }
0x1310   :  { %v6656_v51 = vpack.c.bf16 %v8578_v45, %v8572_v40  ;;  %v6303_v31 = vpop.f32.mrb[148].mxu0 }
0x1311   :  { %v8583_v1 = vadd.f32 %v6303_v31, %v5206_v44  ;;  %v3973_v38 = vpop.f32.mrb[149].mxu0 }
0x1312   :  { %v8590_v61 = vadd.f32 %v5206_v44, %v3973_v38  ;;  %v8680_v44 = vpop.f32.mrb[137].mxu1 }
0x1313   :  { %v8682_v39 = vpop.f32.mrb[138].mxu1 }
0x1314   :  { %v6660_v14 = vpack.c.bf16 %v8590_v61, %v8574_v26  ;;  %v8684_v19 = vpop.f32.mrb[139].mxu1  ;;  %v8762_v26 = vadd.f32 %v8588_v58, %v8680_v44  ;;  %v8786_v61 = vadd.f32 %v8682_v39, %v8588_v58 }
0x1316   :  { %6336 = vmatpush3.xpose.msk.msra.mxu0 %vm484_vm2, %v3954_v56 }
0x1317   :  { %6377 = vmatprep.subr.mxu0 %v6855_v23 }
0x1319   :  { %6338 = vmatmul.mubr.msk.f32.vlgmr.msra.gmra.mrb[150].mxu0 %vm484_vm2, %v8595_v15 }
0x131a   :  { %6340 = vmatprep.mubr.msk.f32.mxu0 %vm6854_vm1, %v6855_v23 }
0x131d   :  { %6341 = vmatmul.mubr.msk.f32.gmra.mrb[152].mxu0 %vm484_vm2, %v8605_v34 }
0x131e   :  { %6343 = vmatprep.mubr.msk.f32.mxu0 %vm6854_vm1, %v6855_v23 }
0x1321   :  { %6344 = vmatmul.mubr.msk.f32.gmra.mrb[154].mxu0 %vm484_vm2, %v8611_v63 }
0x1322   :  { %6346 = vmatprep.mubr.msk.f32.mxu0 %vm6854_vm1, %v6855_v23 }
0x1325   :  { %6347 = vmatmul.mubr.msk.f32.gmra.mrb[156].mxu0 %vm484_vm2, %v8621_v0 }
0x1326   :  { %6349 = vmatprep.mubr.msk.f32.mxu0 %vm6854_vm1, %v6855_v23 }
0x1329   :  { %6350 = vmatmul.mubr.msk.f32.gmra.mrb[158].mxu0 %vm484_vm2, %v8627_v35 }
0x132a   :  { %6379 = vmatprep.mubr.msk.f32.mxu0 %vm6854_vm1, %v6855_v23 }
0x13cf   :  { %v6314_v28 = vpop.f32.mrb[140].mxu1 }
0x13d0   :  { %v4067_v30 = vadd.f32 %v6314_v28, %v8689_v24  ;;  %v4061_v18 = vpop.f32.mrb[141].mxu1 }
0x13d1   :  { %v4062_v27 = vadd.f32 %v8689_v24, %v4061_v18 }
0x13d3   :  { %v6650_v55 = vpack.c.bf16 %v4067_v30, %v4062_v27  ;;  %v6317_v57 = vpop.f32.mrb[142].mxu1 }
0x13d4   :  { %v4077_v36 = vadd.f32 %v6317_v57, %v8689_v24  ;;  %v4071_v37 = vpop.f32.mrb[143].mxu1 }
0x13d5   :  { %6651 = vmatpush3.bf16.msra.mxu1 %v6650_v55  ;;  %v4072_v12 = vadd.f32 %v8689_v24, %v4071_v37 }
0x13d6   :  { %6652 = vmatprep.subr.bf16.mxu1 %v6853_v20 }
0x13d7   :  { %v6653_v10 = vpack.c.bf16 %v4077_v36, %v4072_v12 }
0x13d9   :  { %6654 = vmatpush3.bf16.msra.mxu1 %v6653_v10 }
0x13da   :  { %6360 = vmatprep.subr.mxu1 %v6855_v23 }
0x13ec   :  { %v4207_v4 = vpop.f32.mrb[150].mxu0 }
0x13ed   :  { %v4208_v5 = vadd.f32 %v4207_v4, %v7144_v7  ;;  %v6339_v21 = vpop.f32.mrb[151].mxu0 }
0x13ef   :  { %v4231_v54 = vsel %vm605_vm5, %v4208_v5, -inf }
0x13f0   :  { %4232 = vmax.xlane.f32.xlu0 %v4231_v54  ;;  %v4212_v25 = vpop.f32.mrb[152].mxu0 }
0x13f1   :  { %v4213_v22 = vadd.f32 %v4212_v25, %v7144_v7  ;;  %v6342_v59 = vpop.f32.mrb[153].mxu0 }
0x13f3   :  { %v4234_v50 = vsel %vm605_vm5, %v4213_v22, -inf }
0x13f4   :  { %4235 = vmax.xlane.f32.xlu1 %v4234_v50  ;;  %v4217_v49 = vpop.f32.mrb[154].mxu0 }
0x13f5   :  { %v4218_v11 = vadd.f32 %v4217_v49, %v7144_v7  ;;  %v6345_v46 = vpop.f32.mrb[155].mxu0 }
0x13f7   :  { %v4237_v16 = vsel %vm605_vm5, %v4218_v11, -inf }
0x13f8   :  { %4238 = vmax.xlane.f32.xlu0 %v4237_v16  ;;  %v4222_v3 = vpop.f32.mrb[156].mxu0 }
0x13f9   :  { %v4223_v2 = vadd.f32 %v4222_v3, %v7144_v7  ;;  %v6348_v52 = vpop.f32.mrb[157].mxu0 }
0x13fb   :  { %v4240_v6 = vsel %vm605_vm5, %v4223_v2, -inf }
0x13fc   :  { %4241 = vmax.xlane.f32.xlu1 %v4240_v6  ;;  %v4227_v43 = vpop.f32.mrb[158].mxu0  ;;  %v6320_v6 = vpop.f32.mrb[144].mxu1 }
0x13fd   :  { %v4228_v53 = vadd.f32 %v4227_v43, %v7144_v7  ;;  %v6351_v8 = vpop.f32.mrb[159].mxu0  ;;  %v4081_v43 = vpop.f32.mrb[145].mxu1 }
0x13fe   :  { %v4082_v28 = vadd.f32 %v8689_v24, %v4081_v43 }
0x13ff   :  { %v4243_v17 = vsel %vm605_vm5, %v4228_v53, -inf }
0x1400   :  { %4244 = vmax.xlane.f32.xlu0 %v4243_v17  ;;  %v8703_v17 = vadd.f32 %v6320_v6, %v8689_v24  ;;  %6361 = vmatpush3.msra.mxu1 %v4082_v28 }
0x1401   :  { %6655 = vmatprep.subr.bf16.mxu1 %v6853_v20 }
0x147d   :  { %v4233_v32 = vpop.xlane.xlu0 %4232 }
0x147e   :  { %v4246_v31 = vsub.f32 %v4208_v5, %v4233_v32 }
0x1480   :  { %v4251_v38 = vmul.f32 1.442695, %v4246_v31 }
0x1481   :  { %v4236_v56 = vpop.xlane.xlu1 %4235 }
0x1482   :  { %6793 = vpow2.f32 %v4251_v38  ;;  %v4247_v33 = vsub.f32 %v4213_v22, %v4236_v56 }
0x1484   :  { %v4253_v62 = vmul.f32 1.442695, %v4247_v33 }
0x1485   :  { %v4239_v13 = vpop.xlane.xlu0 %4238 }
0x1486   :  { %6795 = vpow2.f32 %v4253_v62  ;;  %v4248_v47 = vsub.f32 %v4218_v11, %v4239_v13 }
0x1488   :  { %v4255_v9 = vmul.f32 1.442695, %v4248_v47 }
0x1489   :  { %v4242_v60 = vpop.xlane.xlu1 %4241 }
0x148a   :  { %6797 = vpow2.f32 %v4255_v9  ;;  %v4249_v4 = vsub.f32 %v4223_v2, %v4242_v60 }
0x148c   :  { %v6794_v21 = vpop.eup %6793  ;;  %v4257_v54 = vmul.f32 1.442695, %v4249_v4 }
0x148d   :  { %v4245_v25 = vpop.xlane.xlu0 %4244  ;;  %v4261_v59 = vsel %vm605_vm5, %v6794_v21, 0.0 }
0x148e   :  { %6799 = vpow2.f32 %v4257_v54  ;;  %v4250_v50 = vsub.f32 %v4228_v53, %v4245_v25  ;;  %4262 = vadd.xlane.f32.xlu1 %v4261_v59  ;;  %v6323_v53 = vpop.f32.mrb[146].mxu1 }
0x148f   :  { %v4091_v8 = vpop.f32.mrb[147].mxu1  ;;  %v8713_v27 = vadd.f32 %v6323_v53, %v8689_v24 }
0x1490   :  { %v6796_v5 = vpop.eup %6795  ;;  %v4259_v49 = vmul.f32 1.442695, %v4250_v50  ;;  %v8707_v30 = vadd.f32 %v8689_v24, %v4091_v8  ;;  %v8715_v55 = vpop.f32.mrb[148].mxu1 }
0x1491   :  { %v4264_v22 = vsel %vm605_vm5, %v6796_v5, 0.0  ;;  %v4101_v57 = vpop.f32.mrb[149].mxu1  ;;  %v4107_v25 = vadd.f32 %v8715_v55, %v8689_v24 }
0x1492   :  { %6801 = vpow2.f32 %v4259_v49  ;;  %4265 = vadd.xlane.f32.xlu0 %v4264_v22  ;;  %v6664_v18 = vpack.c.bf16 %v8707_v30, %v8703_v17  ;;  %v8718_v36 = vadd.f32 %v8689_v24, %v4101_v57 }
0x1494   :  { %v6798_v46 = vpop.eup %6797  ;;  %v6667_v37 = vpack.c.bf16 %v8718_v36, %v8713_v27 }
0x1495   :  { %v4267_v11 = vsel %vm605_vm5, %v6798_v46, 0.0 }
0x1496   :  { %4268 = vadd.xlane.f32.xlu1 %v4267_v11 }
0x1498   :  { %v6800_v16 = vpop.eup %6799 }
0x1499   :  { %v4270_v3 = vsel %vm605_vm5, %v6800_v16, 0.0 }
0x149a   :  { %4271 = vadd.xlane.f32.xlu0 %v4270_v3 }
0x149c   :  { %v6802_v2 = vpop.eup %6801 }
0x149d   :  { %v4273_v52 = vsel %vm605_vm5, %v6802_v2, 0.0 }
0x149e   :  { %4274 = vadd.xlane.f32.xlu1 %v4273_v52 }
0x151b   :  { %v4263_v12 = vpop.xlane.xlu1 %4262 }
0x151c   :  { %6803 = vrcp.f32 %v4263_v12 }
0x151f   :  { %v4266_v10 = vpop.xlane.xlu0 %4265 }
0x1520   :  { %6805 = vrcp.f32 %v4266_v10 }
0x1523   :  { %v4269_v32 = vpop.xlane.xlu1 %4268 }
0x1524   :  { %6807 = vrcp.f32 %v4269_v32 }
0x1526   :  { %v6804_v31 = vpop.eup %6803 }
0x1527   :  { %v4281_v38 = vmul.f32 %v6804_v31, %v6794_v21  ;;  %v4272_v56 = vpop.xlane.xlu0 %4271 }
0x1528   :  { %6809 = vrcp.f32 %v4272_v56 }
0x1529   :  { %6363 = vmatmul.mubr.msk.f32.vlgmr.msra.gmra.mrb[150].mxu1 %vm605_vm5, %v4281_v38 }
0x152a   :  { %v6806_v33 = vpop.eup %6805  ;;  %6658 = vmatpush3.bf16.xpose.msk.msra.mxu1 %vm7035_vm3, %v6656_v51  ;;  %6365 = vmatprep.mubr.msk.f32.mxu1 %vm6854_vm1, %v6855_v23 }
0x152b   :  { %v4275_v62 = vpop.xlane.xlu1 %4274  ;;  %v4282_v13 = vmul.f32 %v6806_v33, %v6796_v5  ;;  %6659 = vmatprep.subr.bf16.mxu1 %v6853_v20 }
0x152c   :  { %6811 = vrcp.f32 %v4275_v62 }
0x152d   :  { %6366 = vmatmul.mubr.msk.f32.gmra.mrb[152].mxu1 %vm605_vm5, %v4282_v13 }
0x152e   :  { %v6808_v47 = vpop.eup %6807  ;;  %6368 = vmatprep.mubr.msk.f32.mxu1 %vm6854_vm1, %v6855_v23 }
0x152f   :  { %v4283_v9 = vmul.f32 %v6808_v47, %v6798_v46 }
0x1531   :  { %6369 = vmatmul.mubr.msk.f32.gmra.mrb[154].mxu1 %vm605_vm5, %v4283_v9 }
0x1532   :  { %v6810_v40 = vpop.eup %6809  ;;  %6662 = vmatpush3.bf16.xpose.msk.msra.mxu1 %vm7035_vm3, %v6660_v14  ;;  %6371 = vmatprep.mubr.msk.f32.mxu1 %vm6854_vm1, %v6855_v23  ;;  %v4110_v14 = vld [vmem:[%s8953_s7 + $0x18] sm:$0xff] }
0x1533   :  { %v4284_v45 = vmul.f32 %v6810_v40, %v6800_v16  ;;  %6402 = vmatprep.subr.mxu1 %v6855_v23  ;;  %6378 = vmatpush3.msra.mxu0 %v4110_v14 }
0x1534   :  { %6663 = vmatprep.subr.bf16.mxu0 %v6853_v20 }
0x1535   :  { %6372 = vmatmul.mubr.msk.f32.gmra.mrb[156].mxu1 %vm605_vm5, %v4284_v45 }
0x1536   :  { %v6812_v51 = vpop.eup %6811  ;;  %6374 = vmatprep.mubr.msk.f32.mxu1 %vm6854_vm1, %v6855_v23 }
0x1537   :  { %v4285_v60 = vmul.f32 %v6812_v51, %v6802_v2 }
0x1539   :  { %6375 = vmatmul.mubr.msk.f32.gmra.mrb[158].mxu1 %vm605_vm5, %v4285_v60 }
0x153a   :  { %6403 = vmatpush3.xpose.msk.msra.mxu1 %vm484_vm2, %v8583_v1  ;;  %6404 = vmatprep.mubr.msk.f32.mxu1 %vm6854_vm1, %v6855_v23  ;;  %v8778_v1 = vadd.f32 %v8588_v58, %v8684_v19 }
0x153b   :  { %6444 = vmatprep.subr.mxu1 %v6855_v23 }
0x153d   :  { %6405 = vmatmul.mubr.msk.f32.vlgmr.msra.gmra.mrb[160].mxu1 %vm484_vm2, %v8753_v29 }
0x153e   :  { %6407 = vmatprep.mubr.msk.f32.mxu1 %vm6854_vm1, %v6855_v23  ;;  %6445 = vmatpush3.msra.mxu1 %v4110_v14 }
0x1541   :  { %6408 = vmatmul.mubr.msk.f32.gmra.mrb[162].mxu1 %vm484_vm2, %v8762_v26 }
0x1542   :  { %6410 = vmatprep.mubr.msk.f32.mxu1 %vm6854_vm1, %v6855_v23 }
0x1545   :  { %6411 = vmatmul.mubr.msk.f32.gmra.mrb[164].mxu1 %vm484_vm2, %v8770_v42 }
0x1546   :  { %6413 = vmatprep.mubr.msk.f32.mxu1 %vm6854_vm1, %v6855_v23 }
0x1549   :  { %6414 = vmatmul.mubr.msk.f32.gmra.mrb[166].mxu1 %vm484_vm2, %v8778_v1 }
0x154a   :  { %6416 = vmatprep.mubr.msk.f32.mxu1 %vm6854_vm1, %v6855_v23 }
0x154d   :  { %6417 = vmatmul.mubr.msk.f32.gmra.mrb[168].mxu1 %vm484_vm2, %v8786_v61 }
0x154e   :  { %6446 = vmatprep.mubr.msk.f32.mxu1 %vm6854_vm1, %v6855_v23 }
0x15fc   :  { %v4367_v48 = vpop.f32.mrb[150].mxu1 }
0x15fd   :  { %v4391_v44 = vadd.f32 %v4367_v48, %v8595_v15  ;;  %v6364_v19 = vpop.f32.mrb[151].mxu1 }
0x15ff   :  { %v4396_v58 = vsel %vm52_vm6, %v4391_v44, %v4367_v48 }
0x1600   :  { %v4372_v39 = vpop.f32.mrb[152].mxu1  ;;  %6380 = vmatmul.mubr.msk.f32.vlgmr.msra.gmra.mrb[160].mxu0 %vm484_vm2, %v4396_v58 }
0x1601   :  { %v4392_v4 = vadd.f32 %v4372_v39, %v8605_v34  ;;  %6665 = vmatpush3.bf16.msra.mxu0 %v6664_v18  ;;  %v6367_v21 = vpop.f32.mrb[153].mxu1  ;;  %6382 = vmatprep.mubr.msk.f32.mxu0 %vm6854_vm1, %v6855_v23 }
0x1602   :  { %6666 = vmatprep.subr.bf16.mxu0 %v6853_v20 }
0x1604   :  { %v4377_v15 = vpop.f32.mrb[154].mxu1  ;;  %6383 = vmatmul.mubr.msk.f32.gmra.mrb[162].mxu0 %vm484_vm2, %v4392_v4  ;;  %v4401_v4 = vld [vmem:[%s8955_s9] sm:$0xff] }
0x1605   :  { %v4393_v54 = vadd.f32 %v4377_v15, %v8611_v63  ;;  %6668 = vmatpush3.bf16.msra.mxu0 %v6667_v37  ;;  %v6370_v34 = vpop.f32.mrb[155].mxu1  ;;  %6385 = vmatprep.mubr.msk.f32.mxu0 %vm6854_vm1, %v6855_v23 }
0x1606   :  { %6427 = vmatprep.subr.mxu0 %v6855_v23  ;;  %v4402_v34 = vld [vmem:[%s8955_s9 + $0x8] sm:$0xff] }
0x1608   :  { %v4382_v59 = vpop.f32.mrb[156].mxu1  ;;  %6386 = vmatmul.mubr.msk.f32.gmra.mrb[164].mxu0 %vm484_vm2, %v4393_v54 }
0x1609   :  { %v4394_v20 = vadd.f32 %v4382_v59, %v8621_v0  ;;  %6428 = vmatpush3.msra.mxu0 %v4107_v25  ;;  %v6373_v63 = vpop.f32.mrb[157].mxu1  ;;  %6388 = vmatprep.mubr.msk.f32.mxu0 %vm6854_vm1, %v6855_v23 }
0x160a   :  { %v4403_v63 = vld [vmem:[%s8955_s9 + $0x10] sm:$0xff] }
0x160c   :  { %v4387_v50 = vpop.f32.mrb[158].mxu1  ;;  %6389 = vmatmul.mubr.msk.f32.gmra.mrb[166].mxu0 %vm484_vm2, %v4394_v20 }
0x160d   :  { %v4395_v5 = vadd.f32 %v4387_v50, %v8627_v35  ;;  %v6376_v49 = vpop.f32.mrb[159].mxu1  ;;  %6391 = vmatprep.mubr.msk.f32.mxu0 %vm6854_vm1, %v6855_v23 }
0x1610   :  { %6392 = vmatmul.mubr.msk.f32.gmra.mrb[168].mxu0 %vm484_vm2, %v4395_v5  ;;  %v4617_v24 = vpop.f32.mrb[160].mxu1 }
0x1611   :  { %v4618_v22 = vadd.f32 %v4617_v24, %v7144_v7  ;;  %v6406_v0 = vpop.f32.mrb[161].mxu1  ;;  %6429 = vmatprep.mubr.msk.f32.mxu0 %vm6854_vm1, %v6855_v23  ;;  %v4404_v24 = vld [vmem:[%s8955_s9 + $0x18] sm:$0xff] }
0x1613   :  { %v4641_v46 = vsel %vm605_vm5, %v4618_v22, -inf }
0x1614   :  { %4642 = vmax.xlane.f32.xlu0 %v4641_v46  ;;  %v4622_v11 = vpop.f32.mrb[162].mxu1 }
0x1615   :  { %v4623_v16 = vadd.f32 %v4622_v11, %v7144_v7  ;;  %v6409_v35 = vpop.f32.mrb[163].mxu1  ;;  %v4405_v11 = vld [vmem:[%s8955_s9 + $0x20] sm:$0xff] }
0x1617   :  { %v4644_v3 = vsel %vm605_vm5, %v4623_v16, -inf }
0x1618   :  { %4645 = vmax.xlane.f32.xlu1 %v4644_v3  ;;  %v4627_v2 = vpop.f32.mrb[164].mxu1 }
0x1619   :  { %v4628_v52 = vadd.f32 %v4627_v2, %v7144_v7  ;;  %v6412_v6 = vpop.f32.mrb[165].mxu1 }
0x161b   :  { %v4647_v43 = vsel %vm605_vm5, %v4628_v52, -inf }
0x161c   :  { %4648 = vmax.xlane.f32.xlu0 %v4647_v43  ;;  %v4632_v53 = vpop.f32.mrb[166].mxu1 }
0x161d   :  { %v4633_v8 = vadd.f32 %v4632_v53, %v7144_v7  ;;  %v6415_v17 = vpop.f32.mrb[167].mxu1 }
0x161f   :  { %v4650_v28 = vsel %vm605_vm5, %v4633_v8, -inf }
0x1620   :  { %4651 = vmax.xlane.f32.xlu1 %v4650_v28  ;;  %v4637_v30 = vpop.f32.mrb[168].mxu1 }
0x1621   :  { %v4638_v18 = vadd.f32 %v4637_v30, %v7144_v7  ;;  %v6418_v27 = vpop.f32.mrb[169].mxu1 }
0x1623   :  { %v4653_v55 = vsel %vm605_vm5, %v4638_v18, -inf }
0x1624   :  { %4654 = vmax.xlane.f32.xlu0 %v4653_v55 }
0x16a1   :  { %v4643_v57 = vpop.xlane.xlu0 %4642 }
0x16a2   :  { %v4656_v36 = vsub.f32 %v4618_v22, %v4643_v57 }
0x16a4   :  { %v4661_v37 = vmul.f32 1.442695, %v4656_v36 }
0x16a5   :  { %v4646_v12 = vpop.xlane.xlu1 %4645 }
0x16a6   :  { %6813 = vpow2.f32 %v4661_v37  ;;  %v4657_v10 = vsub.f32 %v4623_v16, %v4646_v12 }
0x16a8   :  { %v4663_v32 = vmul.f32 1.442695, %v4657_v10 }
0x16a9   :  { %v4649_v31 = vpop.xlane.xlu0 %4648 }
0x16aa   :  { %6815 = vpow2.f32 %v4663_v32  ;;  %v4658_v38 = vsub.f32 %v4628_v52, %v4649_v31 }
0x16ac   :  { %v4665_v56 = vmul.f32 1.442695, %v4658_v38 }
0x16ad   :  { %v4652_v33 = vpop.xlane.xlu1 %4651 }
0x16ae   :  { %6817 = vpow2.f32 %v4665_v56  ;;  %v4659_v62 = vsub.f32 %v4633_v8, %v4652_v33 }
0x16b0   :  { %v6814_v13 = vpop.eup %6813  ;;  %v4667_v7 = vmul.f32 1.442695, %v4659_v62 }
0x16b1   :  { %v4655_v47 = vpop.xlane.xlu0 %4654  ;;  %v4671_v9 = vsel %vm605_vm5, %v6814_v13, 0.0 }
0x16b2   :  { %6819 = vpow2.f32 %v4667_v7  ;;  %v4660_v40 = vsub.f32 %v4638_v18, %v4655_v47  ;;  %4672 = vadd.xlane.f32.xlu1 %v4671_v9 }
0x16b4   :  { %v6816_v45 = vpop.eup %6815  ;;  %v4669_v51 = vmul.f32 1.442695, %v4660_v40 }
0x16b5   :  { %v4674_v60 = vsel %vm605_vm5, %v6816_v45, 0.0 }
0x16b6   :  { %6821 = vpow2.f32 %v4669_v51  ;;  %4675 = vadd.xlane.f32.xlu0 %v4674_v60 }
0x16b8   :  { %v6818_v14 = vpop.eup %6817 }
0x16b9   :  { %v4677_v48 = vsel %vm605_vm5, %v6818_v14, 0.0 }
0x16ba   :  { %4678 = vadd.xlane.f32.xlu1 %v4677_v48  ;;  %v4813_v48 = vld [vmem:[%s8955_s9 + $0x38] sm:$0xff] }
0x16bc   :  { %v6820_v44 = vpop.eup %6819 }
0x16bd   :  { %v4680_v19 = vsel %vm605_vm5, %v6820_v44, 0.0 }
0x16be   :  { %4681 = vadd.xlane.f32.xlu0 %v4680_v19 }
0x16c0   :  { %v6822_v58 = vpop.eup %6821 }
0x16c1   :  { %v4683_v39 = vsel %vm605_vm5, %v6822_v58, 0.0 }
0x16c2   :  { %4684 = vadd.xlane.f32.xlu1 %v4683_v39  ;;  %v4814_v39 = vld [vmem:[%s8955_s9 + $0x40] sm:$0xff] }
0x16d3   :  { %v4487_v21 = vpop.f32.mrb[160].mxu0 }
0x16d4   :  { %v4511_v15 = vadd.f32 %v4487_v21, %v4401_v4  ;;  %v6381_v54 = vpop.f32.mrb[161].mxu0 }
0x16d5   :  { %v4815_v54 = vld [vmem:[%s8955_s9 + $0x48] sm:$0xff] }
0x16d6   :  { %4516 = vst.msk [vmem:[%s8955_s9] sm:$0xff] %vm64_vm0, %v4511_v15 }
0x16d7   :  { %v4492_v25 = vpop.f32.mrb[162].mxu0 }
0x16d8   :  { %v4512_v59 = vadd.f32 %v4492_v25, %v4402_v34  ;;  %v6384_v20 = vpop.f32.mrb[163].mxu0 }
0x16da   :  { %4517 = vst.msk [vmem:[%s8955_s9 + $0x8] sm:$0xff] %vm64_vm0, %v4512_v59 }
0x16db   :  { %v4497_v50 = vpop.f32.mrb[164].mxu0 }
0x16dc   :  { %v4513_v5 = vadd.f32 %v4497_v50, %v4403_v63  ;;  %v6387_v49 = vpop.f32.mrb[165].mxu0 }
0x16de   :  { %4518 = vst.msk [vmem:[%s8955_s9 + $0x10] sm:$0xff] %vm64_vm0, %v4513_v5 }
0x16df   :  { %v4502_v22 = vpop.f32.mrb[166].mxu0 }
0x16e0   :  { %v4514_v0 = vadd.f32 %v4502_v22, %v4404_v24  ;;  %v6390_v46 = vpop.f32.mrb[167].mxu0 }
0x16e2   :  { %4519 = vst.msk [vmem:[%s8955_s9 + $0x18] sm:$0xff] %vm64_vm0, %v4514_v0 }
0x16e3   :  { %v4507_v16 = vpop.f32.mrb[168].mxu0 }
0x16e4   :  { %v4515_v35 = vadd.f32 %v4507_v16, %v4405_v11  ;;  %v6393_v3 = vpop.f32.mrb[169].mxu0 }
0x16e6   :  { %4520 = vst.msk [vmem:[%s8955_s9 + $0x20] sm:$0xff] %vm64_vm0, %v4515_v35 }
0x173f   :  { %v4673_v2 = vpop.xlane.xlu1 %4672 }
0x1740   :  { %6823 = vrcp.f32 %v4673_v2 }
0x1743   :  { %v4676_v52 = vpop.xlane.xlu0 %4675 }
0x1744   :  { %6825 = vrcp.f32 %v4676_v52 }
0x1747   :  { %v4679_v6 = vpop.xlane.xlu1 %4678 }
0x1748   :  { %6827 = vrcp.f32 %v4679_v6 }
0x174a   :  { %v6824_v43 = vpop.eup %6823 }
0x174b   :  { %v4691_v53 = vmul.f32 %v6824_v43, %v6814_v13  ;;  %v4682_v8 = vpop.xlane.xlu0 %4681 }
0x174c   :  { %6829 = vrcp.f32 %v4682_v8 }
0x174d   :  { %6430 = vmatmul.mubr.msk.f32.vlgmr.msra.gmra.mrb[170].mxu0 %vm605_vm5, %v4691_v53 }
0x174e   :  { %v6826_v17 = vpop.eup %6825  ;;  %6432 = vmatprep.mubr.msk.f32.mxu0 %vm6854_vm1, %v6855_v23 }
0x174f   :  { %v4685_v28 = vpop.xlane.xlu1 %4684  ;;  %v4692_v30 = vmul.f32 %v6826_v17, %v6816_v45 }
0x1750   :  { %6831 = vrcp.f32 %v4685_v28 }
0x1751   :  { %6433 = vmatmul.mubr.msk.f32.gmra.mrb[172].mxu0 %vm605_vm5, %v4692_v30 }
0x1752   :  { %v6828_v18 = vpop.eup %6827  ;;  %6435 = vmatprep.mubr.msk.f32.mxu0 %vm6854_vm1, %v6855_v23 }
0x1753   :  { %v4693_v27 = vmul.f32 %v6828_v18, %v6818_v14 }
0x1755   :  { %6436 = vmatmul.mubr.msk.f32.gmra.mrb[174].mxu0 %vm605_vm5, %v4693_v27 }
0x1756   :  { %v6830_v55 = vpop.eup %6829  ;;  %6438 = vmatprep.mubr.msk.f32.mxu0 %vm6854_vm1, %v6855_v23 }
0x1757   :  { %v4694_v57 = vmul.f32 %v6830_v55, %v6820_v44 }
0x1759   :  { %6439 = vmatmul.mubr.msk.f32.gmra.mrb[176].mxu0 %vm605_vm5, %v4694_v57 }
0x175a   :  { %v6832_v36 = vpop.eup %6831  ;;  %6441 = vmatprep.mubr.msk.f32.mxu0 %vm6854_vm1, %v6855_v23 }
0x175b   :  { %v4695_v37 = vmul.f32 %v6832_v36, %v6822_v58 }
0x175d   :  { %6442 = vmatmul.mubr.msk.f32.gmra.mrb[178].mxu0 %vm605_vm5, %v4695_v37 }
0x1820   :  { %v4777_v12 = vpop.f32.mrb[170].mxu0 }
0x1821   :  { %v4801_v10 = vadd.f32 %v4777_v12, %v8753_v29  ;;  %v6431_v32 = vpop.f32.mrb[171].mxu0 }
0x1823   :  { %v4806_v31 = vsel %vm52_vm6, %v4801_v10, %v4777_v12 }
0x1824   :  { %v4782_v38 = vpop.f32.mrb[172].mxu0  ;;  %6447 = vmatmul.mubr.msk.f32.vlgmr.msra.gmra.mrb[170].mxu1 %vm484_vm2, %v4806_v31 }
0x1825   :  { %v4802_v56 = vadd.f32 %v4782_v38, %v8762_v26  ;;  %v6434_v33 = vpop.f32.mrb[173].mxu0  ;;  %6449 = vmatprep.mubr.msk.f32.mxu1 %vm6854_vm1, %v6855_v23 }
0x1828   :  { %v4787_v62 = vpop.f32.mrb[174].mxu0  ;;  %6450 = vmatmul.mubr.msk.f32.gmra.mrb[172].mxu1 %vm484_vm2, %v4802_v56 }
0x1829   :  { %v4803_v13 = vadd.f32 %v4787_v62, %v8770_v42  ;;  %v6437_v7 = vpop.f32.mrb[175].mxu0  ;;  %6452 = vmatprep.mubr.msk.f32.mxu1 %vm6854_vm1, %v6855_v23  ;;  %v4811_v42 = vld [vmem:[%s8955_s9 + $0x28] sm:$0xff] }
0x182c   :  { %v4792_v41 = vpop.f32.mrb[176].mxu0  ;;  %6453 = vmatmul.mubr.msk.f32.gmra.mrb[174].mxu1 %vm484_vm2, %v4803_v13 }
0x182d   :  { %v4804_v29 = vadd.f32 %v4792_v41, %v8778_v1  ;;  %v6440_v47 = vpop.f32.mrb[177].mxu0  ;;  %6455 = vmatprep.mubr.msk.f32.mxu1 %vm6854_vm1, %v6855_v23 }
0x1830   :  { %v4797_v26 = vpop.f32.mrb[178].mxu0  ;;  %6456 = vmatmul.mubr.msk.f32.gmra.mrb[176].mxu1 %vm484_vm2, %v4804_v29 }
0x1831   :  { %v4805_v9 = vadd.f32 %v4797_v26, %v8786_v61  ;;  %v6443_v40 = vpop.f32.mrb[179].mxu0  ;;  %6458 = vmatprep.mubr.msk.f32.mxu1 %vm6854_vm1, %v6855_v23  ;;  %v4812_v61 = vld [vmem:[%s8955_s9 + $0x30] sm:$0xff] }
0x1834   :  { %6459 = vmatmul.mubr.msk.f32.gmra.mrb[178].mxu1 %vm484_vm2, %v4805_v9 }
0x18f7   :  { %v4897_v1 = vpop.f32.mrb[170].mxu1 }
0x18f8   :  { %v4921_v45 = vadd.f32 %v4897_v1, %v4811_v42  ;;  %v6448_v51 = vpop.f32.mrb[171].mxu1 }
0x18fa   :  { %4926 = vst.msk [vmem:[%s8955_s9 + $0x28] sm:$0xff] %vm64_vm0, %v4921_v45 }
0x18fb   :  { %v4902_v60 = vpop.f32.mrb[172].mxu1 }
0x18fc   :  { %v4922_v23 = vadd.f32 %v4902_v60, %v4812_v61  ;;  %v6451_v14 = vpop.f32.mrb[173].mxu1 }
0x18fe   :  { %4927 = vst.msk [vmem:[%s8955_s9 + $0x30] sm:$0xff] %vm64_vm0, %v4922_v23 }
0x18ff   :  { %v4907_v44 = vpop.f32.mrb[174].mxu1 }
0x1900   :  { %v4923_v19 = vadd.f32 %v4907_v44, %v4813_v48  ;;  %v6454_v58 = vpop.f32.mrb[175].mxu1 }
0x1902   :  { %4928 = vst.msk [vmem:[%s8955_s9 + $0x38] sm:$0xff] %vm64_vm0, %v4923_v19 }
0x1903   :  { %v4912_v4 = vpop.f32.mrb[176].mxu1 }
0x1904   :  { %v4924_v21 = vadd.f32 %v4912_v4, %v4814_v39  ;;  %v6457_v15 = vpop.f32.mrb[177].mxu1 }
0x1906   :  { %4929 = vst.msk [vmem:[%s8955_s9 + $0x40] sm:$0xff] %vm64_vm0, %v4924_v21 }
0x1907   :  { %v4917_v34 = vpop.f32.mrb[178].mxu1 }
0x1908   :  { %v4925_v25 = vadd.f32 %v4917_v34, %v4815_v54  ;;  %v6460_v59 = vpop.f32.mrb[179].mxu1 }
0x190a   :  { %4930 = vst.msk [vmem:[%s8955_s9 + $0x48] sm:$0xff] %vm64_vm0, %v4925_v25 }

</bundles_post_ra>
